<compile_context>
chip_gen: v5e
topology: v5e:2x2
jax: 0.10.0
libtpu: 0.0.40
codegen_flags: <defaults>
</compile_context>

<pallas_src>
import functools
import math

import jax
import jax.numpy as jnp
from jax.experimental import pallas as pl
from jax.experimental.pallas import tpu as pltpu

# ---- scaled-down Longformer-style config (lane-dense hidden dim) ----
VOCAB = 50
MAX_POS = 64
HIDDEN = 128          # lane-dense (multiple of 128)
N_LAYERS = 2
N_HEADS = 4
HEAD_DIM = HIDDEN // N_HEADS
INTERMEDIATE = 256
WINDOW = 4            # attention_window: WINDOW//2 tokens attended on each side
PAD_ID = 1            # Longformer pad / position padding_idx
EPS = 1e-5
NEG = -1e9            # finite "minus infinity" (as HF uses finfo.min)


# ---------------- in-kernel helpers ----------------

def _gelu(y):
    # tanh-approximate GELU
    # TODO(synk): HF Longformer uses exact erf GELU; tanh approx has tiny drift.
    return 0.5 * y * (1.0 + jnp.tanh(0.7978845608028654 * (y + 0.044715 * y * y * y)))


def _layernorm(x, g, b):
    mean = jnp.mean(x, axis=-1, keepdims=True)
    var = jnp.mean(jnp.square(x - mean), axis=-1, keepdims=True)
    return (x - mean) * jax.lax.rsqrt(var + EPS) * g + b


# ---------------- fused encoder-layer kernel ----------------

def _layer_kernel(x_ref, mask_ref,
                  qkv_w_ref, qkv_b_ref, o_w_ref, o_b_ref,
                  ln1_g_ref, ln1_b_ref,
                  fc1_w_ref, fc1_b_ref, fc2_w_ref, fc2_b_ref,
                  ln2_g_ref, ln2_b_ref,
                  out_ref):
    S = x_ref.shape[1]
    x = x_ref[0].astype(jnp.float32)                                   # (S, H)

    # fused QKV projection: one [S,H] x [H,3H] matmul
    qkv = jnp.dot(x, qkv_w_ref[...], preferred_element_type=jnp.float32)
    qkv = qkv + qkv_b_ref[...]
    q = qkv[:, 0:HIDDEN]
    k = qkv[:, HIDDEN:2 * HIDDEN]
    v = qkv[:, 2 * HIDDEN:3 * HIDDEN]

    # sliding-window + key-padding bias, built in-kernel (no SxS DMA)
    row = jax.lax.broadcasted_iota(jnp.int32, (S, S), 0)
    col = jax.lax.broadcasted_iota(jnp.int32, (S, S), 1)
    local = jnp.abs(row - col) <= (WINDOW // 2)
    key_ok = mask_ref[0] > 0.5                                         # (1, S)
    bias = jnp.where(local & key_ok, 0.0, NEG).astype(jnp.float32)     # (S, S)

    # per-head attention on VMEM-resident slices (statically unrolled)
    scale = 1.0 / math.sqrt(HEAD_DIM)
    ctx_heads = []
    for h in range(N_HEADS):
        lo, hi = h * HEAD_DIM, (h + 1) * HEAD_DIM
        qh, kh, vh = q[:, lo:hi], k[:, lo:hi], v[:, lo:hi]
        s = jnp.dot(qh, kh.T, preferred_element_type=jnp.float32) * scale + bias
        m = jnp.max(s, axis=-1, keepdims=True)
        p = jnp.exp(s - m)
        denom = jnp.sum(p, axis=-1, keepdims=True)
        p = p * pl.reciprocal(denom, approx=True)
        ctx_heads.append(jnp.dot(p, vh, preferred_element_type=jnp.float32))
    ctx = jnp.concatenate(ctx_heads, axis=-1)                          # (S, H)

    # output projection + residual + LayerNorm (fused epilogue)
    attn_out = jnp.dot(ctx, o_w_ref[...], preferred_element_type=jnp.float32)
    attn_out = attn_out + o_b_ref[...]
    h1 = _layernorm(attn_out + x, ln1_g_ref[...], ln1_b_ref[...])

    # FFN (GELU) + residual + LayerNorm (fused epilogue)
    ff = jnp.dot(h1, fc1_w_ref[...], preferred_element_type=jnp.float32)
    ff = _gelu(ff + fc1_b_ref[...])
    ff = jnp.dot(ff, fc2_w_ref[...], preferred_element_type=jnp.float32)
    ff = ff + fc2_b_ref[...]
    out = _layernorm(ff + h1, ln2_g_ref[...], ln2_b_ref[...])

    out_ref[0] = out.astype(out_ref.dtype)


def layer_forward(h, mask_f, lyr):
    """h: [B, S, H]; mask_f: [B, 1, S] float; lyr: per-layer param dict."""
    B, S, H = h.shape
    args = (h, mask_f,
            lyr["qkv_w"], lyr["qkv_b"], lyr["o_w"], lyr["o_b"],
            lyr["ln1_g"], lyr["ln1_b"],
            lyr["fc1_w"], lyr["fc1_b"], lyr["fc2_w"], lyr["fc2_b"],
            lyr["ln2_g"], lyr["ln2_b"])
    in_specs = [pl.BlockSpec((1, S, H), lambda b: (b, 0, 0)),      # hidden state
                pl.BlockSpec((1, 1, S), lambda b: (b, 0, 0))]      # key mask
    # all weights/biases are 2-D full-array blocks, batch-invariant
    in_specs += [pl.BlockSpec(a.shape, lambda b: (0, 0)) for a in args[2:]]
    return pl.pallas_call(
        _layer_kernel,
        out_shape=jax.ShapeDtypeStruct((B, S, H), h.dtype),
        grid=(B,),
        in_specs=in_specs,
        out_specs=pl.BlockSpec((1, S, H), lambda b: (b, 0, 0)),
        compiler_params=pltpu.CompilerParams(dimension_semantics=("parallel",)),
    )(*args)


# ---------------- embedding LayerNorm kernel ----------------

def _ln_kernel(x_ref, g_ref, b_ref, o_ref):
    x = x_ref[...].astype(jnp.float32)
    o_ref[...] = _layernorm(x, g_ref[...], b_ref[...]).astype(o_ref.dtype)


def layer_norm(x, g, b):
    M, H = x.shape
    return pl.pallas_call(
        _ln_kernel,
        out_shape=jax.ShapeDtypeStruct((M, H), x.dtype),
        grid=(1,),
        in_specs=[pl.BlockSpec((M, H), lambda i: (0, 0)),
                  pl.BlockSpec((1, H), lambda i: (0, 0)),
                  pl.BlockSpec((1, H), lambda i: (0, 0))],
        out_specs=pl.BlockSpec((M, H), lambda i: (0, 0)),
    )(x, g, b)


# ---------------- pooler kernel (dense + tanh) ----------------

def _pooler_kernel(x_ref, w_ref, b_ref, o_ref):
    y = jnp.dot(x_ref[...], w_ref[...], preferred_element_type=jnp.float32)
    o_ref[...] = jnp.tanh(y + b_ref[...]).astype(o_ref.dtype)


def pooler(x, w, b):
    M, K = x.shape
    O = w.shape[1]
    return pl.pallas_call(
        _pooler_kernel,
        out_shape=jax.ShapeDtypeStruct((M, O), x.dtype),
        grid=(1,),
        in_specs=[pl.BlockSpec((M, K), lambda i: (0, 0)),
                  pl.BlockSpec((K, O), lambda i: (0, 0)),
                  pl.BlockSpec((1, O), lambda i: (0, 0))],
        out_specs=pl.BlockSpec((M, O), lambda i: (0, 0)),
    )(x, w, b)


# ---------------- parameters (deterministic synthetic init) ----------------

def init_params(key):
    def nrm(k, shape, scale=0.02):
        return scale * jax.random.normal(k, shape, jnp.float32)

    keys = iter(jax.random.split(key, 64))
    params = {
        "word_emb": nrm(next(keys), (VOCAB, HIDDEN)),
        "pos_emb": nrm(next(keys), (MAX_POS, HIDDEN)),
        "tok_emb": nrm(next(keys), (1, HIDDEN)),
        "emb_ln_g": jnp.ones((1, HIDDEN), jnp.float32),
        "emb_ln_b": jnp.zeros((1, HIDDEN), jnp.float32),
        "pool_w": nrm(next(keys), (HIDDEN, HIDDEN)),
        "pool_b": jnp.zeros((1, HIDDEN), jnp.float32),
        "layers": [],
    }
    for _ in range(N_LAYERS):
        params["layers"].append({
            "qkv_w": nrm(next(keys), (HIDDEN, 3 * HIDDEN)),          # fused Q|K|V
            "qkv_b": jnp.zeros((1, 3 * HIDDEN), jnp.float32),
            "o_w": nrm(next(keys), (HIDDEN, HIDDEN)),
            "o_b": jnp.zeros((1, HIDDEN), jnp.float32),
            "ln1_g": jnp.ones((1, HIDDEN), jnp.float32),
            "ln1_b": jnp.zeros((1, HIDDEN), jnp.float32),
            "fc1_w": nrm(next(keys), (HIDDEN, INTERMEDIATE)),
            "fc1_b": jnp.zeros((1, INTERMEDIATE), jnp.float32),
            "fc2_w": nrm(next(keys), (INTERMEDIATE, HIDDEN)),
            "fc2_b": jnp.zeros((1, HIDDEN), jnp.float32),
            "ln2_g": jnp.ones((1, HIDDEN), jnp.float32),
            "ln2_b": jnp.zeros((1, HIDDEN), jnp.float32),
        })
    return params


# ---------------- forward (LongFo.forward equivalent) ----------------

def longfo_forward(params, ip, mask):
    """ip: [B, S] int ids; mask: [B, S] {0,1}. Returns (last_hidden_state, pooler_output)."""
    B, S = ip.shape
    ip = ip.astype(jnp.int32)

    # Longformer position ids: cumsum over non-pad tokens, offset by padding_idx.
    not_pad = (ip != PAD_ID).astype(jnp.int32)
    pos_ids = jnp.cumsum(not_pad, axis=1) * not_pad + PAD_ID

    h = (jnp.take(params["word_emb"], ip, axis=0)
         + jnp.take(params["pos_emb"], pos_ids, axis=0)
         + params["tok_emb"][0])
    h = layer_norm(h.reshape(B * S, HIDDEN),
                   params["emb_ln_g"], params["emb_ln_b"]).reshape(B, S, HIDDEN)

    # key-padding mask, passed to the fused layer kernel as a tiny [B,1,S] block
    mask_f = mask.astype(jnp.float32).reshape(B, 1, S)

    for lyr in params["layers"]:
        h = layer_forward(h, mask_f, lyr)

    last_hidden_state = h
    cls = h[:, 0, :]
    pooler_output = pooler(cls, params["pool_w"], params["pool_b"])
    return last_hidden_state, pooler_output


if __name__ == "__main__":
    key = jax.random.PRNGKey(0)
    pkey, dkey = jax.random.split(key)
    params = init_params(pkey)

    B, S = 2, 16
    ip = jax.random.randint(dkey, (B, S), 2, VOCAB, dtype=jnp.int32)
    ip = ip.at[1, -3:].set(PAD_ID)                 # pad tail of second sequence
    mask = (ip != PAD_ID).astype(jnp.int32)

    fwd = jax.jit(longfo_forward)
    last_hidden, pooled = fwd(params, ip, mask)
    jax.block_until_ready((last_hidden, pooled))
    assert last_hidden.shape == (B, S, HIDDEN) and pooled.shape == (B, HIDDEN)
    print("KERNEL_OK")
</pallas_src>

<mosaic_0001>
module attributes {stable_mosaic.version = 11 : i64} {
  func.func @_ln_kernel(%arg0: i32, %arg1: memref<32x128xf32, #tpu.memory_space<vmem>>, %arg2: memref<1x128xf32, #tpu.memory_space<vmem>>, %arg3: memref<1x128xf32, #tpu.memory_space<vmem>>, %arg4: memref<32x128xf32, #tpu.memory_space<vmem>>) attributes {dimension_semantics = [#tpu.dimension_semantics<arbitrary>], iteration_bounds = array<i64: 1>, scalar_prefetch = 0 : i64, scratch_operands = 0 : i64, tpu.core_type = #tpu.core_type<tc>, window_params = [{pipeline_mode = #tpu.pipeline_mode<synchronous>, transform_indices = @transform_0, window_bounds = array<i64: 32, 128>}, {pipeline_mode = #tpu.pipeline_mode<synchronous>, transform_indices = @transform_1, window_bounds = array<i64: 1, 128>}, {pipeline_mode = #tpu.pipeline_mode<synchronous>, transform_indices = @transform_2, window_bounds = array<i64: 1, 128>}, {pipeline_mode = #tpu.pipeline_mode<synchronous>, transform_indices = @transform_3, window_bounds = array<i64: 32, 128>}]} {
    %c0 = arith.constant 0 : index
    %c0_0 = arith.constant 0 : index
    %0 = vector.load %arg1[%c0, %c0_0] : memref<32x128xf32, #tpu.memory_space<vmem>>, vector<32x128xf32>
    %c0_1 = arith.constant 0 : index
    %c0_2 = arith.constant 0 : index
    %1 = vector.load %arg2[%c0_1, %c0_2] : memref<1x128xf32, #tpu.memory_space<vmem>>, vector<1x128xf32>
    %c0_3 = arith.constant 0 : index
    %c0_4 = arith.constant 0 : index
    %2 = vector.load %arg3[%c0_3, %c0_4] : memref<1x128xf32, #tpu.memory_space<vmem>>, vector<1x128xf32>
    %cst = arith.constant dense<0.000000e+00> : vector<32xf32>
    %3 = vector.multi_reduction <add>, %0, %cst [1] : vector<32x128xf32> to vector<32xf32>
    %4 = vector.shape_cast %3 : vector<32xf32> to vector<32x1xf32>
    %cst_5 = arith.constant 1.280000e+02 : f32
    %5 = vector.broadcast %cst_5 : f32 to vector<32x1xf32>
    %6 = arith.divf %4, %5 : vector<32x1xf32>
    %7 = vector.broadcast %6 : vector<32x1xf32> to vector<32x128xf32>
    %8 = arith.subf %0, %7 : vector<32x128xf32>
    %9 = arith.mulf %8, %8 : vector<32x128xf32>
    %cst_6 = arith.constant dense<0.000000e+00> : vector<32xf32>
    %10 = vector.multi_reduction <add>, %9, %cst_6 [1] : vector<32x128xf32> to vector<32xf32>
    %11 = vector.shape_cast %10 : vector<32xf32> to vector<32x1xf32>
    %cst_7 = arith.constant 1.280000e+02 : f32
    %12 = vector.broadcast %cst_7 : f32 to vector<32x1xf32>
    %13 = arith.divf %11, %12 : vector<32x1xf32>
    %14 = vector.broadcast %6 : vector<32x1xf32> to vector<32x128xf32>
    %15 = arith.subf %0, %14 : vector<32x128xf32>
    %cst_8 = arith.constant 9.99999974E-6 : f32
    %16 = vector.broadcast %cst_8 : f32 to vector<32x1xf32>
    %17 = arith.addf %13, %16 : vector<32x1xf32>
    %18 = math.rsqrt %17 : vector<32x1xf32>
    %19 = vector.broadcast %18 : vector<32x1xf32> to vector<32x128xf32>
    %20 = arith.mulf %15, %19 : vector<32x128xf32>
    %21 = vector.broadcast %1 : vector<1x128xf32> to vector<32x128xf32>
    %22 = arith.mulf %20, %21 : vector<32x128xf32>
    %23 = vector.broadcast %2 : vector<1x128xf32> to vector<32x128xf32>
    %24 = arith.addf %22, %23 : vector<32x128xf32>
    %c0_9 = arith.constant 0 : index
    %c0_10 = arith.constant 0 : index
    %25 = vector.load %arg4[%c0_9, %c0_10] : memref<32x128xf32, #tpu.memory_space<vmem>>, vector<32x128xf32>
    tpu.vector_store %arg4[%c0_9, %c0_10], %24 {strides = array<i32>} : memref<32x128xf32, #tpu.memory_space<vmem>>, vector<32x128xf32>,
    return
  }
  func.func @transform_0(%arg0: i32) -> (i32, i32) {
    %c0_i32 = arith.constant 0 : i32
    %c0_i32_0 = arith.constant 0 : i32
    %c0_i32_1 = arith.constant 0 : i32
    return %c0_i32, %c0_i32_0 : i32, i32
  }
  func.func @transform_1(%arg0: i32) -> (i32, i32) {
    %c0_i32 = arith.constant 0 : i32
    %c0_i32_0 = arith.constant 0 : i32
    %c0_i32_1 = arith.constant 0 : i32
    return %c0_i32, %c0_i32_0 : i32, i32
  }
  func.func @transform_2(%arg0: i32) -> (i32, i32) {
    %c0_i32 = arith.constant 0 : i32
    %c0_i32_0 = arith.constant 0 : i32
    %c0_i32_1 = arith.constant 0 : i32
    return %c0_i32, %c0_i32_0 : i32, i32
  }
  func.func @transform_3(%arg0: i32) -> (i32, i32) {
    %c0_i32 = arith.constant 0 : i32
    %c0_i32_0 = arith.constant 0 : i32
    %c0_i32_1 = arith.constant 0 : i32
    return %c0_i32, %c0_i32_0 : i32, i32
  }
}

module attributes {stable_mosaic.version = 11 : i64} {
  func.func @_layer_kernel(%arg0: i32, %arg1: memref<1x16x128xf32, #tpu.memory_space<vmem>>, %arg2: memref<1x1x16xf32, #tpu.memory_space<vmem>>, %arg3: memref<128x384xf32, #tpu.memory_space<vmem>>, %arg4: memref<1x384xf32, #tpu.memory_space<vmem>>, %arg5: memref<128x128xf32, #tpu.memory_space<vmem>>, %arg6: memref<1x128xf32, #tpu.memory_space<vmem>>, %arg7: memref<1x128xf32, #tpu.memory_space<vmem>>, %arg8: memref<1x128xf32, #tpu.memory_space<vmem>>, %arg9: memref<128x256xf32, #tpu.memory_space<vmem>>, %arg10: memref<1x256xf32, #tpu.memory_space<vmem>>, %arg11: memref<256x128xf32, #tpu.memory_space<vmem>>, %arg12: memref<1x128xf32, #tpu.memory_space<vmem>>, %arg13: memref<1x128xf32, #tpu.memory_space<vmem>>, %arg14: memref<1x128xf32, #tpu.memory_space<vmem>>, %arg15: memref<1x16x128xf32, #tpu.memory_space<vmem>>) attributes {dimension_semantics = [#tpu.dimension_semantics<parallel>], iteration_bounds = array<i64: 2>, scalar_prefetch = 0 : i64, scratch_operands = 0 : i64, tpu.core_type = #tpu.core_type<tc>, window_params = [{transform_indices = @transform_0, window_bounds = array<i64: 1, 16, 128>}, {transform_indices = @transform_1, window_bounds = array<i64: 1, 1, 16>}, {pipeline_mode = #tpu.pipeline_mode<synchronous>, transform_indices = @transform_2, window_bounds = array<i64: 128, 384>}, {pipeline_mode = #tpu.pipeline_mode<synchronous>, transform_indices = @transform_3, window_bounds = array<i64: 1, 384>}, {pipeline_mode = #tpu.pipeline_mode<synchronous>, transform_indices = @transform_4, window_bounds = array<i64: 128, 128>}, {pipeline_mode = #tpu.pipeline_mode<synchronous>, transform_indices = @transform_5, window_bounds = array<i64: 1, 128>}, {pipeline_mode = #tpu.pipeline_mode<synchronous>, transform_indices = @transform_6, window_bounds = array<i64: 1, 128>}, {pipeline_mode = #tpu.pipeline_mode<synchronous>, transform_indices = @transform_7, window_bounds = array<i64: 1, 128>}, {pipeline_mode = #tpu.pipeline_mode<synchronous>, transform_indices = @transform_8, window_bounds = array<i64: 128, 256>}, {pipeline_mode = #tpu.pipeline_mode<synchronous>, transform_indices = @transform_9, window_bounds = array<i64: 1, 256>}, {pipeline_mode = #tpu.pipeline_mode<synchronous>, transform_indices = @transform_10, window_bounds = array<i64: 256, 128>}, {pipeline_mode = #tpu.pipeline_mode<synchronous>, transform_indices = @transform_11, window_bounds = array<i64: 1, 128>}, {pipeline_mode = #tpu.pipeline_mode<synchronous>, transform_indices = @transform_12, window_bounds = array<i64: 1, 128>}, {pipeline_mode = #tpu.pipeline_mode<synchronous>, transform_indices = @transform_13, window_bounds = array<i64: 1, 128>}, {transform_indices = @transform_14, window_bounds = array<i64: 1, 16, 128>}]} {
    %c0 = arith.constant 0 : index
    %c0_0 = arith.constant 0 : index
    %c0_1 = arith.constant 0 : index
    %0 = vector.load %arg1[%c0, %c0_0, %c0_1] : memref<1x16x128xf32, #tpu.memory_space<vmem>>, vector<1x16x128xf32>
    %1 = vector.shape_cast %0 : vector<1x16x128xf32> to vector<16x128xf32>
    %c0_2 = arith.constant 0 : index
    %c0_3 = arith.constant 0 : index
    %2 = vector.load %arg3[%c0_2, %c0_3] : memref<128x384xf32, #tpu.memory_space<vmem>>, vector<128x384xf32>
    %cst = arith.constant dense<0.000000e+00> : vector<16x384xf32>
    %3 = tpu.matmul %1, %2, %cst {dimension_numbers = #tpu.dot_dimension_numbers<[1], [0], [0], [1], [0, 0, 1, 1], [], []>} : vector<16x128xf32>, vector<128x384xf32>, vector<16x384xf32> -> vector<16x384xf32>
    %c0_4 = arith.constant 0 : index
    %c0_5 = arith.constant 0 : index
    %4 = vector.load %arg4[%c0_4, %c0_5] : memref<1x384xf32, #tpu.memory_space<vmem>>, vector<1x384xf32>
    %5 = vector.broadcast %4 : vector<1x384xf32> to vector<16x384xf32>
    %6 = arith.addf %3, %5 : vector<16x384xf32>
    %7 = vector.extract_strided_slice %6 {offsets = [0, 0], sizes = [16, 128], strides = [1, 1]} : vector<16x384xf32> to vector<16x128xf32>
    %8 = vector.extract_strided_slice %6 {offsets = [0, 128], sizes = [16, 128], strides = [1, 1]} : vector<16x384xf32> to vector<16x128xf32>
    %9 = vector.extract_strided_slice %6 {offsets = [0, 256], sizes = [16, 128], strides = [1, 1]} : vector<16x384xf32> to vector<16x128xf32>
    %10 = tpu.iota {dimensions = array<i32: 0>} : vector<16x16xi32>
    %11 = tpu.iota {dimensions = array<i32: 1>} : vector<16x16xi32>
    %12 = arith.subi %10, %11 : vector<16x16xi32>
    %13 = math.absi %12 : vector<16x16xi32>
    %c2_i32 = arith.constant 2 : i32
    %14 = vector.broadcast %c2_i32 : i32 to vector<16x16xi32>
    %15 = arith.cmpi sle, %13, %14 : vector<16x16xi32>
    %c0_6 = arith.constant 0 : index
    %c0_7 = arith.constant 0 : index
    %c0_8 = arith.constant 0 : index
    %16 = vector.load %arg2[%c0_6, %c0_7, %c0_8] : memref<1x1x16xf32, #tpu.memory_space<vmem>>, vector<1x1x16xf32>
    %17 = vector.shape_cast %16 : vector<1x1x16xf32> to vector<1x16xf32>
    %cst_9 = arith.constant 5.000000e-01 : f32
    %18 = vector.broadcast %cst_9 : f32 to vector<1x16xf32>
    %19 = arith.cmpf ogt, %17, %18 : vector<1x16xf32>
    %20 = vector.broadcast %19 : vector<1x16xi1> to vector<16x16xi1>
    %21 = arith.andi %15, %20 : vector<16x16xi1>
    %cst_10 = arith.constant 0.000000e+00 : f32
    %cst_11 = arith.constant -1.000000e+09 : f32
    %22 = vector.broadcast %cst_10 : f32 to vector<16x16xf32>
    %23 = vector.broadcast %cst_11 : f32 to vector<16x16xf32>
    %24 = arith.select %21, %22, %23 : vector<16x16xi1>, vector<16x16xf32>
    %25 = vector.extract_strided_slice %7 {offsets = [0, 0], sizes = [16, 32], strides = [1, 1]} : vector<16x128xf32> to vector<16x32xf32>
    %26 = vector.extract_strided_slice %8 {offsets = [0, 0], sizes = [16, 32], strides = [1, 1]} : vector<16x128xf32> to vector<16x32xf32>
    %27 = vector.extract_strided_slice %9 {offsets = [0, 0], sizes = [16, 32], strides = [1, 1]} : vector<16x128xf32> to vector<16x32xf32>
    %28 = tpu.transpose %26, [1, 0] : vector<16x32xf32> -> vector<32x16xf32>
    %cst_12 = arith.constant dense<0.000000e+00> : vector<16x16xf32>
    %29 = tpu.matmul %25, %28, %cst_12 {dimension_numbers = #tpu.dot_dimension_numbers<[1], [0], [0], [1], [0, 0, 1, 1], [], []>} : vector<16x32xf32>, vector<32x16xf32>, vector<16x16xf32> -> vector<16x16xf32>
    %cst_13 = arith.constant 0.176776692 : f32
    %30 = vector.broadcast %cst_13 : f32 to vector<16x16xf32>
    %31 = arith.mulf %29, %30 : vector<16x16xf32>
    %32 = arith.addf %31, %24 : vector<16x16xf32>
    %cst_14 = arith.constant dense<0xFF800000> : vector<16xf32>
    %33 = vector.multi_reduction <maximumf>, %32, %cst_14 [1] : vector<16x16xf32> to vector<16xf32>
    %34 = vector.shape_cast %33 : vector<16xf32> to vector<16x1xf32>
    %35 = vector.broadcast %34 : vector<16x1xf32> to vector<16x16xf32>
    %36 = arith.subf %32, %35 : vector<16x16xf32>
    %37 = math.exp %36 : vector<16x16xf32>
    %cst_15 = arith.constant dense<0.000000e+00> : vector<16xf32>
    %38 = vector.multi_reduction <add>, %37, %cst_15 [1] : vector<16x16xf32> to vector<16xf32>
    %39 = vector.shape_cast %38 : vector<16xf32> to vector<16x1xf32>
    %40 = tpu.reciprocal %39 {approx = true} : vector<16x1xf32> -> vector<16x1xf32>
    %41 = vector.broadcast %40 : vector<16x1xf32> to vector<16x16xf32>
    %42 = arith.mulf %37, %41 : vector<16x16xf32>
    %cst_16 = arith.constant dense<0.000000e+00> : vector<16x32xf32>
    %43 = tpu.matmul %42, %27, %cst_16 {dimension_numbers = #tpu.dot_dimension_numbers<[1], [0], [0], [1], [0, 0, 1, 1], [], []>} : vector<16x16xf32>, vector<16x32xf32>, vector<16x32xf32> -> vector<16x32xf32>
    %44 = vector.extract_strided_slice %7 {offsets = [0, 32], sizes = [16, 32], strides = [1, 1]} : vector<16x128xf32> to vector<16x32xf32>
    %45 = vector.extract_strided_slice %8 {offsets = [0, 32], sizes = [16, 32], strides = [1, 1]} : vector<16x128xf32> to vector<16x32xf32>
    %46 = vector.extract_strided_slice %9 {offsets = [0, 32], sizes = [16, 32], strides = [1, 1]} : vector<16x128xf32> to vector<16x32xf32>
    %47 = tpu.transpose %45, [1, 0] : vector<16x32xf32> -> vector<32x16xf32>
    %cst_17 = arith.constant dense<0.000000e+00> : vector<16x16xf32>
    %48 = tpu.matmul %44, %47, %cst_17 {dimension_numbers = #tpu.dot_dimension_numbers<[1], [0], [0], [1], [0, 0, 1, 1], [], []>} : vector<16x32xf32>, vector<32x16xf32>, vector<16x16xf32> -> vector<16x16xf32>
    %cst_18 = arith.constant 0.176776692 : f32
    %49 = vector.broadcast %cst_18 : f32 to vector<16x16xf32>
    %50 = arith.mulf %48, %49 : vector<16x16xf32>
    %51 = arith.addf %50, %24 : vector<16x16xf32>
    %cst_19 = arith.constant dense<0xFF800000> : vector<16xf32>
    %52 = vector.multi_reduction <maximumf>, %51, %cst_19 [1] : vector<16x16xf32> to vector<16xf32>
    %53 = vector.shape_cast %52 : vector<16xf32> to vector<16x1xf32>
    %54 = vector.broadcast %53 : vector<16x1xf32> to vector<16x16xf32>
    %55 = arith.subf %51, %54 : vector<16x16xf32>
    %56 = math.exp %55 : vector<16x16xf32>
    %cst_20 = arith.constant dense<0.000000e+00> : vector<16xf32>
    %57 = vector.multi_reduction <add>, %56, %cst_20 [1] : vector<16x16xf32> to vector<16xf32>
    %58 = vector.shape_cast %57 : vector<16xf32> to vector<16x1xf32>
    %59 = tpu.reciprocal %58 {approx = true} : vector<16x1xf32> -> vector<16x1xf32>
    %60 = vector.broadcast %59 : vector<16x1xf32> to vector<16x16xf32>
    %61 = arith.mulf %56, %60 : vector<16x16xf32>
    %cst_21 = arith.constant dense<0.000000e+00> : vector<16x32xf32>
    %62 = tpu.matmul %61, %46, %cst_21 {dimension_numbers = #tpu.dot_dimension_numbers<[1], [0], [0], [1], [0, 0, 1, 1], [], []>} : vector<16x16xf32>, vector<16x32xf32>, vector<16x32xf32> -> vector<16x32xf32>
    %63 = vector.extract_strided_slice %7 {offsets = [0, 64], sizes = [16, 32], strides = [1, 1]} : vector<16x128xf32> to vector<16x32xf32>
    %64 = vector.extract_strided_slice %8 {offsets = [0, 64], sizes = [16, 32], strides = [1, 1]} : vector<16x128xf32> to vector<16x32xf32>
    %65 = vector.extract_strided_slice %9 {offsets = [0, 64], sizes = [16, 32], strides = [1, 1]} : vector<16x128xf32> to vector<16x32xf32>
    %66 = tpu.transpose %64, [1, 0] : vector<16x32xf32> -> vector<32x16xf32>
    %cst_22 = arith.constant dense<0.000000e+00> : vector<16x16xf32>
    %67 = tpu.matmul %63, %66, %cst_22 {dimension_numbers = #tpu.dot_dimension_numbers<[1], [0], [0], [1], [0, 0, 1, 1], [], []>} : vector<16x32xf32>, vector<32x16xf32>, vector<16x16xf32> -> vector<16x16xf32>
    %cst_23 = arith.constant 0.176776692 : f32
    %68 = vector.broadcast %cst_23 : f32 to vector<16x16xf32>
    %69 = arith.mulf %67, %68 : vector<16x16xf32>
    %70 = arith.addf %69, %24 : vector<16x16xf32>
    %cst_24 = arith.constant dense<0xFF800000> : vector<16xf32>
    %71 = vector.multi_reduction <maximumf>, %70, %cst_24 [1] : vector<16x16xf32> to vector<16xf32>
    %72 = vector.shape_cast %71 : vector<16xf32> to vector<16x1xf32>
    %73 = vector.broadcast %72 : vector<16x1xf32> to vector<16x16xf32>
    %74 = arith.subf %70, %73 : vector<16x16xf32>
    %75 = math.exp %74 : vector<16x16xf32>
    %cst_25 = arith.constant dense<0.000000e+00> : vector<16xf32>
    %76 = vector.multi_reduction <add>, %75, %cst_25 [1] : vector<16x16xf32> to vector<16xf32>
    %77 = vector.shape_cast %76 : vector<16xf32> to vector<16x1xf32>
    %78 = tpu.reciprocal %77 {approx = true} : vector<16x1xf32> -> vector<16x1xf32>
    %79 = vector.broadcast %78 : vector<16x1xf32> to vector<16x16xf32>
    %80 = arith.mulf %75, %79 : vector<16x16xf32>
    %cst_26 = arith.constant dense<0.000000e+00> : vector<16x32xf32>
    %81 = tpu.matmul %80, %65, %cst_26 {dimension_numbers = #tpu.dot_dimension_numbers<[1], [0], [0], [1], [0, 0, 1, 1], [], []>} : vector<16x16xf32>, vector<16x32xf32>, vector<16x32xf32> -> vector<16x32xf32>
    %82 = vector.extract_strided_slice %7 {offsets = [0, 96], sizes = [16, 32], strides = [1, 1]} : vector<16x128xf32> to vector<16x32xf32>
    %83 = vector.extract_strided_slice %8 {offsets = [0, 96], sizes = [16, 32], strides = [1, 1]} : vector<16x128xf32> to vector<16x32xf32>
    %84 = vector.extract_strided_slice %9 {offsets = [0, 96], sizes = [16, 32], strides = [1, 1]} : vector<16x128xf32> to vector<16x32xf32>
    %85 = tpu.transpose %83, [1, 0] : vector<16x32xf32> -> vector<32x16xf32>
    %cst_27 = arith.constant dense<0.000000e+00> : vector<16x16xf32>
    %86 = tpu.matmul %82, %85, %cst_27 {dimension_numbers = #tpu.dot_dimension_numbers<[1], [0], [0], [1], [0, 0, 1, 1], [], []>} : vector<16x32xf32>, vector<32x16xf32>, vector<16x16xf32> -> vector<16x16xf32>
    %cst_28 = arith.constant 0.176776692 : f32
    %87 = vector.broadcast %cst_28 : f32 to vector<16x16xf32>
    %88 = arith.mulf %86, %87 : vector<16x16xf32>
    %89 = arith.addf %88, %24 : vector<16x16xf32>
    %cst_29 = arith.constant dense<0xFF800000> : vector<16xf32>
    %90 = vector.multi_reduction <maximumf>, %89, %cst_29 [1] : vector<16x16xf32> to vector<16xf32>
    %91 = vector.shape_cast %90 : vector<16xf32> to vector<16x1xf32>
    %92 = vector.broadcast %91 : vector<16x1xf32> to vector<16x16xf32>
    %93 = arith.subf %89, %92 : vector<16x16xf32>
    %94 = math.exp %93 : vector<16x16xf32>
    %cst_30 = arith.constant dense<0.000000e+00> : vector<16xf32>
    %95 = vector.multi_reduction <add>, %94, %cst_30 [1] : vector<16x16xf32> to vector<16xf32>
    %96 = vector.shape_cast %95 : vector<16xf32> to vector<16x1xf32>
    %97 = tpu.reciprocal %96 {approx = true} : vector<16x1xf32> -> vector<16x1xf32>
    %98 = vector.broadcast %97 : vector<16x1xf32> to vector<16x16xf32>
    %99 = arith.mulf %94, %98 : vector<16x16xf32>
    %cst_31 = arith.constant dense<0.000000e+00> : vector<16x32xf32>
    %100 = tpu.matmul %99, %84, %cst_31 {dimension_numbers = #tpu.dot_dimension_numbers<[1], [0], [0], [1], [0, 0, 1, 1], [], []>} : vector<16x16xf32>, vector<16x32xf32>, vector<16x32xf32> -> vector<16x32xf32>
    %101 = tpu.concatenate %43, %62, %81, %100 in 1 : vector<16x32xf32>, vector<16x32xf32>, vector<16x32xf32>, vector<16x32xf32> -> vector<16x128xf32>
    %c0_32 = arith.constant 0 : index
    %c0_33 = arith.constant 0 : index
    %102 = vector.load %arg5[%c0_32, %c0_33] : memref<128x128xf32, #tpu.memory_space<vmem>>, vector<128x128xf32>
    %cst_34 = arith.constant dense<0.000000e+00> : vector<16x128xf32>
    %103 = tpu.matmul %101, %102, %cst_34 {dimension_numbers = #tpu.dot_dimension_numbers<[1], [0], [0], [1], [0, 0, 1, 1], [], []>} : vector<16x128xf32>, vector<128x128xf32>, vector<16x128xf32> -> vector<16x128xf32>
    %c0_35 = arith.constant 0 : index
    %c0_36 = arith.constant 0 : index
    %104 = vector.load %arg6[%c0_35, %c0_36] : memref<1x128xf32, #tpu.memory_space<vmem>>, vector<1x128xf32>
    %105 = vector.broadcast %104 : vector<1x128xf32> to vector<16x128xf32>
    %106 = arith.addf %103, %105 : vector<16x128xf32>
    %107 = arith.addf %106, %1 : vector<16x128xf32>
    %c0_37 = arith.constant 0 : index
    %c0_38 = arith.constant 0 : index
    %108 = vector.load %arg7[%c0_37, %c0_38] : memref<1x128xf32, #tpu.memory_space<vmem>>, vector<1x128xf32>
    %c0_39 = arith.constant 0 : index
    %c0_40 = arith.constant 0 : index
    %109 = vector.load %arg8[%c0_39, %c0_40] : memref<1x128xf32, #tpu.memory_space<vmem>>, vector<1x128xf32>
    %cst_41 = arith.constant dense<0.000000e+00> : vector<16xf32>
    %110 = vector.multi_reduction <add>, %107, %cst_41 [1] : vector<16x128xf32> to vector<16xf32>
    %111 = vector.shape_cast %110 : vector<16xf32> to vector<16x1xf32>
    %cst_42 = arith.constant 1.280000e+02 : f32
    %112 = vector.broadcast %cst_42 : f32 to vector<16x1xf32>
    %113 = arith.divf %111, %112 : vector<16x1xf32>
    %114 = vector.broadcast %113 : vector<16x1xf32> to vector<16x128xf32>
    %115 = arith.subf %107, %114 : vector<16x128xf32>
    %116 = arith.mulf %115, %115 : vector<16x128xf32>
    %cst_43 = arith.constant dense<0.000000e+00> : vector<16xf32>
    %117 = vector.multi_reduction <add>, %116, %cst_43 [1] : vector<16x128xf32> to vector<16xf32>
    %118 = vector.shape_cast %117 : vector<16xf32> to vector<16x1xf32>
    %cst_44 = arith.constant 1.280000e+02 : f32
    %119 = vector.broadcast %cst_44 : f32 to vector<16x1xf32>
    %120 = arith.divf %118, %119 : vector<16x1xf32>
    %121 = vector.broadcast %113 : vector<16x1xf32> to vector<16x128xf32>
    %122 = arith.subf %107, %121 : vector<16x128xf32>
    %cst_45 = arith.constant 9.99999974E-6 : f32
    %123 = vector.broadcast %cst_45 : f32 to vector<16x1xf32>
    %124 = arith.addf %120, %123 : vector<16x1xf32>
    %125 = math.rsqrt %124 : vector<16x1xf32>
    %126 = vector.broadcast %125 : vector<16x1xf32> to vector<16x128xf32>
    %127 = arith.mulf %122, %126 : vector<16x128xf32>
    %128 = vector.broadcast %108 : vector<1x128xf32> to vector<16x128xf32>
    %129 = arith.mulf %127, %128 : vector<16x128xf32>
    %130 = vector.broadcast %109 : vector<1x128xf32> to vector<16x128xf32>
    %131 = arith.addf %129, %130 : vector<16x128xf32>
    %c0_46 = arith.constant 0 : index
    %c0_47 = arith.constant 0 : index
    %132 = vector.load %arg9[%c0_46, %c0_47] : memref<128x256xf32, #tpu.memory_space<vmem>>, vector<128x256xf32>
    %cst_48 = arith.constant dense<0.000000e+00> : vector<16x256xf32>
    %133 = tpu.matmul %131, %132, %cst_48 {dimension_numbers = #tpu.dot_dimension_numbers<[1], [0], [0], [1], [0, 0, 1, 1], [], []>} : vector<16x128xf32>, vector<128x256xf32>, vector<16x256xf32> -> vector<16x256xf32>
    %c0_49 = arith.constant 0 : index
    %c0_50 = arith.constant 0 : index
    %134 = vector.load %arg10[%c0_49, %c0_50] : memref<1x256xf32, #tpu.memory_space<vmem>>, vector<1x256xf32>
    %135 = vector.broadcast %134 : vector<1x256xf32> to vector<16x256xf32>
    %136 = arith.addf %133, %135 : vector<16x256xf32>
    %cst_51 = arith.constant 5.000000e-01 : f32
    %137 = vector.broadcast %cst_51 : f32 to vector<16x256xf32>
    %138 = arith.mulf %137, %136 : vector<16x256xf32>
    %cst_52 = arith.constant 4.471500e-02 : f32
    %139 = vector.broadcast %cst_52 : f32 to vector<16x256xf32>
    %140 = arith.mulf %139, %136 : vector<16x256xf32>
    %141 = arith.mulf %140, %136 : vector<16x256xf32>
    %142 = arith.mulf %141, %136 : vector<16x256xf32>
    %143 = arith.addf %136, %142 : vector<16x256xf32>
    %cst_53 = arith.constant 0.797884583 : f32
    %144 = vector.broadcast %cst_53 : f32 to vector<16x256xf32>
    %145 = arith.mulf %144, %143 : vector<16x256xf32>
    %146 = math.tanh %145 : vector<16x256xf32>
    %cst_54 = arith.constant 1.000000e+00 : f32
    %147 = vector.broadcast %cst_54 : f32 to vector<16x256xf32>
    %148 = arith.addf %147, %146 : vector<16x256xf32>
    %149 = arith.mulf %138, %148 : vector<16x256xf32>
    %c0_55 = arith.constant 0 : index
    %c0_56 = arith.constant 0 : index
    %150 = vector.load %arg11[%c0_55, %c0_56] : memref<256x128xf32, #tpu.memory_space<vmem>>, vector<256x128xf32>
    %cst_57 = arith.constant dense<0.000000e+00> : vector<16x128xf32>
    %151 = tpu.matmul %149, %150, %cst_57 {dimension_numbers = #tpu.dot_dimension_numbers<[1], [0], [0], [1], [0, 0, 1, 1], [], []>} : vector<16x256xf32>, vector<256x128xf32>, vector<16x128xf32> -> vector<16x128xf32>
    %c0_58 = arith.constant 0 : index
    %c0_59 = arith.constant 0 : index
    %152 = vector.load %arg12[%c0_58, %c0_59] : memref<1x128xf32, #tpu.memory_space<vmem>>, vector<1x128xf32>
    %153 = vector.broadcast %152 : vector<1x128xf32> to vector<16x128xf32>
    %154 = arith.addf %151, %153 : vector<16x128xf32>
    %155 = arith.addf %154, %131 : vector<16x128xf32>
    %c0_60 = arith.constant 0 : index
    %c0_61 = arith.constant 0 : index
    %156 = vector.load %arg13[%c0_60, %c0_61] : memref<1x128xf32, #tpu.memory_space<vmem>>, vector<1x128xf32>
    %c0_62 = arith.constant 0 : index
    %c0_63 = arith.constant 0 : index
    %157 = vector.load %arg14[%c0_62, %c0_63] : memref<1x128xf32, #tpu.memory_space<vmem>>, vector<1x128xf32>
    %cst_64 = arith.constant dense<0.000000e+00> : vector<16xf32>
    %158 = vector.multi_reduction <add>, %155, %cst_64 [1] : vector<16x128xf32> to vector<16xf32>
    %159 = vector.shape_cast %158 : vector<16xf32> to vector<16x1xf32>
    %cst_65 = arith.constant 1.280000e+02 : f32
    %160 = vector.broadcast %cst_65 : f32 to vector<16x1xf32>
    %161 = arith.divf %159, %160 : vector<16x1xf32>
    %162 = vector.broadcast %161 : vector<16x1xf32> to vector<16x128xf32>
    %163 = arith.subf %155, %162 : vector<16x128xf32>
    %164 = arith.mulf %163, %163 : vector<16x128xf32>
    %cst_66 = arith.constant dense<0.000000e+00> : vector<16xf32>
    %165 = vector.multi_reduction <add>, %164, %cst_66 [1] : vector<16x128xf32> to vector<16xf32>
    %166 = vector.shape_cast %165 : vector<16xf32> to vector<16x1xf32>
    %cst_67 = arith.constant 1.280000e+02 : f32
    %167 = vector.broadcast %cst_67 : f32 to vector<16x1xf32>
    %168 = arith.divf %166, %167 : vector<16x1xf32>
    %169 = vector.broadcast %161 : vector<16x1xf32> to vector<16x128xf32>
    %170 = arith.subf %155, %169 : vector<16x128xf32>
    %cst_68 = arith.constant 9.99999974E-6 : f32
    %171 = vector.broadcast %cst_68 : f32 to vector<16x1xf32>
    %172 = arith.addf %168, %171 : vector<16x1xf32>
    %173 = math.rsqrt %172 : vector<16x1xf32>
    %174 = vector.broadcast %173 : vector<16x1xf32> to vector<16x128xf32>
    %175 = arith.mulf %170, %174 : vector<16x128xf32>
    %176 = vector.broadcast %156 : vector<1x128xf32> to vector<16x128xf32>
    %177 = arith.mulf %175, %176 : vector<16x128xf32>
    %178 = vector.broadcast %157 : vector<1x128xf32> to vector<16x128xf32>
    %179 = arith.addf %177, %178 : vector<16x128xf32>
    %c0_69 = arith.constant 0 : index
    %c0_70 = arith.constant 0 : index
    %c0_71 = arith.constant 0 : index
    %180 = vector.load %arg15[%c0_69, %c0_70, %c0_71] : memref<1x16x128xf32, #tpu.memory_space<vmem>>, vector<1x16x128xf32>
    %181 = vector.shape_cast %180 : vector<1x16x128xf32> to vector<16x128xf32>
    %182 = vector.shape_cast %179 : vector<16x128xf32> to vector<1x16x128xf32>
    tpu.vector_store %arg15[%c0_69, %c0_70, %c0_71], %182 {strides = array<i32>} : memref<1x16x128xf32, #tpu.memory_space<vmem>>, vector<1x16x128xf32>,
    return
  }
  func.func @transform_0(%arg0: i32) -> (i32, i32, i32) {
    %c0_i32 = arith.constant 0 : i32
    %c0_i32_0 = arith.constant 0 : i32
    %c0_i32_1 = arith.constant 0 : i32
    return %arg0, %c0_i32, %c0_i32_0 : i32, i32, i32
  }
  func.func @transform_1(%arg0: i32) -> (i32, i32, i32) {
    %c0_i32 = arith.constant 0 : i32
    %c0_i32_0 = arith.constant 0 : i32
    %c0_i32_1 = arith.constant 0 : i32
    return %arg0, %c0_i32, %c0_i32_0 : i32, i32, i32
  }
  func.func @transform_2(%arg0: i32) -> (i32, i32) {
    %c0_i32 = arith.constant 0 : i32
    %c0_i32_0 = arith.constant 0 : i32
    %c0_i32_1 = arith.constant 0 : i32
    return %c0_i32, %c0_i32_0 : i32, i32
  }
  func.func @transform_3(%arg0: i32) -> (i32, i32) {
    %c0_i32 = arith.constant 0 : i32
    %c0_i32_0 = arith.constant 0 : i32
    %c0_i32_1 = arith.constant 0 : i32
    return %c0_i32, %c0_i32_0 : i32, i32
  }
  func.func @transform_4(%arg0: i32) -> (i32, i32) {
    %c0_i32 = arith.constant 0 : i32
    %c0_i32_0 = arith.constant 0 : i32
    %c0_i32_1 = arith.constant 0 : i32
    return %c0_i32, %c0_i32_0 : i32, i32
  }
  func.func @transform_5(%arg0: i32) -> (i32, i32) {
    %c0_i32 = arith.constant 0 : i32
    %c0_i32_0 = arith.constant 0 : i32
    %c0_i32_1 = arith.constant 0 : i32
    return %c0_i32, %c0_i32_0 : i32, i32
  }
  func.func @transform_6(%arg0: i32) -> (i32, i32) {
    %c0_i32 = arith.constant 0 : i32
    %c0_i32_0 = arith.constant 0 : i32
    %c0_i32_1 = arith.constant 0 : i32
    return %c0_i32, %c0_i32_0 : i32, i32
  }
  func.func @transform_7(%arg0: i32) -> (i32, i32) {
    %c0_i32 = arith.constant 0 : i32
    %c0_i32_0 = arith.constant 0 : i32
    %c0_i32_1 = arith.constant 0 : i32
    return %c0_i32, %c0_i32_0 : i32, i32
  }
  func.func @transform_8(%arg0: i32) -> (i32, i32) {
    %c0_i32 = arith.constant 0 : i32
    %c0_i32_0 = arith.constant 0 : i32
    %c0_i32_1 = arith.constant 0 : i32
    return %c0_i32, %c0_i32_0 : i32, i32
  }
  func.func @transform_9(%arg0: i32) -> (i32, i32) {
    %c0_i32 = arith.constant 0 : i32
    %c0_i32_0 = arith.constant 0 : i32
    %c0_i32_1 = arith.constant 0 : i32
    return %c0_i32, %c0_i32_0 : i32, i32
  }
  func.func @transform_10(%arg0: i32) -> (i32, i32) {
    %c0_i32 = arith.constant 0 : i32
    %c0_i32_0 = arith.constant 0 : i32
    %c0_i32_1 = arith.constant 0 : i32
    return %c0_i32, %c0_i32_0 : i32, i32
  }
  func.func @transform_11(%arg0: i32) -> (i32, i32) {
    %c0_i32 = arith.constant 0 : i32
    %c0_i32_0 = arith.constant 0 : i32
    %c0_i32_1 = arith.constant 0 : i32
    return %c0_i32, %c0_i32_0 : i32, i32
  }
  func.func @transform_12(%arg0: i32) -> (i32, i32) {
    %c0_i32 = arith.constant 0 : i32
    %c0_i32_0 = arith.constant 0 : i32
    %c0_i32_1 = arith.constant 0 : i32
    return %c0_i32, %c0_i32_0 : i32, i32
  }
  func.func @transform_13(%arg0: i32) -> (i32, i32) {
    %c0_i32 = arith.constant 0 : i32
    %c0_i32_0 = arith.constant 0 : i32
    %c0_i32_1 = arith.constant 0 : i32
    return %c0_i32, %c0_i32_0 : i32, i32
  }
  func.func @transform_14(%arg0: i32) -> (i32, i32, i32) {
    %c0_i32 = arith.constant 0 : i32
    %c0_i32_0 = arith.constant 0 : i32
    %c0_i32_1 = arith.constant 0 : i32
    return %arg0, %c0_i32, %c0_i32_0 : i32, i32, i32
  }
}

module attributes {stable_mosaic.version = 11 : i64} {
  func.func @_layer_kernel(%arg0: i32, %arg1: memref<1x16x128xf32, #tpu.memory_space<vmem>>, %arg2: memref<1x1x16xf32, #tpu.memory_space<vmem>>, %arg3: memref<128x384xf32, #tpu.memory_space<vmem>>, %arg4: memref<1x384xf32, #tpu.memory_space<vmem>>, %arg5: memref<128x128xf32, #tpu.memory_space<vmem>>, %arg6: memref<1x128xf32, #tpu.memory_space<vmem>>, %arg7: memref<1x128xf32, #tpu.memory_space<vmem>>, %arg8: memref<1x128xf32, #tpu.memory_space<vmem>>, %arg9: memref<128x256xf32, #tpu.memory_space<vmem>>, %arg10: memref<1x256xf32, #tpu.memory_space<vmem>>, %arg11: memref<256x128xf32, #tpu.memory_space<vmem>>, %arg12: memref<1x128xf32, #tpu.memory_space<vmem>>, %arg13: memref<1x128xf32, #tpu.memory_space<vmem>>, %arg14: memref<1x128xf32, #tpu.memory_space<vmem>>, %arg15: memref<1x16x128xf32, #tpu.memory_space<vmem>>) attributes {dimension_semantics = [#tpu.dimension_semantics<parallel>], iteration_bounds = array<i64: 2>, scalar_prefetch = 0 : i64, scratch_operands = 0 : i64, tpu.core_type = #tpu.core_type<tc>, window_params = [{transform_indices = @transform_0, window_bounds = array<i64: 1, 16, 128>}, {transform_indices = @transform_1, window_bounds = array<i64: 1, 1, 16>}, {pipeline_mode = #tpu.pipeline_mode<synchronous>, transform_indices = @transform_2, window_bounds = array<i64: 128, 384>}, {pipeline_mode = #tpu.pipeline_mode<synchronous>, transform_indices = @transform_3, window_bounds = array<i64: 1, 384>}, {pipeline_mode = #tpu.pipeline_mode<synchronous>, transform_indices = @transform_4, window_bounds = array<i64: 128, 128>}, {pipeline_mode = #tpu.pipeline_mode<synchronous>, transform_indices = @transform_5, window_bounds = array<i64: 1, 128>}, {pipeline_mode = #tpu.pipeline_mode<synchronous>, transform_indices = @transform_6, window_bounds = array<i64: 1, 128>}, {pipeline_mode = #tpu.pipeline_mode<synchronous>, transform_indices = @transform_7, window_bounds = array<i64: 1, 128>}, {pipeline_mode = #tpu.pipeline_mode<synchronous>, transform_indices = @transform_8, window_bounds = array<i64: 128, 256>}, {pipeline_mode = #tpu.pipeline_mode<synchronous>, transform_indices = @transform_9, window_bounds = array<i64: 1, 256>}, {pipeline_mode = #tpu.pipeline_mode<synchronous>, transform_indices = @transform_10, window_bounds = array<i64: 256, 128>}, {pipeline_mode = #tpu.pipeline_mode<synchronous>, transform_indices = @transform_11, window_bounds = array<i64: 1, 128>}, {pipeline_mode = #tpu.pipeline_mode<synchronous>, transform_indices = @transform_12, window_bounds = array<i64: 1, 128>}, {pipeline_mode = #tpu.pipeline_mode<synchronous>, transform_indices = @transform_13, window_bounds = array<i64: 1, 128>}, {transform_indices = @transform_14, window_bounds = array<i64: 1, 16, 128>}]} {
    %c0 = arith.constant 0 : index
    %c0_0 = arith.constant 0 : index
    %c0_1 = arith.constant 0 : index
    %0 = vector.load %arg1[%c0, %c0_0, %c0_1] : memref<1x16x128xf32, #tpu.memory_space<vmem>>, vector<1x16x128xf32>
    %1 = vector.shape_cast %0 : vector<1x16x128xf32> to vector<16x128xf32>
    %c0_2 = arith.constant 0 : index
    %c0_3 = arith.constant 0 : index
    %2 = vector.load %arg3[%c0_2, %c0_3] : memref<128x384xf32, #tpu.memory_space<vmem>>, vector<128x384xf32>
    %cst = arith.constant dense<0.000000e+00> : vector<16x384xf32>
    %3 = tpu.matmul %1, %2, %cst {dimension_numbers = #tpu.dot_dimension_numbers<[1], [0], [0], [1], [0, 0, 1, 1], [], []>} : vector<16x128xf32>, vector<128x384xf32>, vector<16x384xf32> -> vector<16x384xf32>
    %c0_4 = arith.constant 0 : index
    %c0_5 = arith.constant 0 : index
    %4 = vector.load %arg4[%c0_4, %c0_5] : memref<1x384xf32, #tpu.memory_space<vmem>>, vector<1x384xf32>
    %5 = vector.broadcast %4 : vector<1x384xf32> to vector<16x384xf32>
    %6 = arith.addf %3, %5 : vector<16x384xf32>
    %7 = vector.extract_strided_slice %6 {offsets = [0, 0], sizes = [16, 128], strides = [1, 1]} : vector<16x384xf32> to vector<16x128xf32>
    %8 = vector.extract_strided_slice %6 {offsets = [0, 128], sizes = [16, 128], strides = [1, 1]} : vector<16x384xf32> to vector<16x128xf32>
    %9 = vector.extract_strided_slice %6 {offsets = [0, 256], sizes = [16, 128], strides = [1, 1]} : vector<16x384xf32> to vector<16x128xf32>
    %10 = tpu.iota {dimensions = array<i32: 0>} : vector<16x16xi32>
    %11 = tpu.iota {dimensions = array<i32: 1>} : vector<16x16xi32>
    %12 = arith.subi %10, %11 : vector<16x16xi32>
    %13 = math.absi %12 : vector<16x16xi32>
    %c2_i32 = arith.constant 2 : i32
    %14 = vector.broadcast %c2_i32 : i32 to vector<16x16xi32>
    %15 = arith.cmpi sle, %13, %14 : vector<16x16xi32>
    %c0_6 = arith.constant 0 : index
    %c0_7 = arith.constant 0 : index
    %c0_8 = arith.constant 0 : index
    %16 = vector.load %arg2[%c0_6, %c0_7, %c0_8] : memref<1x1x16xf32, #tpu.memory_space<vmem>>, vector<1x1x16xf32>
    %17 = vector.shape_cast %16 : vector<1x1x16xf32> to vector<1x16xf32>
    %cst_9 = arith.constant 5.000000e-01 : f32
    %18 = vector.broadcast %cst_9 : f32 to vector<1x16xf32>
    %19 = arith.cmpf ogt, %17, %18 : vector<1x16xf32>
    %20 = vector.broadcast %19 : vector<1x16xi1> to vector<16x16xi1>
    %21 = arith.andi %15, %20 : vector<16x16xi1>
    %cst_10 = arith.constant 0.000000e+00 : f32
    %cst_11 = arith.constant -1.000000e+09 : f32
    %22 = vector.broadcast %cst_10 : f32 to vector<16x16xf32>
    %23 = vector.broadcast %cst_11 : f32 to vector<16x16xf32>
    %24 = arith.select %21, %22, %23 : vector<16x16xi1>, vector<16x16xf32>
    %25 = vector.extract_strided_slice %7 {offsets = [0, 0], sizes = [16, 32], strides = [1, 1]} : vector<16x128xf32> to vector<16x32xf32>
    %26 = vector.extract_strided_slice %8 {offsets = [0, 0], sizes = [16, 32], strides = [1, 1]} : vector<16x128xf32> to vector<16x32xf32>
    %27 = vector.extract_strided_slice %9 {offsets = [0, 0], sizes = [16, 32], strides = [1, 1]} : vector<16x128xf32> to vector<16x32xf32>
    %28 = tpu.transpose %26, [1, 0] : vector<16x32xf32> -> vector<32x16xf32>
    %cst_12 = arith.constant dense<0.000000e+00> : vector<16x16xf32>
    %29 = tpu.matmul %25, %28, %cst_12 {dimension_numbers = #tpu.dot_dimension_numbers<[1], [0], [0], [1], [0, 0, 1, 1], [], []>} : vector<16x32xf32>, vector<32x16xf32>, vector<16x16xf32> -> vector<16x16xf32>
    %cst_13 = arith.constant 0.176776692 : f32
    %30 = vector.broadcast %cst_13 : f32 to vector<16x16xf32>
    %31 = arith.mulf %29, %30 : vector<16x16xf32>
    %32 = arith.addf %31, %24 : vector<16x16xf32>
    %cst_14 = arith.constant dense<0xFF800000> : vector<16xf32>
    %33 = vector.multi_reduction <maximumf>, %32, %cst_14 [1] : vector<16x16xf32> to vector<16xf32>
    %34 = vector.shape_cast %33 : vector<16xf32> to vector<16x1xf32>
    %35 = vector.broadcast %34 : vector<16x1xf32> to vector<16x16xf32>
    %36 = arith.subf %32, %35 : vector<16x16xf32>
    %37 = math.exp %36 : vector<16x16xf32>
    %cst_15 = arith.constant dense<0.000000e+00> : vector<16xf32>
    %38 = vector.multi_reduction <add>, %37, %cst_15 [1] : vector<16x16xf32> to vector<16xf32>
    %39 = vector.shape_cast %38 : vector<16xf32> to vector<16x1xf32>
    %40 = tpu.reciprocal %39 {approx = true} : vector<16x1xf32> -> vector<16x1xf32>
    %41 = vector.broadcast %40 : vector<16x1xf32> to vector<16x16xf32>
    %42 = arith.mulf %37, %41 : vector<16x16xf32>
    %cst_16 = arith.constant dense<0.000000e+00> : vector<16x32xf32>
    %43 = tpu.matmul %42, %27, %cst_16 {dimension_numbers = #tpu.dot_dimension_numbers<[1], [0], [0], [1], [0, 0, 1, 1], [], []>} : vector<16x16xf32>, vector<16x32xf32>, vector<16x32xf32> -> vector<16x32xf32>
    %44 = vector.extract_strided_slice %7 {offsets = [0, 32], sizes = [16, 32], strides = [1, 1]} : vector<16x128xf32> to vector<16x32xf32>
    %45 = vector.extract_strided_slice %8 {offsets = [0, 32], sizes = [16, 32], strides = [1, 1]} : vector<16x128xf32> to vector<16x32xf32>
    %46 = vector.extract_strided_slice %9 {offsets = [0, 32], sizes = [16, 32], strides = [1, 1]} : vector<16x128xf32> to vector<16x32xf32>
    %47 = tpu.transpose %45, [1, 0] : vector<16x32xf32> -> vector<32x16xf32>
    %cst_17 = arith.constant dense<0.000000e+00> : vector<16x16xf32>
    %48 = tpu.matmul %44, %47, %cst_17 {dimension_numbers = #tpu.dot_dimension_numbers<[1], [0], [0], [1], [0, 0, 1, 1], [], []>} : vector<16x32xf32>, vector<32x16xf32>, vector<16x16xf32> -> vector<16x16xf32>
    %cst_18 = arith.constant 0.176776692 : f32
    %49 = vector.broadcast %cst_18 : f32 to vector<16x16xf32>
    %50 = arith.mulf %48, %49 : vector<16x16xf32>
    %51 = arith.addf %50, %24 : vector<16x16xf32>
    %cst_19 = arith.constant dense<0xFF800000> : vector<16xf32>
    %52 = vector.multi_reduction <maximumf>, %51, %cst_19 [1] : vector<16x16xf32> to vector<16xf32>
    %53 = vector.shape_cast %52 : vector<16xf32> to vector<16x1xf32>
    %54 = vector.broadcast %53 : vector<16x1xf32> to vector<16x16xf32>
    %55 = arith.subf %51, %54 : vector<16x16xf32>
    %56 = math.exp %55 : vector<16x16xf32>
    %cst_20 = arith.constant dense<0.000000e+00> : vector<16xf32>
    %57 = vector.multi_reduction <add>, %56, %cst_20 [1] : vector<16x16xf32> to vector<16xf32>
    %58 = vector.shape_cast %57 : vector<16xf32> to vector<16x1xf32>
    %59 = tpu.reciprocal %58 {approx = true} : vector<16x1xf32> -> vector<16x1xf32>
    %60 = vector.broadcast %59 : vector<16x1xf32> to vector<16x16xf32>
    %61 = arith.mulf %56, %60 : vector<16x16xf32>
    %cst_21 = arith.constant dense<0.000000e+00> : vector<16x32xf32>
    %62 = tpu.matmul %61, %46, %cst_21 {dimension_numbers = #tpu.dot_dimension_numbers<[1], [0], [0], [1], [0, 0, 1, 1], [], []>} : vector<16x16xf32>, vector<16x32xf32>, vector<16x32xf32> -> vector<16x32xf32>
    %63 = vector.extract_strided_slice %7 {offsets = [0, 64], sizes = [16, 32], strides = [1, 1]} : vector<16x128xf32> to vector<16x32xf32>
    %64 = vector.extract_strided_slice %8 {offsets = [0, 64], sizes = [16, 32], strides = [1, 1]} : vector<16x128xf32> to vector<16x32xf32>
    %65 = vector.extract_strided_slice %9 {offsets = [0, 64], sizes = [16, 32], strides = [1, 1]} : vector<16x128xf32> to vector<16x32xf32>
    %66 = tpu.transpose %64, [1, 0] : vector<16x32xf32> -> vector<32x16xf32>
    %cst_22 = arith.constant dense<0.000000e+00> : vector<16x16xf32>
    %67 = tpu.matmul %63, %66, %cst_22 {dimension_numbers = #tpu.dot_dimension_numbers<[1], [0], [0], [1], [0, 0, 1, 1], [], []>} : vector<16x32xf32>, vector<32x16xf32>, vector<16x16xf32> -> vector<16x16xf32>
    %cst_23 = arith.constant 0.176776692 : f32
    %68 = vector.broadcast %cst_23 : f32 to vector<16x16xf32>
    %69 = arith.mulf %67, %68 : vector<16x16xf32>
    %70 = arith.addf %69, %24 : vector<16x16xf32>
    %cst_24 = arith.constant dense<0xFF800000> : vector<16xf32>
    %71 = vector.multi_reduction <maximumf>, %70, %cst_24 [1] : vector<16x16xf32> to vector<16xf32>
    %72 = vector.shape_cast %71 : vector<16xf32> to vector<16x1xf32>
    %73 = vector.broadcast %72 : vector<16x1xf32> to vector<16x16xf32>
    %74 = arith.subf %70, %73 : vector<16x16xf32>
    %75 = math.exp %74 : vector<16x16xf32>
    %cst_25 = arith.constant dense<0.000000e+00> : vector<16xf32>
    %76 = vector.multi_reduction <add>, %75, %cst_25 [1] : vector<16x16xf32> to vector<16xf32>
    %77 = vector.shape_cast %76 : vector<16xf32> to vector<16x1xf32>
    %78 = tpu.reciprocal %77 {approx = true} : vector<16x1xf32> -> vector<16x1xf32>
    %79 = vector.broadcast %78 : vector<16x1xf32> to vector<16x16xf32>
    %80 = arith.mulf %75, %79 : vector<16x16xf32>
    %cst_26 = arith.constant dense<0.000000e+00> : vector<16x32xf32>
    %81 = tpu.matmul %80, %65, %cst_26 {dimension_numbers = #tpu.dot_dimension_numbers<[1], [0], [0], [1], [0, 0, 1, 1], [], []>} : vector<16x16xf32>, vector<16x32xf32>, vector<16x32xf32> -> vector<16x32xf32>
    %82 = vector.extract_strided_slice %7 {offsets = [0, 96], sizes = [16, 32], strides = [1, 1]} : vector<16x128xf32> to vector<16x32xf32>
    %83 = vector.extract_strided_slice %8 {offsets = [0, 96], sizes = [16, 32], strides = [1, 1]} : vector<16x128xf32> to vector<16x32xf32>
    %84 = vector.extract_strided_slice %9 {offsets = [0, 96], sizes = [16, 32], strides = [1, 1]} : vector<16x128xf32> to vector<16x32xf32>
    %85 = tpu.transpose %83, [1, 0] : vector<16x32xf32> -> vector<32x16xf32>
    %cst_27 = arith.constant dense<0.000000e+00> : vector<16x16xf32>
    %86 = tpu.matmul %82, %85, %cst_27 {dimension_numbers = #tpu.dot_dimension_numbers<[1], [0], [0], [1], [0, 0, 1, 1], [], []>} : vector<16x32xf32>, vector<32x16xf32>, vector<16x16xf32> -> vector<16x16xf32>
    %cst_28 = arith.constant 0.176776692 : f32
    %87 = vector.broadcast %cst_28 : f32 to vector<16x16xf32>
    %88 = arith.mulf %86, %87 : vector<16x16xf32>
    %89 = arith.addf %88, %24 : vector<16x16xf32>
    %cst_29 = arith.constant dense<0xFF800000> : vector<16xf32>
    %90 = vector.multi_reduction <maximumf>, %89, %cst_29 [1] : vector<16x16xf32> to vector<16xf32>
    %91 = vector.shape_cast %90 : vector<16xf32> to vector<16x1xf32>
    %92 = vector.broadcast %91 : vector<16x1xf32> to vector<16x16xf32>
    %93 = arith.subf %89, %92 : vector<16x16xf32>
    %94 = math.exp %93 : vector<16x16xf32>
    %cst_30 = arith.constant dense<0.000000e+00> : vector<16xf32>
    %95 = vector.multi_reduction <add>, %94, %cst_30 [1] : vector<16x16xf32> to vector<16xf32>
    %96 = vector.shape_cast %95 : vector<16xf32> to vector<16x1xf32>
    %97 = tpu.reciprocal %96 {approx = true} : vector<16x1xf32> -> vector<16x1xf32>
    %98 = vector.broadcast %97 : vector<16x1xf32> to vector<16x16xf32>
    %99 = arith.mulf %94, %98 : vector<16x16xf32>
    %cst_31 = arith.constant dense<0.000000e+00> : vector<16x32xf32>
    %100 = tpu.matmul %99, %84, %cst_31 {dimension_numbers = #tpu.dot_dimension_numbers<[1], [0], [0], [1], [0, 0, 1, 1], [], []>} : vector<16x16xf32>, vector<16x32xf32>, vector<16x32xf32> -> vector<16x32xf32>
    %101 = tpu.concatenate %43, %62, %81, %100 in 1 : vector<16x32xf32>, vector<16x32xf32>, vector<16x32xf32>, vector<16x32xf32> -> vector<16x128xf32>
    %c0_32 = arith.constant 0 : index
    %c0_33 = arith.constant 0 : index
    %102 = vector.load %arg5[%c0_32, %c0_33] : memref<128x128xf32, #tpu.memory_space<vmem>>, vector<128x128xf32>
    %cst_34 = arith.constant dense<0.000000e+00> : vector<16x128xf32>
    %103 = tpu.matmul %101, %102, %cst_34 {dimension_numbers = #tpu.dot_dimension_numbers<[1], [0], [0], [1], [0, 0, 1, 1], [], []>} : vector<16x128xf32>, vector<128x128xf32>, vector<16x128xf32> -> vector<16x128xf32>
    %c0_35 = arith.constant 0 : index
    %c0_36 = arith.constant 0 : index
    %104 = vector.load %arg6[%c0_35, %c0_36] : memref<1x128xf32, #tpu.memory_space<vmem>>, vector<1x128xf32>
    %105 = vector.broadcast %104 : vector<1x128xf32> to vector<16x128xf32>
    %106 = arith.addf %103, %105 : vector<16x128xf32>
    %107 = arith.addf %106, %1 : vector<16x128xf32>
    %c0_37 = arith.constant 0 : index
    %c0_38 = arith.constant 0 : index
    %108 = vector.load %arg7[%c0_37, %c0_38] : memref<1x128xf32, #tpu.memory_space<vmem>>, vector<1x128xf32>
    %c0_39 = arith.constant 0 : index
    %c0_40 = arith.constant 0 : index
    %109 = vector.load %arg8[%c0_39, %c0_40] : memref<1x128xf32, #tpu.memory_space<vmem>>, vector<1x128xf32>
    %cst_41 = arith.constant dense<0.000000e+00> : vector<16xf32>
    %110 = vector.multi_reduction <add>, %107, %cst_41 [1] : vector<16x128xf32> to vector<16xf32>
    %111 = vector.shape_cast %110 : vector<16xf32> to vector<16x1xf32>
    %cst_42 = arith.constant 1.280000e+02 : f32
    %112 = vector.broadcast %cst_42 : f32 to vector<16x1xf32>
    %113 = arith.divf %111, %112 : vector<16x1xf32>
    %114 = vector.broadcast %113 : vector<16x1xf32> to vector<16x128xf32>
    %115 = arith.subf %107, %114 : vector<16x128xf32>
    %116 = arith.mulf %115, %115 : vector<16x128xf32>
    %cst_43 = arith.constant dense<0.000000e+00> : vector<16xf32>
    %117 = vector.multi_reduction <add>, %116, %cst_43 [1] : vector<16x128xf32> to vector<16xf32>
    %118 = vector.shape_cast %117 : vector<16xf32> to vector<16x1xf32>
    %cst_44 = arith.constant 1.280000e+02 : f32
    %119 = vector.broadcast %cst_44 : f32 to vector<16x1xf32>
    %120 = arith.divf %118, %119 : vector<16x1xf32>
    %121 = vector.broadcast %113 : vector<16x1xf32> to vector<16x128xf32>
    %122 = arith.subf %107, %121 : vector<16x128xf32>
    %cst_45 = arith.constant 9.99999974E-6 : f32
    %123 = vector.broadcast %cst_45 : f32 to vector<16x1xf32>
    %124 = arith.addf %120, %123 : vector<16x1xf32>
    %125 = math.rsqrt %124 : vector<16x1xf32>
    %126 = vector.broadcast %125 : vector<16x1xf32> to vector<16x128xf32>
    %127 = arith.mulf %122, %126 : vector<16x128xf32>
    %128 = vector.broadcast %108 : vector<1x128xf32> to vector<16x128xf32>
    %129 = arith.mulf %127, %128 : vector<16x128xf32>
    %130 = vector.broadcast %109 : vector<1x128xf32> to vector<16x128xf32>
    %131 = arith.addf %129, %130 : vector<16x128xf32>
    %c0_46 = arith.constant 0 : index
    %c0_47 = arith.constant 0 : index
    %132 = vector.load %arg9[%c0_46, %c0_47] : memref<128x256xf32, #tpu.memory_space<vmem>>, vector<128x256xf32>
    %cst_48 = arith.constant dense<0.000000e+00> : vector<16x256xf32>
    %133 = tpu.matmul %131, %132, %cst_48 {dimension_numbers = #tpu.dot_dimension_numbers<[1], [0], [0], [1], [0, 0, 1, 1], [], []>} : vector<16x128xf32>, vector<128x256xf32>, vector<16x256xf32> -> vector<16x256xf32>
    %c0_49 = arith.constant 0 : index
    %c0_50 = arith.constant 0 : index
    %134 = vector.load %arg10[%c0_49, %c0_50] : memref<1x256xf32, #tpu.memory_space<vmem>>, vector<1x256xf32>
    %135 = vector.broadcast %134 : vector<1x256xf32> to vector<16x256xf32>
    %136 = arith.addf %133, %135 : vector<16x256xf32>
    %cst_51 = arith.constant 5.000000e-01 : f32
    %137 = vector.broadcast %cst_51 : f32 to vector<16x256xf32>
    %138 = arith.mulf %137, %136 : vector<16x256xf32>
    %cst_52 = arith.constant 4.471500e-02 : f32
    %139 = vector.broadcast %cst_52 : f32 to vector<16x256xf32>
    %140 = arith.mulf %139, %136 : vector<16x256xf32>
    %141 = arith.mulf %140, %136 : vector<16x256xf32>
    %142 = arith.mulf %141, %136 : vector<16x256xf32>
    %143 = arith.addf %136, %142 : vector<16x256xf32>
    %cst_53 = arith.constant 0.797884583 : f32
    %144 = vector.broadcast %cst_53 : f32 to vector<16x256xf32>
    %145 = arith.mulf %144, %143 : vector<16x256xf32>
    %146 = math.tanh %145 : vector<16x256xf32>
    %cst_54 = arith.constant 1.000000e+00 : f32
    %147 = vector.broadcast %cst_54 : f32 to vector<16x256xf32>
    %148 = arith.addf %147, %146 : vector<16x256xf32>
    %149 = arith.mulf %138, %148 : vector<16x256xf32>
    %c0_55 = arith.constant 0 : index
    %c0_56 = arith.constant 0 : index
    %150 = vector.load %arg11[%c0_55, %c0_56] : memref<256x128xf32, #tpu.memory_space<vmem>>, vector<256x128xf32>
    %cst_57 = arith.constant dense<0.000000e+00> : vector<16x128xf32>
    %151 = tpu.matmul %149, %150, %cst_57 {dimension_numbers = #tpu.dot_dimension_numbers<[1], [0], [0], [1], [0, 0, 1, 1], [], []>} : vector<16x256xf32>, vector<256x128xf32>, vector<16x128xf32> -> vector<16x128xf32>
    %c0_58 = arith.constant 0 : index
    %c0_59 = arith.constant 0 : index
    %152 = vector.load %arg12[%c0_58, %c0_59] : memref<1x128xf32, #tpu.memory_space<vmem>>, vector<1x128xf32>
    %153 = vector.broadcast %152 : vector<1x128xf32> to vector<16x128xf32>
    %154 = arith.addf %151, %153 : vector<16x128xf32>
    %155 = arith.addf %154, %131 : vector<16x128xf32>
    %c0_60 = arith.constant 0 : index
    %c0_61 = arith.constant 0 : index
    %156 = vector.load %arg13[%c0_60, %c0_61] : memref<1x128xf32, #tpu.memory_space<vmem>>, vector<1x128xf32>
    %c0_62 = arith.constant 0 : index
    %c0_63 = arith.constant 0 : index
    %157 = vector.load %arg14[%c0_62, %c0_63] : memref<1x128xf32, #tpu.memory_space<vmem>>, vector<1x128xf32>
    %cst_64 = arith.constant dense<0.000000e+00> : vector<16xf32>
    %158 = vector.multi_reduction <add>, %155, %cst_64 [1] : vector<16x128xf32> to vector<16xf32>
    %159 = vector.shape_cast %158 : vector<16xf32> to vector<16x1xf32>
    %cst_65 = arith.constant 1.280000e+02 : f32
    %160 = vector.broadcast %cst_65 : f32 to vector<16x1xf32>
    %161 = arith.divf %159, %160 : vector<16x1xf32>
    %162 = vector.broadcast %161 : vector<16x1xf32> to vector<16x128xf32>
    %163 = arith.subf %155, %162 : vector<16x128xf32>
    %164 = arith.mulf %163, %163 : vector<16x128xf32>
    %cst_66 = arith.constant dense<0.000000e+00> : vector<16xf32>
    %165 = vector.multi_reduction <add>, %164, %cst_66 [1] : vector<16x128xf32> to vector<16xf32>
    %166 = vector.shape_cast %165 : vector<16xf32> to vector<16x1xf32>
    %cst_67 = arith.constant 1.280000e+02 : f32
    %167 = vector.broadcast %cst_67 : f32 to vector<16x1xf32>
    %168 = arith.divf %166, %167 : vector<16x1xf32>
    %169 = vector.broadcast %161 : vector<16x1xf32> to vector<16x128xf32>
    %170 = arith.subf %155, %169 : vector<16x128xf32>
    %cst_68 = arith.constant 9.99999974E-6 : f32
    %171 = vector.broadcast %cst_68 : f32 to vector<16x1xf32>
    %172 = arith.addf %168, %171 : vector<16x1xf32>
    %173 = math.rsqrt %172 : vector<16x1xf32>
    %174 = vector.broadcast %173 : vector<16x1xf32> to vector<16x128xf32>
    %175 = arith.mulf %170, %174 : vector<16x128xf32>
    %176 = vector.broadcast %156 : vector<1x128xf32> to vector<16x128xf32>
    %177 = arith.mulf %175, %176 : vector<16x128xf32>
    %178 = vector.broadcast %157 : vector<1x128xf32> to vector<16x128xf32>
    %179 = arith.addf %177, %178 : vector<16x128xf32>
    %c0_69 = arith.constant 0 : index
    %c0_70 = arith.constant 0 : index
    %c0_71 = arith.constant 0 : index
    %180 = vector.load %arg15[%c0_69, %c0_70, %c0_71] : memref<1x16x128xf32, #tpu.memory_space<vmem>>, vector<1x16x128xf32>
    %181 = vector.shape_cast %180 : vector<1x16x128xf32> to vector<16x128xf32>
    %182 = vector.shape_cast %179 : vector<16x128xf32> to vector<1x16x128xf32>
    tpu.vector_store %arg15[%c0_69, %c0_70, %c0_71], %182 {strides = array<i32>} : memref<1x16x128xf32, #tpu.memory_space<vmem>>, vector<1x16x128xf32>,
    return
  }
  func.func @transform_0(%arg0: i32) -> (i32, i32, i32) {
    %c0_i32 = arith.constant 0 : i32
    %c0_i32_0 = arith.constant 0 : i32
    %c0_i32_1 = arith.constant 0 : i32
    return %arg0, %c0_i32, %c0_i32_0 : i32, i32, i32
  }
  func.func @transform_1(%arg0: i32) -> (i32, i32, i32) {
    %c0_i32 = arith.constant 0 : i32
    %c0_i32_0 = arith.constant 0 : i32
    %c0_i32_1 = arith.constant 0 : i32
    return %arg0, %c0_i32, %c0_i32_0 : i32, i32, i32
  }
  func.func @transform_2(%arg0: i32) -> (i32, i32) {
    %c0_i32 = arith.constant 0 : i32
    %c0_i32_0 = arith.constant 0 : i32
    %c0_i32_1 = arith.constant 0 : i32
    return %c0_i32, %c0_i32_0 : i32, i32
  }
  func.func @transform_3(%arg0: i32) -> (i32, i32) {
    %c0_i32 = arith.constant 0 : i32
    %c0_i32_0 = arith.constant 0 : i32
    %c0_i32_1 = arith.constant 0 : i32
    return %c0_i32, %c0_i32_0 : i32, i32
  }
  func.func @transform_4(%arg0: i32) -> (i32, i32) {
    %c0_i32 = arith.constant 0 : i32
    %c0_i32_0 = arith.constant 0 : i32
    %c0_i32_1 = arith.constant 0 : i32
    return %c0_i32, %c0_i32_0 : i32, i32
  }
  func.func @transform_5(%arg0: i32) -> (i32, i32) {
    %c0_i32 = arith.constant 0 : i32
    %c0_i32_0 = arith.constant 0 : i32
    %c0_i32_1 = arith.constant 0 : i32
    return %c0_i32, %c0_i32_0 : i32, i32
  }
  func.func @transform_6(%arg0: i32) -> (i32, i32) {
    %c0_i32 = arith.constant 0 : i32
    %c0_i32_0 = arith.constant 0 : i32
    %c0_i32_1 = arith.constant 0 : i32
    return %c0_i32, %c0_i32_0 : i32, i32
  }
  func.func @transform_7(%arg0: i32) -> (i32, i32) {
    %c0_i32 = arith.constant 0 : i32
    %c0_i32_0 = arith.constant 0 : i32
    %c0_i32_1 = arith.constant 0 : i32
    return %c0_i32, %c0_i32_0 : i32, i32
  }
  func.func @transform_8(%arg0: i32) -> (i32, i32) {
    %c0_i32 = arith.constant 0 : i32
    %c0_i32_0 = arith.constant 0 : i32
    %c0_i32_1 = arith.constant 0 : i32
    return %c0_i32, %c0_i32_0 : i32, i32
  }
  func.func @transform_9(%arg0: i32) -> (i32, i32) {
    %c0_i32 = arith.constant 0 : i32
    %c0_i32_0 = arith.constant 0 : i32
    %c0_i32_1 = arith.constant 0 : i32
    return %c0_i32, %c0_i32_0 : i32, i32
  }
  func.func @transform_10(%arg0: i32) -> (i32, i32) {
    %c0_i32 = arith.constant 0 : i32
    %c0_i32_0 = arith.constant 0 : i32
    %c0_i32_1 = arith.constant 0 : i32
    return %c0_i32, %c0_i32_0 : i32, i32
  }
  func.func @transform_11(%arg0: i32) -> (i32, i32) {
    %c0_i32 = arith.constant 0 : i32
    %c0_i32_0 = arith.constant 0 : i32
    %c0_i32_1 = arith.constant 0 : i32
    return %c0_i32, %c0_i32_0 : i32, i32
  }
  func.func @transform_12(%arg0: i32) -> (i32, i32) {
    %c0_i32 = arith.constant 0 : i32
    %c0_i32_0 = arith.constant 0 : i32
    %c0_i32_1 = arith.constant 0 : i32
    return %c0_i32, %c0_i32_0 : i32, i32
  }
  func.func @transform_13(%arg0: i32) -> (i32, i32) {
    %c0_i32 = arith.constant 0 : i32
    %c0_i32_0 = arith.constant 0 : i32
    %c0_i32_1 = arith.constant 0 : i32
    return %c0_i32, %c0_i32_0 : i32, i32
  }
  func.func @transform_14(%arg0: i32) -> (i32, i32, i32) {
    %c0_i32 = arith.constant 0 : i32
    %c0_i32_0 = arith.constant 0 : i32
    %c0_i32_1 = arith.constant 0 : i32
    return %arg0, %c0_i32, %c0_i32_0 : i32, i32, i32
  }
}

module attributes {stable_mosaic.version = 11 : i64} {
  func.func @_pooler_kernel(%arg0: i32, %arg1: memref<2x128xf32, #tpu.memory_space<vmem>>, %arg2: memref<128x128xf32, #tpu.memory_space<vmem>>, %arg3: memref<1x128xf32, #tpu.memory_space<vmem>>, %arg4: memref<2x128xf32, #tpu.memory_space<vmem>>) attributes {dimension_semantics = [#tpu.dimension_semantics<arbitrary>], iteration_bounds = array<i64: 1>, scalar_prefetch = 0 : i64, scratch_operands = 0 : i64, tpu.core_type = #tpu.core_type<tc>, window_params = [{pipeline_mode = #tpu.pipeline_mode<synchronous>, transform_indices = @transform_0, window_bounds = array<i64: 2, 128>}, {pipeline_mode = #tpu.pipeline_mode<synchronous>, transform_indices = @transform_1, window_bounds = array<i64: 128, 128>}, {pipeline_mode = #tpu.pipeline_mode<synchronous>, transform_indices = @transform_2, window_bounds = array<i64: 1, 128>}, {pipeline_mode = #tpu.pipeline_mode<synchronous>, transform_indices = @transform_3, window_bounds = array<i64: 2, 128>}]} {
    %c0 = arith.constant 0 : index
    %c0_0 = arith.constant 0 : index
    %0 = vector.load %arg1[%c0, %c0_0] : memref<2x128xf32, #tpu.memory_space<vmem>>, vector<2x128xf32>
    %c0_1 = arith.constant 0 : index
    %c0_2 = arith.constant 0 : index
    %1 = vector.load %arg2[%c0_1, %c0_2] : memref<128x128xf32, #tpu.memory_space<vmem>>, vector<128x128xf32>
    %cst = arith.constant dense<0.000000e+00> : vector<2x128xf32>
    %2 = tpu.matmul %0, %1, %cst {dimension_numbers = #tpu.dot_dimension_numbers<[1], [0], [0], [1], [0, 0, 1, 1], [], []>} : vector<2x128xf32>, vector<128x128xf32>, vector<2x128xf32> -> vector<2x128xf32>
    %c0_3 = arith.constant 0 : index
    %c0_4 = arith.constant 0 : index
    %3 = vector.load %arg3[%c0_3, %c0_4] : memref<1x128xf32, #tpu.memory_space<vmem>>, vector<1x128xf32>
    %4 = vector.broadcast %3 : vector<1x128xf32> to vector<2x128xf32>
    %5 = arith.addf %2, %4 : vector<2x128xf32>
    %6 = math.tanh %5 : vector<2x128xf32>
    %c0_5 = arith.constant 0 : index
    %c0_6 = arith.constant 0 : index
    %7 = vector.load %arg4[%c0_5, %c0_6] : memref<2x128xf32, #tpu.memory_space<vmem>>, vector<2x128xf32>
    tpu.vector_store %arg4[%c0_5, %c0_6], %6 {strides = array<i32>} : memref<2x128xf32, #tpu.memory_space<vmem>>, vector<2x128xf32>,
    return
  }
  func.func @transform_0(%arg0: i32) -> (i32, i32) {
    %c0_i32 = arith.constant 0 : i32
    %c0_i32_0 = arith.constant 0 : i32
    %c0_i32_1 = arith.constant 0 : i32
    return %c0_i32, %c0_i32_0 : i32, i32
  }
  func.func @transform_1(%arg0: i32) -> (i32, i32) {
    %c0_i32 = arith.constant 0 : i32
    %c0_i32_0 = arith.constant 0 : i32
    %c0_i32_1 = arith.constant 0 : i32
    return %c0_i32, %c0_i32_0 : i32, i32
  }
  func.func @transform_2(%arg0: i32) -> (i32, i32) {
    %c0_i32 = arith.constant 0 : i32
    %c0_i32_0 = arith.constant 0 : i32
    %c0_i32_1 = arith.constant 0 : i32
    return %c0_i32, %c0_i32_0 : i32, i32
  }
  func.func @transform_3(%arg0: i32) -> (i32, i32) {
    %c0_i32 = arith.constant 0 : i32
    %c0_i32_0 = arith.constant 0 : i32
    %c0_i32_1 = arith.constant 0 : i32
    return %c0_i32, %c0_i32_0 : i32, i32
  }
}

</mosaic_0001>

<bundles_post_ra>
// kernel: longfo_forward.4
= control target key start
LH: loop header
LB: loop body
LE: loop exit
PB: predicated region body
PF: predicated region fallthrough
CT: control target
= control target key end

     0   :  { %v142_v4 = vmov 128.0   ;;  %s203_s0 = inlined_call_operand.vmem [shape: f32[32,128], index: 0, kind: input, shape index: {}]   ;;  %s204_s1 = inlined_call_operand.vmem [shape: f32[1,128], index: 1, kind: input, shape index: {}]   ;;  %s205_s2 = inlined_call_operand.vmem [shape: f32[1,128], index: 2, kind: input, shape index: {}]   ;;  %s206_s3 = inlined_call_operand.vmem [shape: f32[32,128], index: 3, kind: output, shape index: {}]  }
   0x1   :  { %v16_v0 = vld [vmem:[%s203_s0 + $0x10] sm:$0xff]  ;;  %v14_v1 = vld [vmem:[%s203_s0] sm:$0xff]  ;;  %v17_v2 = vld [vmem:[%s203_s0 + $0x18] sm:$0xff]  ;;  %132 = vrcp.f32 %v142_v4 }
   0x2   :  { %24 = vadd.xlane.f32.xlu1 %v16_v0  ;;  %20 = vadd.xlane.f32.xlu0 %v14_v1  ;;  %v15_v3 = vld [vmem:[%s203_s0 + $0x8] sm:$0xff]  ;;  %v130_v53 = vld [vmem:[%s204_s1] ss:$0 sm:$0xff] }
   0x3   :  { %v131_v58 = vld [vmem:[%s205_s2] ss:$0 sm:$0xff] }
   0x7   :  { %v133_v5 = vpop.eup %132 }
   0x8   :  { %v29_v6 = vmul.f32 128.0, %v133_v5  ;;  %vm33_vm0 = vweird.f32 %v133_v5 }
   0xa   :  { %26 = vadd.xlane.f32.xlu1 %v17_v2  ;;  %22 = vadd.xlane.f32.xlu0 %v15_v3  ;;  %v30_v7 = vsub.f32 1.0, %v29_v6 }
   0xc   :  { %v31_v8 = vmul.f32 %v133_v5, %v30_v7 }
   0xe   :  { %v32_v9 = vadd.f32 %v133_v5, %v31_v8 }
  0x10   :  { %v34_v10 = vsel %vm33_vm0, %v133_v5, %v32_v9 }
  0x75   :  { %v25_v11 = vpop.xlane.xlu1 %24  ;;  %v21_v12 = vpop.xlane.xlu0 %20 }
  0x76   :  { %v37_v13 = vmul.f32 %v34_v10, %v25_v11  ;;  %v35_v14 = vmul.f32 %v34_v10, %v21_v12 }
  0x78   :  { %v41_v15 = vsub.f32 %v16_v0, %v37_v13  ;;  %v39_v16 = vsub.f32 %v14_v1, %v35_v14 }
  0x7a   :  { %v45_v17 = vmul.f32 %v41_v15, %v41_v15  ;;  %v43_v18 = vmul.f32 %v39_v16, %v39_v16 }
  0x7c   :  { %51 = vadd.xlane.f32.xlu0 %v45_v17  ;;  %47 = vadd.xlane.f32.xlu2 %v43_v18 }
  0x7d   :  { %v27_v19 = vpop.xlane.xlu1 %26  ;;  %v23_v20 = vpop.xlane.xlu0 %22 }
  0x7e   :  { %v38_v21 = vmul.f32 %v34_v10, %v27_v19  ;;  %v36_v22 = vmul.f32 %v34_v10, %v23_v20 }
  0x80   :  { %v175_v23 = vsub.f32 %v17_v2, %v38_v21  ;;  %v177_v24 = vsub.f32 %v15_v3, %v36_v22 }
  0x82   :  { %v46_v25 = vmul.f32 %v175_v23, %v175_v23  ;;  %v44_v26 = vmul.f32 %v177_v24, %v177_v24 }
  0x84   :  { %53 = vadd.xlane.f32.xlu1 %v46_v25  ;;  %49 = vadd.xlane.f32.xlu2 %v44_v26 }
  0xef   :  { %v48_v27 = vpop.xlane.xlu2 %47  ;;  %v52_v28 = vpop.xlane.xlu0 %51 }
  0xf0   :  { %v55_v29 = vmul.f32 %v48_v27, %v34_v10  ;;  %v57_v30 = vmul.f32 %v52_v28, %v34_v10 }
  0xf2   :  { %v59_v31 = vadd.f32 1e-05, %v55_v29  ;;  %v61_v32 = vadd.f32 1e-05, %v57_v30 }
  0xf4   :  { %134 = vrsqrt.f32 %v59_v31  ;;  %vm69_vm3 = vweird.f32 %v59_v31  ;;  %vm89_vm5 = vweird.f32 %v61_v32 }
  0xf5   :  { %136 = vrsqrt.f32 %v61_v32 }
  0xf7   :  { %v54_v33 = vpop.xlane.xlu1 %53  ;;  %v50_v34 = vpop.xlane.xlu2 %49 }
  0xf8   :  { %v58_v35 = vmul.f32 %v54_v33, %v34_v10  ;;  %v56_v36 = vmul.f32 %v50_v34, %v34_v10 }
  0xfa   :  { %v135_v37 = vpop.eup %134  ;;  %v62_v38 = vadd.f32 1e-05, %v58_v35  ;;  %v60_v39 = vadd.f32 1e-05, %v56_v36 }
  0xfb   :  { %v137_v40 = vpop.eup %136  ;;  %v64_v41 = vmul.f32 %v135_v37, %v59_v31  ;;  %vm70_vm1 = vweird.f32 %v135_v37 }
  0xfc   :  { %v84_v42 = vmul.f32 %v137_v40, %v61_v32  ;;  %138 = vrsqrt.f32 %v62_v38  ;;  %vm90_vm2 = vweird.f32 %v137_v40  ;;  %vm71_vm4 = vmor %vm69_vm3, %vm70_vm1  ;;  %vm99_vm9 = vweird.f32 %v62_v38 }
  0xfd   :  { %v65_v43 = vmul.f32 %v135_v37, %v64_v41  ;;  %140 = vrsqrt.f32 %v60_v39  ;;  %vm91_vm6 = vmor %vm89_vm5, %vm90_vm2  ;;  %vm79_vm11 = vweird.f32 %v60_v39 }
  0xfe   :  { %v85_v44 = vmul.f32 %v137_v40, %v84_v42 }
  0xff   :  { %v66_v45 = vmul.f32 0.5, %v65_v43 }
 0x100   :  { %v86_v46 = vmul.f32 0.5, %v85_v44 }
 0x101   :  { %v67_v47 = vsub.f32 1.5, %v66_v45 }
 0x102   :  { %v139_v48 = vpop.eup %138  ;;  %v87_v49 = vsub.f32 1.5, %v86_v46 }
 0x103   :  { %v141_v50 = vpop.eup %140  ;;  %v68_v51 = vmul.f32 %v135_v37, %v67_v47  ;;  %v94_v52 = vmul.f32 %v139_v48, %v62_v38  ;;  %vm100_vm7 = vweird.f32 %v139_v48 }
 0x104   :  { %v88_v54 = vmul.f32 %v137_v40, %v87_v49  ;;  %v74_v55 = vmul.f32 %v141_v50, %v60_v39  ;;  %vm80_vm8 = vweird.f32 %v141_v50  ;;  %vm101_vm10 = vmor %vm99_vm9, %vm100_vm7 }
 0x105   :  { %v72_v56 = vsel %vm71_vm4, %v135_v37, %v68_v51  ;;  %v95_v57 = vmul.f32 %v139_v48, %v94_v52  ;;  %vm81_vm12 = vmor %vm79_vm11, %vm80_vm8 }
 0x106   :  { %v103_v59 = vmul.f32 %v72_v56, %v39_v16  ;;  %v92_v60 = vsel %vm91_vm6, %v137_v40, %v88_v54  ;;  %v75_v61 = vmul.f32 %v141_v50, %v74_v55 }
 0x107   :  { %v105_v62 = vmul.f32 %v92_v60, %v41_v15  ;;  %v96_v63 = vmul.f32 0.5, %v95_v57 }
 0x108   :  { %v110_v0 = vmul.f32 %v130_v53, %v103_v59  ;;  %v76_v1 = vmul.f32 0.5, %v75_v61 }
 0x109   :  { %v112_v2 = vmul.f32 %v130_v53, %v105_v62  ;;  %v97_v3 = vsub.f32 1.5, %v96_v63 }
 0x10a   :  { %v117_v4 = vadd.f32 %v131_v58, %v110_v0  ;;  %v77_v5 = vsub.f32 1.5, %v76_v1 }
 0x10b   :  { %v119_v6 = vadd.f32 %v131_v58, %v112_v2  ;;  %v98_v7 = vmul.f32 %v139_v48, %v97_v3 }
 0x10c   :  { %121 = vst [vmem:[%s206_s3] sm:$0xff] %v117_v4  ;;  %v78_v8 = vmul.f32 %v141_v50, %v77_v5 }
 0x10d   :  { %123 = vst [vmem:[%s206_s3 + $0x10] sm:$0xff] %v119_v6  ;;  %v102_v9 = vsel %vm101_vm10, %v139_v48, %v98_v7 }
 0x10e   :  { %v106_v10 = vmul.f32 %v102_v9, %v175_v23  ;;  %v82_v11 = vsel %vm81_vm12, %v141_v50, %v78_v8 }
 0x10f   :  { %v104_v12 = vmul.f32 %v82_v11, %v177_v24 }
 0x110   :  { %v113_v13 = vmul.f32 %v130_v53, %v106_v10 }
 0x111   :  { %v111_v14 = vmul.f32 %v130_v53, %v104_v12 }
 0x112   :  { %v120_v15 = vadd.f32 %v131_v58, %v113_v13 }
 0x113   :  { %v118_v16 = vadd.f32 %v131_v58, %v111_v14 }
 0x114   :  { %124 = vst [vmem:[%s206_s3 + $0x18] sm:$0xff] %v120_v15 }
 0x115   :  { %122 = vst [vmem:[%s206_s3 + $0x8] sm:$0xff] %v118_v16 }

// kernel: longfo_forward.7
= control target key start
LH: loop header
LB: loop body
LE: loop exit
PB: predicated region body
PF: predicated region fallthrough
CT: control target
= control target key end

     0   :  { %8 = vsyncpa [#allocation3], 0  ;;  %s186_s0 = inlined_call_operand.vmem [shape: f32[2,128], index: 0, kind: input, shape index: {}]   ;;  %s187_s1 = inlined_call_operand.hbm [shape: f32[128,128], index: 1, kind: input, shape index: {}]   ;;  %s188_s2 = inlined_call_operand.vmem [shape: f32[1,128], index: 2, kind: input, shape index: {}]   ;;  %s189_s3 = inlined_call_operand.hbm [shape: f32[2,128], index: 3, kind: output, shape index: {}]  }
   0x1   :  { %9 = vsyncpa [#allocation4], 0  ;;  %s16_s14 = sshll.u32 %s187_s1, 4  ;;  %s150_s15 = smov [#allocation2]   ;;  %s17_s14 = int_to_ptr.hbm [resolvable:$true] %s16_s14 }
   0x2   :  { %s18_s16 = sshll.u32 %s150_s15, 4  ;;  %s151_s17 = smov 128   ;;  %s19_s16 = int_to_ptr.vmem [resolvable:$true] %s18_s16 }
   0x3   :  { %s152_s18 = smov 8  }
   0x4   :  { %24 = dma.hbm_to_vmem [thread:$0]  %s17_s14, 2048, %s19_s16, [#allocation3], %s151_s17, %s151_s17, %s152_s18  }
   0x5   :  { %146 = dma.done.wait [#allocation3], 2048  }
   0x6   :  { %147 = vsyncadd [#allocation3], 4294965248  ;;  %v47_v0 = vld [vmem:[#allocation2 + $0x78] sm:$0xff]  ;;  %v46_v1 = vld [vmem:[#allocation2 + $0x70] sm:$0xff]  ;;  %s153_s22 = smov [#allocation5]   ;;  %s81_s26 = sshll.u32 %s189_s3, 4  ;;  %s82_s26 = int_to_ptr.hbm [resolvable:$true] %s81_s26 }
   0x7   :  { %52 = vmatpush.msra.mxu0 %v47_v0  ;;  %v45_v2 = vld [vmem:[#allocation2 + $0x68] sm:$0xff]  ;;  %v44_v3 = vld [vmem:[#allocation2 + $0x60] sm:$0xff]  ;;  %v43_v4 = vld [vmem:[#allocation2 + $0x58] sm:$0xff]  ;;  %s79_s23 = sshll.u32 %s153_s22, 4  ;;  %s80_s23 = int_to_ptr.vmem [resolvable:$true] %s79_s23 }
   0x8   :  { %v42_v5 = vld [vmem:[#allocation2 + $0x50] sm:$0xff]  ;;  %v41_v6 = vld [vmem:[#allocation2 + $0x48] sm:$0xff]  ;;  %v40_v7 = vld [vmem:[#allocation2 + $0x40] sm:$0xff] }
   0x9   :  { %53 = vmatpush.msra.mxu0 %v46_v1  ;;  %v39_v8 = vld [vmem:[#allocation2 + $0x38] sm:$0xff]  ;;  %v38_v9 = vld [vmem:[#allocation2 + $0x30] sm:$0xff]  ;;  %v37_v10 = vld [vmem:[#allocation2 + $0x28] sm:$0xff] }
   0xa   :  { %v36_v11 = vld [vmem:[#allocation2 + $0x20] sm:$0xff]  ;;  %v35_v12 = vld [vmem:[#allocation2 + $0x18] sm:$0xff]  ;;  %v34_v13 = vld [vmem:[#allocation2 + $0x10] sm:$0xff] }
   0xb   :  { %54 = vmatpush.msra.mxu0 %v45_v2  ;;  %v33_v14 = vld [vmem:[#allocation2 + $0x8] sm:$0xff]  ;;  %v32_v15 = vld [vmem:[#allocation2] sm:$0xff] }
   0xc   :  { %v31_v16 = vld [vmem:[%s186_s0] sm:$0x3] }
   0xd   :  { %55 = vmatpush.msra.mxu0 %v44_v3  ;;  %v95_v17 = vld [vmem:[%s188_s2] ss:$0 sm:$0xff] }
   0xf   :  { %56 = vmatpush.msra.mxu0 %v43_v4 }
  0x11   :  { %57 = vmatpush.msra.mxu0 %v42_v5 }
  0x13   :  { %58 = vmatpush.msra.mxu0 %v41_v6 }
  0x15   :  { %59 = vmatpush.msra.mxu0 %v40_v7 }
  0x17   :  { %60 = vmatpush.msra.mxu0 %v39_v8 }
  0x19   :  { %61 = vmatpush.msra.mxu0 %v38_v9 }
  0x1b   :  { %62 = vmatpush.msra.mxu0 %v37_v10 }
  0x1d   :  { %63 = vmatpush.msra.mxu0 %v36_v11 }
  0x1f   :  { %64 = vmatpush.msra.mxu0 %v35_v12 }
  0x21   :  { %65 = vmatpush.msra.mxu0 %v34_v13 }
  0x23   :  { %66 = vmatpush.msra.mxu0 %v33_v14 }
  0x25   :  { %67 = vmatpush.msra.mxu0 %v32_v15 }
  0x26   :  { %68 = vmatmul.f32.vlgmr.msra.gmra.mxu0 %v31_v16 }
  0xa3   :  { %v69_v18 = vpop.f32.mrf.mxu0 }
  0xa4   :  { %v70_v19 = vadd.f32 %v95_v17, %v69_v18 }
  0xa6   :  { %96 = vtanh.f32 %v70_v19 }
  0xac   :  { %v97_v20 = vpop.eup %96 }
  0xad   :  { %73 = vst [vmem:[#allocation5] sm:$0x3] %v97_v20 }
  0xae   :  { %84 = dma.vmem_to_hbm [thread:$0]  %s80_s23, 32, %s82_s26, [#allocation4]  }
  0xaf   :  { %148 = dma.done.wait [#allocation4], 32  }
  0xb0   :  { %149 = vsyncadd [#allocation4], 4294967264 }
  0xb1   :  { %89 = vsyncpa [#allocation3], 1 }
  0xb2   :  { %90 = vsyncpa [#allocation4], 1 }

// kernel: longfo_forward.5
= control target key start
LH: loop header
LB: loop body
LE: loop exit
PB: predicated region body
PF: predicated region fallthrough
CT: control target
= control target key end

     0   :  { %19 = vsyncpa [#allocation3], 0  ;;  %s2328_s0 = inlined_call_operand.vmem [shape: f32[2,16,128], index: 0, kind: input, shape index: {}]   ;;  %s2329_s1 = inlined_call_operand.vmem [shape: f32[2,1,16], index: 1, kind: input, shape index: {}]   ;;  %s2330_s2 = inlined_call_operand.vmem [shape: f32[128,384], index: 2, kind: input, shape index: {}]   ;;  %s2331_s3 = inlined_call_operand.vmem [shape: f32[1,384], index: 3, kind: input, shape index: {}]   ;;  %s2332_s4 = inlined_call_operand.hbm [shape: f32[128,128], index: 4, kind: input, shape index: {}]   ;;  %s2333_s5 = inlined_call_operand.vmem [shape: f32[1,128], index: 5, kind: input, shape index: {}]   ;;  %s2334_s6 = inlined_call_operand.vmem [shape: f32[1,128], index: 6, kind: input, shape index: {}]   ;;  %s2335_s7 = inlined_call_operand.vmem [shape: f32[1,128], index: 7, kind: input, shape index: {}]   ;;  %s2336_s8 = inlined_call_operand.vmem [shape: f32[128,256], index: 8, kind: input, shape index: {}]   ;;  %s2337_s9 = inlined_call_operand.vmem [shape: f32[1,256], index: 9, kind: input, shape index: {}]   ;;  %s2338_s10 = inlined_call_operand.hbm [shape: f32[256,128], index: 10, kind: input, shape index: {}]   ;;  %s2339_s11 = inlined_call_operand.vmem [shape: f32[1,128], index: 11, kind: input, shape index: {}]   ;;  %s2340_s12 = inlined_call_operand.vmem [shape: f32[1,128], index: 12, kind: input, shape index: {}]   ;;  %s2341_s13 = inlined_call_operand.vmem [shape: f32[1,128], index: 13, kind: input, shape index: {}]   ;;  %s2342_s14 = inlined_call_operand.vmem [shape: f32[2,16,128], index: 14, kind: output, shape index: {}]  }
   0x1   :  { %20 = vsyncpa [#allocation5], 0  ;;  %s1851_s29 = smov 0  }
   0x2 LB: > { %s378_s16 = sshll.u32 %s2332_s4, 4  ;;  %s1860_s17 = sadd.s32 4294967295, %s1764_s29   ;;  %s1764_s29 = sphi %s1851_s29, %s26_s29   ;;  %s379_s16 = int_to_ptr.hbm [resolvable:$true] %s378_s16 }
   0x3   : > { %p1543_p0 = scmp.ge.s32.totalorder %s1764_s29, 1  ;;  %p361_p1 = scmp.lt.s32.totalorder %s1764_s29, 3 }
   0x4   : > { %p1597_p2 = scmp.eq.s32.totalorder %s1860_s17, 0  ;;  %s1766_s19 = smov [#allocation2]  }
   0x5   : > { %p1865_p3 = pnand %p1543_p0, %p361_p1  ;;  %s380_s20 = sshll.u32 %s1766_s19, 4  ;;  %s381_s20 = int_to_ptr.vmem [resolvable:$true] %s380_s20 }
   0x6   : > { %s407_s23 = sshll.u32 %s2338_s10, 4  ;;  %s1767_s24 = smov [#allocation4]   ;;  %s408_s23 = int_to_ptr.hbm [resolvable:$true] %s407_s23 }
   0x7   : > { %p1590_p4 = pneg %p1865_p3  ;;  %s409_s25 = sshll.u32 %s1767_s24, 4  ;;  %s410_s25 = int_to_ptr.vmem [resolvable:$true] %s409_s25 }
   0x8   : > { %s1768_s26 = smov 128   ;;  %s1769_s27 = smov 8  }
   0x9   : > { %p1591_p5 = pnand %p1597_p2, %p1590_p4  ;;  %448 = sbr.rel (%p1865_p3) target bundleno = 2230 (0x8b6), region = 76 }
   0xb   : > { %1593 = dma.hbm_to_vmem [thread:$0]  (!%p1591_p5), %s379_s16, 2048, %s381_s20, [#allocation3], %s1768_s26, %s1768_s26, %s1769_s27  }
   0xc   : > { %1596 = dma.hbm_to_vmem [thread:$0]  (!%p1591_p5), %s408_s23, 4096, %s410_s25, [#allocation5], %s1768_s26, %s1768_s26, %s1769_s27  }
   0xe   : > { %1755 = dma.done.wait (%p1597_p2), [#allocation3], 2048  }
   0xf   : > { %1757 = vsyncadd (%p1597_p2), [#allocation3], 4294965248 }
  0x10   : > { %1759 = dma.done.wait (%p1597_p2), [#allocation5], 4096  }
  0x11   : > { %1761 = vsyncadd (%p1597_p2), [#allocation5], 4294963200  ;;  %v564_v0 = vld [vmem:[%s2330_s2 + $0x170] sm:$0xff]  ;;  %v561_v1 = vld [vmem:[%s2330_s2 + $0x158] sm:$0xff]  ;;  %p503_p6 = scmp.lt.s32.totalorder %s1860_s17, 1  ;;  %vm667_vm0 = vcmask 261120  }
  0x12   : > { %597 = vmatpush.msra.mxu1 %v564_v0  ;;  %v558_v2 = vld [vmem:[%s2330_s2 + $0x140] sm:$0xff]  ;;  %v563_v3 = vld [vmem:[%s2330_s2 + $0x168] sm:$0xff]  ;;  %v560_v4 = vld [vmem:[%s2330_s2 + $0x150] sm:$0xff]  ;;  %s1770_s20 = smov 64   ;;  %s1771_s23 = smov 96   ;;  %vm707_vm7 = vcmask 130048  }
  0x13   : > { %574 = vmatpush.msra.mxu0 %v563_v3  ;;  %v555_v5 = vld [vmem:[%s2330_s2 + $0x128] sm:$0xff]  ;;  %v557_v6 = vld [vmem:[%s2330_s2 + $0x138] sm:$0xff]  ;;  %v552_v7 = vld [vmem:[%s2330_s2 + $0x110] sm:$0xff]  ;;  %s2345_s17 = smov (!%p503_p6, %s1860_s17), 1  ;;  %s1772_s24 = smov 32   ;;  %vm1087_vm10 = vcmask 523264  }
  0x14   : > { %598 = vmatpush.msra.mxu1 %v561_v1  ;;  %v554_v8 = vld [vmem:[%s2330_s2 + $0x120] sm:$0xff]  ;;  %v549_v9 = vld [vmem:[%s2330_s2 + $0xf8] sm:$0xff]  ;;  %v551_v10 = vld [vmem:[%s2330_s2 + $0x108] sm:$0xff]  ;;  %s1580_s22 = sshll.u32 %s2345_s17, 4  ;;  %s510_s27 = scalar_lea.vmem %s2329_s1, %s2345_s17  ;;  %vm1090_vm11 = vcmask 785408  }
  0x15   : > { %575 = vmatpush.msra.mxu0 %v560_v4  ;;  %v546_v11 = vld [vmem:[%s2330_s2 + $0xe0] sm:$0xff]  ;;  %v548_v12 = vld [vmem:[%s2330_s2 + $0xf0] sm:$0xff]  ;;  %v565_v13 = vld [vmem:[%s2330_s2 + $0x178] sm:$0xff]  ;;  %s507_s21 = scalar_lea.vmem %s2328_s0, %s1580_s22  ;;  %s515_s15 = scalar_lea.vmem %s2342_s14, %s1580_s22 }
  0x16   : > { %599 = vmatpush.msra.mxu1 %v558_v2  ;;  %v562_v14 = vld [vmem:[%s2330_s2 + $0x160] sm:$0xff]  ;;  %v543_v15 = vld [vmem:[%s2330_s2 + $0xc8] sm:$0xff]  ;;  %v545_v16 = vld [vmem:[%s2330_s2 + $0xd8] sm:$0xff]  ;;  %620 = vmatpush.msra.mxu2 %v565_v13 }
  0x17   : > { %576 = vmatpush.msra.mxu0 %v557_v6  ;;  %v559_v17 = vld [vmem:[%s2330_s2 + $0x148] sm:$0xff]  ;;  %v540_v18 = vld [vmem:[%s2330_s2 + $0xb0] sm:$0xff]  ;;  %v542_v19 = vld [vmem:[%s2330_s2 + $0xc0] sm:$0xff] }
  0x18   : > { %600 = vmatpush.msra.mxu1 %v555_v5  ;;  %621 = vmatpush.msra.mxu2 %v562_v14  ;;  %v537_v20 = vld [vmem:[%s2330_s2 + $0x98] sm:$0xff]  ;;  %v556_v21 = vld [vmem:[%s2330_s2 + $0x130] sm:$0xff]  ;;  %v534_v22 = vld [vmem:[%s2330_s2 + $0x80] sm:$0xff]  ;;  %v1773_v14 = vmov 0  }
  0x19   : > { %577 = vmatpush.msra.mxu0 %v554_v8  ;;  %v539_v23 = vld [vmem:[%s2330_s2 + $0xa8] sm:$0xff]  ;;  %v553_v24 = vld [vmem:[%s2330_s2 + $0x118] sm:$0xff]  ;;  %v536_v25 = vld [vmem:[%s2330_s2 + $0x90] sm:$0xff] }
  0x1a   : > { %601 = vmatpush.msra.mxu1 %v552_v7  ;;  %622 = vmatpush.msra.mxu2 %v559_v17  ;;  %v550_v26 = vld [vmem:[%s2330_s2 + $0x100] sm:$0xff]  ;;  %v531_v27 = vld [vmem:[%s2330_s2 + $0x68] sm:$0xff]  ;;  %v533_v28 = vld [vmem:[%s2330_s2 + $0x78] sm:$0xff]  ;;  %v643_v7 = vlaneseq }
  0x1b   : > { %578 = vmatpush.msra.mxu0 %v551_v10  ;;  %v547_v29 = vld [vmem:[%s2330_s2 + $0xe8] sm:$0xff]  ;;  %v528_v30 = vld [vmem:[%s2330_s2 + $0x50] sm:$0xff]  ;;  %v530_v31 = vld [vmem:[%s2330_s2 + $0x60] sm:$0xff] }
  0x1c   : > { %602 = vmatpush.msra.mxu1 %v549_v9  ;;  %623 = vmatpush.msra.mxu2 %v556_v21  ;;  %v544_v32 = vld [vmem:[%s2330_s2 + $0xd0] sm:$0xff]  ;;  %v525_v33 = vld [vmem:[%s2330_s2 + $0x38] sm:$0xff]  ;;  %v527_v34 = vld [vmem:[%s2330_s2 + $0x48] sm:$0xff]  ;;  %v644_v8 = vshrl.u32 %v643_v7, 7  ;;  %v647_v9 = vand.u32 127, %v643_v7 }
  0x1d   : > { %579 = vmatpush.msra.mxu0 %v548_v12  ;;  %v541_v35 = vld [vmem:[%s2330_s2 + $0xb8] sm:$0xff]  ;;  %v522_v36 = vld [vmem:[%s2330_s2 + $0x20] sm:$0xff]  ;;  %v524_v37 = vld [vmem:[%s2330_s2 + $0x30] sm:$0xff] }
  0x1e   : > { %603 = vmatpush.msra.mxu1 %v546_v11  ;;  %624 = vmatpush.msra.mxu2 %v553_v24  ;;  %v538_v38 = vld [vmem:[%s2330_s2 + $0xa0] sm:$0xff]  ;;  %v519_v39 = vld [vmem:[%s2330_s2 + $0x8] sm:$0xff]  ;;  %v521_v40 = vld [vmem:[%s2330_s2 + $0x18] sm:$0xff]  ;;  %v648_v12 = vsub.s32 %v644_v8, %v647_v9 }
  0x1f   : > { %580 = vmatpush.msra.mxu0 %v545_v16  ;;  %v2019_v41 = vld [vmem:[%s507_s21] sm:$0xff]  ;;  %v535_v42 = vld [vmem:[%s2330_s2 + $0x88] sm:$0xff]  ;;  %v532_v44 = vld [vmem:[%s2330_s2 + $0x70] sm:$0xff]  ;;  %v645_v16 = vadd.s32 8, %v644_v8 }
  0x20   : > { %604 = vmatpush.msra.mxu1 %v543_v15  ;;  %625 = vmatpush.msra.mxu2 %v550_v26  ;;  %v518_v43 = vld [vmem:[%s2330_s2] sm:$0xff]  ;;  %v529_v45 = vld [vmem:[%s2330_s2 + $0x58] sm:$0xff]  ;;  %v2038_v47 = vld [vmem:[%s507_s21 + $0x8] sm:$0xff]  ;;  %v651_v13 = vsub.s32 0, %v648_v12  ;;  %vm650_vm2 = vcmp.lt.s32.totalorder %v648_v12, 0 }
  0x21   : > { %581 = vmatpush.msra.mxu0 %v542_v19  ;;  %v526_v46 = vld [vmem:[%s2330_s2 + $0x40] sm:$0xff]  ;;  %v523_v48 = vld [vmem:[%s2330_s2 + $0x28] sm:$0xff]  ;;  %v520_v49 = vld [vmem:[%s2330_s2 + $0x10] sm:$0xff]  ;;  %v649_v19 = vsub.s32 %v645_v16, %v647_v9 }
  0x22   : > { %605 = vmatpush.msra.mxu1 %v540_v18  ;;  %626 = vmatpush.msra.mxu2 %v547_v29  ;;  %v566_v51 = vld [vmem:[%s2331_s3] sm:$0x7]  ;;  %v652_v18 = vsel %vm650_vm2, %v651_v13, %v648_v12 }
  0x23   : > { %582 = vmatpush.msra.mxu0 %v539_v23  ;;  %v569_v52 = vperm.slane %v566_v51, 1  ;;  %v568_v56 = vperm.slane %v566_v51, 0  ;;  %v570_v62 = vperm.slane %v566_v51, 2  ;;  %v658_v10 = vld [vmem:[%s510_s27] sm:$0x1]  ;;  %vm656_vm3 = vcmp.le.s32.totalorder %v652_v18, 2 }
  0x24   : > { %606 = vmatpush.msra.mxu1 %v537_v20  ;;  %627 = vmatpush.msra.mxu2 %v544_v32  ;;  %vm659_vm1 = vcmp.gt.f32.partialorder %v658_v10, 0.5  ;;  %v654_v20 = vsub.s32 0, %v649_v19  ;;  %vm653_vm5 = vcmp.lt.s32.totalorder %v649_v19, 0  ;;  %v1774_v23 = vmov -1e+09  }
  0x25   : > { %583 = vmatpush.msra.mxu0 %v536_v25  ;;  %v660_v15 = vsel %vm659_vm1, 1, %v1773_v14 }
  0x26   : > { %607 = vmatpush.msra.mxu1 %v534_v22  ;;  %628 = vmatpush.msra.mxu2 %v541_v35  ;;  %v661_v17 = vperm.slane %v660_v15, 0  ;;  %v655_v21 = vsel %vm653_vm5, %v654_v20, %v649_v19 }
  0x27   : > { %584 = vmatpush.msra.mxu0 %v533_v28  ;;  %vm657_vm8 = vcmp.le.s32.totalorder %v655_v21, 2 }
  0x28   : > { %608 = vmatpush.msra.mxu1 %v531_v27  ;;  %629 = vmatpush.msra.mxu2 %v538_v38  ;;  %vm662_vm4 = vcmp.eq.s32.totalorder %v661_v17, 1 }
  0x29   : > { %585 = vmatpush.msra.mxu0 %v530_v31  ;;  %vm663_vm6 = vmand %vm656_vm3, %vm662_vm4 }
  0x2a   : > { %609 = vmatpush.msra.mxu1 %v528_v30  ;;  %630 = vmatpush.msra.mxu2 %v535_v42  ;;  %v2096_v24 = vsel %vm663_vm6, 0.0, %v1774_v23  ;;  %vm664_vm9 = vmand %vm657_vm8, %vm662_vm4 }
  0x2b   : > { %586 = vmatpush.msra.mxu0 %v527_v34  ;;  %v2100_v29 = vsel %vm664_vm9, 0.0, %v1774_v23 }
  0x2c   : > { %610 = vmatpush.msra.mxu1 %v525_v33  ;;  %631 = vmatpush.msra.mxu2 %v532_v44 }
  0x2d   : > { %587 = vmatpush.msra.mxu0 %v524_v37 }
  0x2e   : > { %611 = vmatpush.msra.mxu1 %v522_v36  ;;  %632 = vmatpush.msra.mxu2 %v529_v45 }
  0x2f   : > { %588 = vmatpush.msra.mxu0 %v521_v40 }
  0x30   : > { %612 = vmatpush.msra.mxu1 %v519_v39  ;;  %633 = vmatpush.msra.mxu2 %v526_v46 }
  0x31   : > { %613 = vmatmul.f32.vlgmr.msra.gmra.mxu1 %v2019_v41  ;;  %589 = vmatpush.msra.mxu0 %v518_v43 }
  0x32   : > { %590 = vmatmul.f32.vlgmr.msra.gmra.mxu0 %v2019_v41  ;;  %634 = vmatpush.msra.mxu2 %v523_v48 }
  0x34   : > { %635 = vmatpush.msra.mxu2 %v520_v49 }
  0x35   : > { %636 = vmatmul.f32.vlgmr.msra.gmra.mxu2 %v2019_v41 }
  0x39   : > { %616 = vmatmul.f32.gmra.mxu1 %v2038_v47 }
  0x3a   : > { %593 = vmatmul.f32.gmra.mxu0 %v2038_v47 }
  0x3d   : > { %639 = vmatmul.f32.gmra.mxu2 %v2038_v47 }
  0xae   : > { %v614_v50 = vpop.f32.mrf.mxu1 }
  0xaf   : > { %v591_v55 = vpop.f32.mrf.mxu0  ;;  %v615_v57 = vadd.f32 %v614_v50, %v569_v52 }
  0xb0   : > { %v2061_v58 = vadd.f32 %v591_v55, %v568_v56 }
  0xb6   : > { %v617_v53 = vpop.f32.mrf.mxu1 }
  0xb7   : > { %v2053_v54 = vadd.f32 %v617_v53, %v569_v52  ;;  %v594_v59 = vpop.f32.mrf.mxu0 }
  0xb8   : > { %v2067_v60 = vadd.f32 %v594_v59, %v568_v56  ;;  %v637_v61 = vpop.f32.mrf.mxu2 }
  0xb9   : > { %867 = vrot.lane.b32.xlu1 %v2053_v54, %s1770_s20  ;;  %765 = vrot.lane.b32.xlu2 %v2053_v54, %s1771_s23  ;;  %v2074_v0 = vadd.f32 %v637_v61, %v570_v62 }
  0xba   : > { %1554 = vmatpush.xpose.msk.msra.mxu3 %vm667_vm0, %v2053_v54 }
  0xbe   : > { %1555 = vmatpush.xpose.msk.msra.mxu3 %vm667_vm0, %v615_v57 }
  0xc0   : > { %v640_v63 = vpop.f32.mrf.mxu2 }
  0xc1   : > { %1556 = vmatmul.msk.f32.vlgmr.msra.gmra.mxu3 %vm667_vm0, %v2061_v58  ;;  %763 = vrot.lane.b32.xlu2 %v615_v57, %s1771_s23  ;;  %v2076_v1 = vadd.f32 %v640_v63, %v570_v62 }
  0xc3   : > { %750 = vmatpush.msrb.mxu3 %v2076_v1 }
  0xc5   : > { %751 = vmatpush.msrb.mxu3 %v2074_v0 }
  0xc9   : > { %1557 = vmatmul.msk.f32.gmra.mxu3 %vm667_vm0, %v2067_v60  ;;  %865 = vrot.lane.b32.xlu2 %v615_v57, %s1770_s20 }
  0xd1   : > { %761 = vrot.lane.b32.xlu2 %v2067_v60, %s1771_s23 }
  0xd9   : > { %861 = vrot.lane.b32.xlu2 %v2061_v58, %s1770_s20 }
  0xe1   : > { %965 = vrot.lane.b32.xlu2 %v615_v57, %s1772_s24 }
  0xe9   : > { %963 = vrot.lane.b32.xlu2 %v2067_v60, %s1772_s24 }
 0x113   : > { %v766_v2 = vpop.permute.xlu2 %765 }
 0x114   : > { %1560 = vmatpush.xpose.msk.msra.mxu3 %vm667_vm0, %v766_v2 }
 0x11b   : > { %v764_v3 = vpop.permute.xlu2 %763 }
 0x11c   : > { %1561 = vmatpush.xpose.msk.msra.mxu3 %vm667_vm0, %v764_v3 }
 0x123   : > { %v866_v4 = vpop.permute.xlu2 %865 }
 0x12b   : > { %v868_v5 = vpop.permute.xlu1 %867  ;;  %v2087_v6 = vpop.permute.xlu2 %761 }
 0x12c   : > { %1566 = vmatpush.xpose.msk.msrb.mxu2 %vm667_vm0, %v868_v5 }
 0x130   : > { %1567 = vmatpush.xpose.msk.msrb.mxu2 %vm667_vm0, %v866_v4 }
 0x133   : > { %v862_v11 = vpop.permute.xlu2 %861 }
 0x134   : > { %1568 = vmatmul.msk.f32.vlgmr.msrb.gmra.mxu2 %vm667_vm0, %v862_v11 }
 0x13b   : > { %v966_v56 = vpop.permute.xlu2 %965 }
 0x143   : > { %v964_v62 = vpop.permute.xlu2 %963 }
 0x144   : > { %v697_v22 = vpop.f32.mrf.mxu3 }
 0x145   : > { %v703_v25 = vmul.f32 0.17677669, %v697_v22 }
 0x147   : > { %v705_v26 = vadd.f32 %v703_v25, %v2096_v24 }
 0x149   : > { %v708_v27 = vsel %vm707_vm7, %v705_v26, -inf }
 0x14a   : > { %709 = vmax.xlane.f32.xlu0 %v708_v27 }
 0x14c   : > { %v700_v28 = vpop.f32.mrf.mxu3 }
 0x14d   : > { %v704_v30 = vmul.f32 0.17677669, %v700_v28 }
 0x14f   : > { %v706_v31 = vadd.f32 %v704_v30, %v2100_v29 }
 0x151   : > { %v711_v32 = vsel %vm707_vm7, %v706_v31, -inf }
 0x152   : > { %712 = vmax.xlane.f32.xlu0 %v711_v32 }
 0x166   : > { %759 = vrot.lane.b32.xlu0 %v2061_v58, %s1771_s23 }
 0x16e   : > { %967 = vrot.lane.b32.xlu0 %v2053_v54, %s1772_s24 }
 0x176   : > { %863 = vrot.lane.b32.xlu0 %v2067_v60, %s1770_s20 }
 0x1b7   : > { %v894_v33 = vpop.f32.mrf.mxu2 }
 0x1b8   : > { %v900_v34 = vmul.f32 0.17677669, %v894_v33 }
 0x1ba   : > { %v902_v35 = vadd.f32 %v900_v34, %v2096_v24 }
 0x1bc   : > { %v904_v36 = vsel %vm707_vm7, %v902_v35, -inf }
 0x1bd   : > { %v710_v37 = vpop.xlane.xlu0 %709  ;;  %905 = vmax.xlane.f32.xlu2 %v904_v36 }
 0x1be   : > { %v714_v38 = vsub.f32 %v705_v26, %v710_v37 }
 0x1c0   : > { %v716_v39 = vmul.f32 1.442695, %v714_v38 }
 0x1c2   : > { %1640 = vpow2.f32 %v716_v39 }
 0x1c5   : > { %v713_v40 = vpop.xlane.xlu0 %712 }
 0x1c6   : > { %v715_v42 = vsub.f32 %v706_v31, %v713_v40 }
 0x1c8   : > { %v1641_v43 = vpop.eup %1640  ;;  %v718_v44 = vmul.f32 1.442695, %v715_v42 }
 0x1c9   : > { %v720_v45 = vsel %vm707_vm7, %v1641_v43, 0.0 }
 0x1ca   : > { %1642 = vpow2.f32 %v718_v44  ;;  %721 = vadd.xlane.f32.xlu1 %v720_v45 }
 0x1d0   : > { %v1643_v46 = vpop.eup %1642 }
 0x1d1   : > { %v723_v48 = vsel %vm707_vm7, %v1643_v46, 0.0 }
 0x1d2   : > { %724 = vadd.xlane.f32.xlu1 %v723_v48 }
 0x1d8   : > { %v760_v49 = vpop.permute.xlu0 %759 }
 0x1e0   : > { %v968_v50 = vpop.permute.xlu0 %967 }
 0x1e8   : > { %v864_v51 = vpop.permute.xlu0 %863 }
 0x1e9   : > { %1569 = vmatmul.msk.f32.gmra.mxu2 %vm667_vm0, %v864_v51 }
 0x1eb   : > { %961 = vrot.lane.b32.xlu1 %v2061_v58, %s1772_s24 }
 0x230   : > { %v906_v10 = vpop.xlane.xlu2 %905 }
 0x231   : > { %v910_v13 = vsub.f32 %v902_v35, %v906_v10 }
 0x233   : > { %v912_v15 = vmul.f32 1.442695, %v910_v13 }
 0x23d   : > { %v722_v52 = vpop.xlane.xlu1 %721 }
 0x23e   : > { %1644 = vrcp.f32 %v722_v52 }
 0x244   : > { %v1645_v53 = vpop.eup %1644 }
 0x245   : > { %v725_v54 = vpop.xlane.xlu1 %724  ;;  %v728_v55 = vmul.f32 %v1645_v53, %v1641_v43 }
 0x246   : > { %1646 = vrcp.f32 %v725_v54 }
 0x247   : > { %1558 = vmatmul.msk.f32.vlgmr.msrb.gmra.mxu3 %vm707_vm7, %v728_v55  ;;  %1648 = vpow2.f32 %v912_v15 }
 0x248   : > { %1572 = vmatpush.xpose.msk.msrb.mxu3 %vm667_vm0, %v968_v50 }
 0x24c   : > { %v1647_v57 = vpop.eup %1646  ;;  %1573 = vmatpush.xpose.msk.msrb.mxu3 %vm667_vm0, %v966_v56 }
 0x24d   : > { %v729_v59 = vmul.f32 %v1647_v57, %v1643_v46  ;;  %v2138_v22 = vpop.eup %1648 }
 0x24e   : > { %v916_v25 = vsel %vm707_vm7, %v2138_v22, 0.0 }
 0x24f   : > { %1559 = vmatmul.msk.f32.gmra.mxu3 %vm707_vm7, %v729_v59 }
 0x257   : > { %1562 = vmatmul.msk.f32.vlgmr.msra.gmra.mxu3 %vm667_vm0, %v760_v49 }
 0x25d   : > { %v962_v58 = vpop.permute.xlu1 %961 }
 0x25f   : > { %1563 = vmatmul.msk.f32.gmra.mxu3 %vm667_vm0, %v2087_v6 }
 0x267   : > { %1574 = vmatmul.msk.f32.vlgmr.msrb.gmra.mxu3 %vm667_vm0, %v962_v58 }
 0x26c   : > { %v897_v60 = vpop.f32.mrf.mxu2 }
 0x26d   : > { %v901_v61 = vmul.f32 0.17677669, %v897_v60 }
 0x26f   : > { %1575 = vmatmul.msk.f32.gmra.mxu3 %vm667_vm0, %v964_v62  ;;  %v903_v63 = vadd.f32 %v901_v61, %v2100_v29 }
 0x271   : > { %v907_v2 = vsel %vm707_vm7, %v903_v63, -inf }
 0x272   : > { %908 = vmax.xlane.f32.xlu0 %v907_v2 }
 0x2ca   : > { %v2128_v3 = vpop.f32.mrf.mxu3 }
 0x2d2   : > { %v2130_v4 = vpop.f32.mrf.mxu3 }
 0x2da   : > { %v792_v5 = vpop.f32.mrf.mxu3 }
 0x2db   : > { %v798_v7 = vmul.f32 0.17677669, %v792_v5 }
 0x2dd   : > { %v800_v6 = vadd.f32 %v798_v7, %v2096_v24 }
 0x2df   : > { %v802_v8 = vsel %vm707_vm7, %v800_v6, -inf }
 0x2e0   : > { %803 = vmax.xlane.f32.xlu1 %v802_v8 }
 0x2e2   : > { %v795_v9 = vpop.f32.mrf.mxu3 }
 0x2e3   : > { %v799_v11 = vmul.f32 0.17677669, %v795_v9 }
 0x2e5   : > { %v801_v12 = vadd.f32 %v799_v11, %v2100_v29  ;;  %v909_v27 = vpop.xlane.xlu0 %908 }
 0x2e6   : > { %v911_v28 = vsub.f32 %v903_v63, %v909_v27  ;;  %v1105_v27 = vld [vmem:[#allocation2 + $0x60] sm:$0xff] }
 0x2e7   : > { %v805_v14 = vsel %vm707_vm7, %v801_v12, -inf }
 0x2e8   : > { %806 = vmax.xlane.f32.xlu0 %v805_v14  ;;  %v914_v30 = vmul.f32 1.442695, %v911_v28  ;;  %v1104_v28 = vld [vmem:[#allocation2 + $0x58] sm:$0xff] }
 0x2ea   : > { %v994_v16 = vpop.f32.mrf.mxu3  ;;  %1650 = vpow2.f32 %v914_v30  ;;  %v1103_v30 = vld [vmem:[#allocation2 + $0x50] sm:$0xff] }
 0x2eb   : > { %v1000_v17 = vmul.f32 0.17677669, %v994_v16 }
 0x2ed   : > { %v1002_v18 = vadd.f32 %v1000_v17, %v2096_v24  ;;  %v1619_v24 = vpack.i.bf16 %v2074_v0, %v2076_v1 }
 0x2ef   : > { %v1004_v19 = vsel %vm707_vm7, %v1002_v18, -inf }
 0x2f0   : > { %1005 = vmax.xlane.f32.xlu1 %v1004_v19  ;;  %v1651_v31 = vpop.eup %1650 }
 0x2f1   : > { %v919_v32 = vsel %vm707_vm7, %v1651_v31, 0.0 }
 0x2f2   : > { %v997_v20 = vpop.f32.mrf.mxu3 }
 0x2f3   : > { %v1001_v21 = vmul.f32 0.17677669, %v997_v20 }
 0x2f5   : > { %v1003_v23 = vadd.f32 %v1001_v21, %v2100_v29 }
 0x2f7   : > { %v1007_v26 = vsel %vm707_vm7, %v1003_v23, -inf }
 0x2f8   : > { %917 = vadd.xlane.f32.xlu1 %v916_v25  ;;  %1008 = vmax.xlane.f32.xlu2 %v1007_v26  ;;  %v1108_v25 = vld [vmem:[#allocation2 + $0x78] sm:$0xff]  ;;  %v1107_v26 = vld [vmem:[#allocation2 + $0x70] sm:$0xff] }
 0x2f9   : > { %1113 = vmatpush.msrb.mxu1 %v1108_v25  ;;  %v1216_v25 = vld [vmem:[%s2336_s8 + $0x98] sm:$0xff] }
 0x2fb   : > { %1114 = vmatpush.msrb.mxu1 %v1107_v26  ;;  %v1213_v26 = vld [vmem:[%s2336_s8 + $0x80] sm:$0xff] }
 0x2fc   : > { %1620 = vrot.lane.b32.xlu0 %v1619_v24, %s1771_s23 }
 0x326   : > { %920 = vadd.xlane.f32.xlu0 %v919_v32  ;;  %v1102_v32 = vld [vmem:[#allocation2 + $0x48] sm:$0xff] }
 0x353   : > { %v804_v29 = vpop.xlane.xlu1 %803 }
 0x354   : > { %v808_v33 = vsub.f32 %v800_v6, %v804_v29  ;;  %v1101_v29 = vld [vmem:[#allocation2 + $0x40] sm:$0xff] }
 0x356   : > { %v810_v34 = vmul.f32 1.442695, %v808_v33  ;;  %v1100_v33 = vld [vmem:[#allocation2 + $0x38] sm:$0xff] }
 0x358   : > { %1652 = vpow2.f32 %v810_v34  ;;  %v1099_v34 = vld [vmem:[#allocation2 + $0x30] sm:$0xff] }
 0x35b   : > { %v807_v35 = vpop.xlane.xlu0 %806 }
 0x35c   : > { %v809_v36 = vsub.f32 %v801_v12, %v807_v35  ;;  %v1098_v35 = vld [vmem:[#allocation2 + $0x28] sm:$0xff] }
 0x35e   : > { %v1653_v37 = vpop.eup %1652  ;;  %v812_v38 = vmul.f32 1.442695, %v809_v36  ;;  %v1097_v36 = vld [vmem:[#allocation2 + $0x20] sm:$0xff] }
 0x35f   : > { %v814_v0 = vsel %vm707_vm7, %v1653_v37, 0.0 }
 0x360   : > { %1654 = vpow2.f32 %v812_v38  ;;  %815 = vadd.xlane.f32.xlu1 %v814_v0  ;;  %v1095_v38 = vld [vmem:[#allocation2 + $0x10] sm:$0xff]  ;;  %v1094_v0 = vld [vmem:[#allocation2 + $0x8] sm:$0xff] }
 0x363   : > { %v1006_v1 = vpop.xlane.xlu1 %1005 }
 0x364   : > { %v1010_v39 = vsub.f32 %v1002_v18, %v1006_v1  ;;  %v1093_v1 = vld [vmem:[#allocation2] sm:$0xff] }
 0x366   : > { %v1655_v40 = vpop.eup %1654  ;;  %v1012_v42 = vmul.f32 1.442695, %v1010_v39 }
 0x367   : > { %v817_v43 = vsel %vm707_vm7, %v1655_v40, 0.0 }
 0x368   : > { %1656 = vpow2.f32 %v1012_v42  ;;  %818 = vadd.xlane.f32.xlu2 %v817_v43 }
 0x36b   : > { %v1009_v50 = vpop.xlane.xlu2 %1008  ;;  %v918_v55 = vpop.xlane.xlu1 %917 }
 0x36c   : > { %v1011_v51 = vsub.f32 %v1003_v23, %v1009_v50 }
 0x36e   : > { %v1657_v44 = vpop.eup %1656  ;;  %v1621_v45 = vpop.permute.xlu0 %1620  ;;  %v1014_v52 = vmul.f32 1.442695, %v1011_v51 }
 0x36f   : > { %v1016_v46 = vsel %vm707_vm7, %v1657_v44, 0.0  ;;  %v1622_v48 = vunpack.i.l.bf16 %v1621_v45  ;;  %v1623_v49 = vunpack.i.h.bf16 %v1621_v45 }
 0x370   : > { %1017 = vadd.xlane.f32.xlu1 %v1016_v46  ;;  %1658 = vpow2.f32 %v1014_v52 }
 0x371   : > { %852 = vmatpush.msrb.mxu0 %v1622_v48 }
 0x373   : > { %853 = vmatpush.msrb.mxu0 %v1623_v49 }
 0x376   : > { %v1659_v53 = vpop.eup %1658 }
 0x377   : > { %v1019_v54 = vsel %vm707_vm7, %v1659_v53, 0.0 }
 0x380   : > { %1625 = vrot.lane.b32.xlu2 %v1619_v24, %s1770_s20 }
 0x389   : > { %1630 = vrot.lane.b32.xlu1 %v1619_v24, %s1772_s24  ;;  %v1106_v24 = vld [vmem:[#allocation2 + $0x68] sm:$0xff] }
 0x38a   : > { %1115 = vmatpush.msrb.mxu1 %v1106_v24  ;;  %v1214_v24 = vld [vmem:[%s2336_s8 + $0x88] sm:$0xff] }
 0x38c   : > { %1116 = vmatpush.msrb.mxu1 %v1105_v27  ;;  %v1211_v27 = vld [vmem:[%s2336_s8 + $0x70] sm:$0xff] }
 0x38e   : > { %1117 = vmatpush.msrb.mxu1 %v1104_v28  ;;  %v1212_v28 = vld [vmem:[%s2336_s8 + $0x78] sm:$0xff] }
 0x390   : > { %1118 = vmatpush.msrb.mxu1 %v1103_v30  ;;  %v1209_v30 = vld [vmem:[%s2336_s8 + $0x60] sm:$0xff] }
 0x392   : > { %1119 = vmatpush.msrb.mxu1 %v1102_v32  ;;  %v1207_v32 = vld [vmem:[%s2336_s8 + $0x50] sm:$0xff] }
 0x394   : > { %1120 = vmatpush.msrb.mxu1 %v1101_v29  ;;  %v1208_v29 = vld [vmem:[%s2336_s8 + $0x58] sm:$0xff] }
 0x396   : > { %1121 = vmatpush.msrb.mxu1 %v1100_v33  ;;  %v1205_v33 = vld [vmem:[%s2336_s8 + $0x40] sm:$0xff] }
 0x398   : > { %1122 = vmatpush.msrb.mxu1 %v1099_v34  ;;  %v1206_v34 = vld [vmem:[%s2336_s8 + $0x48] sm:$0xff] }
 0x399   : > { %v921_v61 = vpop.xlane.xlu0 %920 }
 0x39a   : > { %1123 = vmatpush.msrb.mxu1 %v1098_v35  ;;  %v1203_v35 = vld [vmem:[%s2336_s8 + $0x30] sm:$0xff] }
 0x39c   : > { %1124 = vmatpush.msrb.mxu1 %v1097_v36  ;;  %v1204_v36 = vld [vmem:[%s2336_s8 + $0x38] sm:$0xff] }
 0x3a9   : > { %1020 = vadd.xlane.f32.xlu2 %v1019_v54 }
 0x3d3   : > { %v816_v56 = vpop.xlane.xlu1 %815 }
 0x3d4   : > { %1660 = vrcp.f32 %v816_v56 }
 0x3da   : > { %v1661_v57 = vpop.eup %1660 }
 0x3db   : > { %v819_v59 = vpop.xlane.xlu2 %818  ;;  %v822_v58 = vmul.f32 %v1661_v57, %v1653_v37  ;;  %v1096_v37 = vld [vmem:[#allocation2 + $0x18] sm:$0xff] }
 0x3dc   : > { %1662 = vrcp.f32 %v819_v59  ;;  %1125 = vmatpush.msrb.mxu1 %v1096_v37  ;;  %v1201_v37 = vld [vmem:[%s2336_s8 + $0x20] sm:$0xff] }
 0x3dd   : > { %1564 = vmatmul.msk.f32.vlgmr.msrb.gmra.mxu0 %vm707_vm7, %v822_v58  ;;  %1664 = vrcp.f32 %v918_v55  ;;  %v1775_v58 = vmov 128.0  }
 0x3de   : > { %1666 = vrcp.f32 %v921_v61  ;;  %1126 = vmatpush.msrb.mxu1 %v1095_v38  ;;  %v1202_v38 = vld [vmem:[%s2336_s8 + $0x28] sm:$0xff] }
 0x3e0   : > { %1127 = vmatpush.msrb.mxu1 %v1094_v0  ;;  %v1199_v0 = vld [vmem:[%s2336_s8 + $0x10] sm:$0xff] }
 0x3e2   : > { %v1663_v60 = vpop.eup %1662  ;;  %1128 = vmatpush.msrb.mxu1 %v1093_v1  ;;  %v1200_v1 = vld [vmem:[%s2336_s8 + $0x18] sm:$0xff] }
 0x3e3   : > { %v1626_v62 = vpop.permute.xlu2 %1625  ;;  %v823_v63 = vmul.f32 %v1663_v60, %v1655_v40  ;;  %v1665_v2 = vpop.eup %1664 }
 0x3e4   : > { %v1627_v5 = vunpack.i.l.bf16 %v1626_v62  ;;  %v1628_v7 = vunpack.i.h.bf16 %v1626_v62  ;;  %v924_v6 = vmul.f32 %v1665_v2, %v2138_v22  ;;  %v1667_v8 = vpop.eup %1666  ;;  %v1018_v10 = vpop.xlane.xlu1 %1017  ;;  %v1227_v62 = vld [vmem:[%s2336_s8 + $0xf0] sm:$0xff] }
 0x3e5   : > { %1565 = vmatmul.msk.f32.gmra.mxu0 %vm707_vm7, %v823_v63  ;;  %v925_v9 = vmul.f32 %v1667_v8, %v1651_v31  ;;  %1668 = vrcp.f32 %v1018_v10  ;;  %v1228_v63 = vld [vmem:[%s2336_s8 + $0xf8] sm:$0xff] }
 0x3e6   : > { %952 = vmatpush.msra.mxu2 %v1627_v5  ;;  %1258 = vmatpush.msra.mxu3 %v1228_v63 }
 0x3e8   : > { %953 = vmatpush.msra.mxu2 %v1628_v7 }
 0x3e9   : > { %1570 = vmatmul.msk.f32.vlgmr.msra.gmra.mxu2 %vm707_vm7, %v924_v6 }
 0x3ea   : > { %1235 = vmatpush.msrb.mxu2 %v1227_v62 }
 0x3eb   : > { %v1669_v12 = vpop.eup %1668 }
 0x3ec   : > { %v1024_v15 = vmul.f32 %v1669_v12, %v1657_v44 }
 0x3f1   : > { %1571 = vmatmul.msk.f32.gmra.mxu2 %vm707_vm7, %v925_v9 }
 0x3fb   : > { %v1631_v11 = vpop.permute.xlu1 %1630 }
 0x3fc   : > { %v1632_v13 = vunpack.i.l.bf16 %v1631_v11  ;;  %v1633_v14 = vunpack.i.h.bf16 %v1631_v11 }
 0x3fe   : > { %1052 = vmatpush.msra.mxu0 %v1632_v13 }
 0x400   : > { %1053 = vmatpush.msra.mxu0 %v1633_v14 }
 0x401   : > { %1576 = vmatmul.msk.f32.vlgmr.msra.gmra.mxu0 %vm707_vm7, %v1024_v15  ;;  %v1223_v15 = vld [vmem:[%s2336_s8 + $0xd0] sm:$0xff] }
 0x41c   : > { %v1021_v16 = vpop.xlane.xlu2 %1020 }
 0x41d   : > { %1670 = vrcp.f32 %v1021_v16  ;;  %v1224_v16 = vld [vmem:[%s2336_s8 + $0xd8] sm:$0xff] }
 0x41e   : > { %1672 = vrcp.f32 %v1775_v58 }
 0x423   : > { %v1671_v17 = vpop.eup %1670 }
 0x424   : > { %v1025_v18 = vmul.f32 %v1671_v17, %v1659_v53  ;;  %v1634_v53 = vld [vmem:[%s2333_s5] ss:$0 sm:$0xff] }
 0x425   : > { %v1221_v17 = vld [vmem:[%s2336_s8 + $0xc0] sm:$0xff] }
 0x426   : > { %1577 = vmatmul.msk.f32.gmra.mxu0 %vm707_vm7, %v1025_v18  ;;  %v1222_v18 = vld [vmem:[%s2336_s8 + $0xc8] sm:$0xff] }
 0x45a   : > { %v855_v19 = vpop.f32.mrf.mxu0 }
 0x462   : > { %v858_v21 = vpop.f32.mrf.mxu0 }
 0x46c   : > { %v955_v20 = vpop.f32.mrf.mxu2 }
 0x46d   : > { %1071 = vrot.lane.b32.xlu1 %v955_v20, %s1770_s20  ;;  %v1220_v20 = vld [vmem:[%s2336_s8 + $0xb8] sm:$0xff] }
 0x474   : > { %v958_v23 = vpop.f32.mrf.mxu2 }
 0x475   : > { %1063 = vrot.lane.b32.xlu1 %v855_v19, %s1772_s24  ;;  %v1219_v19 = vld [vmem:[%s2336_s8 + $0xb0] sm:$0xff] }
 0x47d   : > { %1065 = vrot.lane.b32.xlu1 %v858_v21, %s1772_s24  ;;  %v1217_v21 = vld [vmem:[%s2336_s8 + $0xa0] sm:$0xff] }
 0x47e   : > { %v1055_v22 = vpop.f32.mrf.mxu0 }
 0x47f   : > { %1079 = vrot.lane.b32.xlu0 %v1055_v22, %s1771_s23  ;;  %v1218_v22 = vld [vmem:[%s2336_s8 + $0xa8] sm:$0xff] }
 0x485   : > { %1073 = vrot.lane.b32.xlu1 %v958_v23, %s1770_s20  ;;  %v1215_v23 = vld [vmem:[%s2336_s8 + $0x90] sm:$0xff] }
 0x4a3   : > { %v1058_v31 = vpop.f32.mrf.mxu0 }
 0x4a4   : > { %1081 = vrot.lane.b32.xlu2 %v1058_v31, %s1771_s23  ;;  %v1210_v31 = vld [vmem:[%s2336_s8 + $0x68] sm:$0xff] }
 0x4df   : > { %v1072_v39 = vpop.permute.xlu1 %1071 }
 0x4e7   : > { %v1064_v40 = vpop.permute.xlu1 %1063 }
 0x4e8   : > { %v1085_v42 = vsel %vm667_vm0, %v2128_v3, %v1064_v40  ;;  %v1198_v40 = vld [vmem:[%s2336_s8 + $0x8] sm:$0xff] }
 0x4e9   : > { %v1088_v45 = vsel %vm1087_vm10, %v1085_v42, %v1072_v39  ;;  %v1197_v39 = vld [vmem:[%s2336_s8] sm:$0xff] }
 0x4ef   : > { %v1066_v43 = vpop.permute.xlu1 %1065 }
 0x4f0   : > { %v1086_v49 = vsel %vm667_vm0, %v2130_v4, %v1066_v43  ;;  %v1673_v4 = vpop.eup %1672 }
 0x4f1   : > { %v1080_v44 = vpop.permute.xlu0 %1079  ;;  %v1145_v60 = vmul.f32 128.0, %v1673_v4  ;;  %vm1149_vm12 = vweird.f32 %v1673_v4 }
 0x4f2   : > { %v1091_v46 = vsel %vm1090_vm11, %v1088_v45, %v1080_v44  ;;  %v1332_v45 = vld [vmem:[#allocation4 + $0x78] sm:$0xff] }
 0x4f3   : > { %1129 = vmatmul.f32.vlgmr.msrb.gmra.mxu1 %v1091_v46  ;;  %v1146_v61 = vsub.f32 1.0, %v1145_v60  ;;  %v1348_v46 = vld [vmem:[#allocation4 + $0xf8] sm:$0xff]  ;;  %1353 = vmatpush.msrb.mxu0 %v1332_v45 }
 0x4f4   : > { %1376 = vmatpush.msra.mxu1 %v1348_v46 }
 0x4f5   : > { %v1147_v2 = vmul.f32 %v1673_v4, %v1146_v61  ;;  %v1635_v61 = vld [vmem:[%s2334_s6] ss:$0 sm:$0xff] }
 0x4f7   : > { %v1074_v48 = vpop.permute.xlu1 %1073  ;;  %v1148_v5 = vadd.f32 %v1673_v4, %v1147_v2 }
 0x4f8   : > { %v1089_v50 = vsel %vm1087_vm10, %v1086_v49, %v1074_v48  ;;  %v1331_v48 = vld [vmem:[#allocation4 + $0x70] sm:$0xff] }
 0x4f9   : > { %v2188_v7 = vsel %vm1149_vm12, %v1673_v4, %v1148_v5  ;;  %1354 = vmatpush.msrb.mxu0 %v1331_v48 }
 0x4fe   : > { %v1082_v51 = vpop.permute.xlu2 %1081 }
 0x4ff   : > { %v1092_v52 = vsel %vm1090_vm11, %v1089_v50, %v1082_v51  ;;  %v1347_v50 = vld [vmem:[#allocation4 + $0xf0] sm:$0xff] }
 0x500   : > { %1132 = vmatmul.f32.gmra.mxu1 %v1092_v52  ;;  %v1330_v52 = vld [vmem:[#allocation4 + $0x68] sm:$0xff] }
 0x501   : > { %1377 = vmatpush.msra.mxu1 %v1347_v50  ;;  %1355 = vmatpush.msrb.mxu0 %v1330_v52 }
 0x570   : > { %v1130_v3 = vpop.f32.mrf.mxu1 }
 0x571   : > { %v1131_v54 = vadd.f32 %v1634_v53, %v1130_v3 }
 0x573   : > { %v1136_v55 = vadd.f32 %v1131_v54, %v2019_v41  ;;  %v1225_v41 = vld [vmem:[%s2336_s8 + $0xe0] sm:$0xff] }
 0x574   : > { %1236 = vmatpush.msrb.mxu2 %v1225_v41  ;;  %v1636_v41 = vld [vmem:[%s2335_s7] ss:$0 sm:$0xff] }
 0x575   : > { %1140 = vadd.xlane.f32.xlu1 %v1136_v55 }
 0x576   : > { %1237 = vmatpush.msrb.mxu2 %v1223_v15 }
 0x578   : > { %1238 = vmatpush.msrb.mxu2 %v1221_v17  ;;  %v1328_v17 = vld [vmem:[#allocation4 + $0x58] sm:$0xff] }
 0x57a   : > { %1239 = vmatpush.msrb.mxu2 %v1219_v19  ;;  %v1327_v19 = vld [vmem:[#allocation4 + $0x50] sm:$0xff] }
 0x57c   : > { %1240 = vmatpush.msrb.mxu2 %v1217_v21  ;;  %v1326_v21 = vld [vmem:[#allocation4 + $0x48] sm:$0xff] }
 0x57d   : > { %v1133_v56 = vpop.f32.mrf.mxu1 }
 0x57e   : > { %v1134_v57 = vadd.f32 %v1634_v53, %v1133_v56  ;;  %1241 = vmatpush.msrb.mxu2 %v1215_v23  ;;  %v1346_v53 = vld [vmem:[#allocation4 + $0xe8] sm:$0xff]  ;;  %v1329_v56 = vld [vmem:[#allocation4 + $0x60] sm:$0xff] }
 0x57f   : > { %1378 = vmatpush.msra.mxu1 %v1346_v53  ;;  %1356 = vmatpush.msrb.mxu0 %v1329_v56  ;;  %v1341_v23 = vld [vmem:[#allocation4 + $0xc0] sm:$0xff] }
 0x580   : > { %v1137_v59 = vadd.f32 %v1134_v57, %v2038_v47  ;;  %v1226_v47 = vld [vmem:[%s2336_s8 + $0xe8] sm:$0xff]  ;;  %1242 = vmatpush.msrb.mxu2 %v1213_v26  ;;  %v1345_v57 = vld [vmem:[#allocation4 + $0xe0] sm:$0xff]  ;;  %v1340_v26 = vld [vmem:[#allocation4 + $0xb8] sm:$0xff] }
 0x581   : > { %1259 = vmatpush.msra.mxu3 %v1226_v47  ;;  %1379 = vmatpush.msra.mxu1 %v1345_v57 }
 0x582   : > { %1142 = vadd.xlane.f32.xlu0 %v1137_v59  ;;  %1243 = vmatpush.msrb.mxu2 %v1211_v27  ;;  %v1339_v27 = vld [vmem:[#allocation4 + $0xb0] sm:$0xff] }
 0x583   : > { %1260 = vmatpush.msra.mxu3 %v1224_v16  ;;  %1357 = vmatpush.msrb.mxu0 %v1328_v17 }
 0x584   : > { %1244 = vmatpush.msrb.mxu2 %v1209_v30  ;;  %v1338_v30 = vld [vmem:[#allocation4 + $0xa8] sm:$0xff] }
 0x585   : > { %1261 = vmatpush.msra.mxu3 %v1222_v18  ;;  %v1344_v18 = vld [vmem:[#allocation4 + $0xd8] sm:$0xff]  ;;  %1358 = vmatpush.msrb.mxu0 %v1327_v19 }
 0x586   : > { %1245 = vmatpush.msrb.mxu2 %v1207_v32  ;;  %1380 = vmatpush.msra.mxu1 %v1344_v18  ;;  %v1337_v32 = vld [vmem:[#allocation4 + $0xa0] sm:$0xff] }
 0x587   : > { %1262 = vmatpush.msra.mxu3 %v1220_v20  ;;  %v1343_v20 = vld [vmem:[#allocation4 + $0xd0] sm:$0xff]  ;;  %1359 = vmatpush.msrb.mxu0 %v1326_v21 }
 0x588   : > { %1246 = vmatpush.msrb.mxu2 %v1205_v33  ;;  %1381 = vmatpush.msra.mxu1 %v1343_v20  ;;  %v1336_v33 = vld [vmem:[#allocation4 + $0x98] sm:$0xff] }
 0x589   : > { %1263 = vmatpush.msra.mxu3 %v1218_v22  ;;  %v1342_v22 = vld [vmem:[#allocation4 + $0xc8] sm:$0xff] }
 0x58a   : > { %1247 = vmatpush.msrb.mxu2 %v1203_v35  ;;  %1382 = vmatpush.msra.mxu1 %v1342_v22  ;;  %v1335_v35 = vld [vmem:[#allocation4 + $0x90] sm:$0xff] }
 0x58b   : > { %1264 = vmatpush.msra.mxu3 %v1216_v25  ;;  %v1324_v25 = vld [vmem:[#allocation4 + $0x38] sm:$0xff] }
 0x58c   : > { %1248 = vmatpush.msrb.mxu2 %v1201_v37  ;;  %1383 = vmatpush.msra.mxu1 %v1341_v23  ;;  %v1334_v37 = vld [vmem:[#allocation4 + $0x88] sm:$0xff] }
 0x58d   : > { %1265 = vmatpush.msra.mxu3 %v1214_v24  ;;  %v1323_v24 = vld [vmem:[#allocation4 + $0x30] sm:$0xff] }
 0x58e   : > { %1249 = vmatpush.msrb.mxu2 %v1199_v0  ;;  %1384 = vmatpush.msra.mxu1 %v1340_v26  ;;  %v1333_v0 = vld [vmem:[#allocation4 + $0x80] sm:$0xff] }
 0x58f   : > { %1266 = vmatpush.msra.mxu3 %v1212_v28  ;;  %v1322_v28 = vld [vmem:[#allocation4 + $0x28] sm:$0xff] }
 0x590   : > { %1250 = vmatpush.msrb.mxu2 %v1197_v39  ;;  %1385 = vmatpush.msra.mxu1 %v1339_v27 }
 0x591   : > { %1267 = vmatpush.msra.mxu3 %v1210_v31  ;;  %v1321_v31 = vld [vmem:[#allocation4 + $0x20] sm:$0xff] }
 0x592   : > { %1386 = vmatpush.msra.mxu1 %v1338_v30 }
 0x593   : > { %1268 = vmatpush.msra.mxu3 %v1208_v29  ;;  %v1320_v29 = vld [vmem:[#allocation4 + $0x18] sm:$0xff] }
 0x594   : > { %1387 = vmatpush.msra.mxu1 %v1337_v32 }
 0x595   : > { %1269 = vmatpush.msra.mxu3 %v1206_v34  ;;  %v1319_v34 = vld [vmem:[#allocation4 + $0x10] sm:$0xff] }
 0x596   : > { %1388 = vmatpush.msra.mxu1 %v1336_v33 }
 0x597   : > { %1270 = vmatpush.msra.mxu3 %v1204_v36  ;;  %v1318_v36 = vld [vmem:[#allocation4 + $0x8] sm:$0xff] }
 0x598   : > { %1389 = vmatpush.msra.mxu1 %v1335_v35 }
 0x599   : > { %1271 = vmatpush.msra.mxu3 %v1202_v38  ;;  %v1317_v38 = vld [vmem:[#allocation4] sm:$0xff] }
 0x59a   : > { %1390 = vmatpush.msra.mxu1 %v1334_v37 }
 0x59b   : > { %1272 = vmatpush.msra.mxu3 %v1200_v1  ;;  %v1229_v1 = vld [vmem:[%s2337_s9] sm:$0x3] }
 0x59c   : > { %1391 = vmatpush.msra.mxu1 %v1333_v0  ;;  %v1231_v39 = vperm.slane %v1229_v1, 0 }
 0x59d   : > { %1273 = vmatpush.msra.mxu3 %v1198_v40  ;;  %v1232_v40 = vperm.slane %v1229_v1, 1 }
 0x5e8   : > { %v1141_v6 = vpop.xlane.xlu1 %1140 }
 0x5e9   : > { %v1151_v8 = vmul.f32 %v2188_v7, %v1141_v6 }
 0x5eb   : > { %v2191_v9 = vsub.f32 %v1136_v55, %v1151_v8 }
 0x5ed   : > { %v1155_v10 = vmul.f32 %v2191_v9, %v2191_v9 }
 0x5ef   : > { %1157 = vadd.xlane.f32.xlu2 %v1155_v10 }
 0x5f5   : > { %v1143_v11 = vpop.xlane.xlu0 %1142 }
 0x5f6   : > { %v1152_v12 = vmul.f32 %v2188_v7, %v1143_v11 }
 0x5f8   : > { %v2196_v13 = vsub.f32 %v1137_v59, %v1152_v12 }
 0x5fa   : > { %v1156_v14 = vmul.f32 %v2196_v13, %v2196_v13 }
 0x5fc   : > { %1159 = vadd.xlane.f32.xlu1 %v1156_v14 }
 0x662   : > { %v1158_v42 = vpop.xlane.xlu2 %1157 }
 0x663   : > { %v1161_v43 = vmul.f32 %v1158_v42, %v2188_v7 }
 0x665   : > { %v1163_v44 = vadd.f32 1e-05, %v1161_v43 }
 0x667   : > { %1674 = vrsqrt.f32 %v1163_v44  ;;  %vm1171_vm14 = vweird.f32 %v1163_v44 }
 0x66d   : > { %v1675_v49 = vpop.eup %1674 }
 0x66e   : > { %v1166_v51 = vmul.f32 %v1675_v49, %v1163_v44  ;;  %vm1172_vm13 = vweird.f32 %v1675_v49 }
 0x66f   : > { %v1160_v3 = vpop.xlane.xlu1 %1159  ;;  %vm1173_vm15 = vmor %vm1171_vm14, %vm1172_vm13 }
 0x670   : > { %v1167_v54 = vmul.f32 %v1675_v49, %v1166_v51  ;;  %v1162_v55 = vmul.f32 %v1160_v3, %v2188_v7 }
 0x672   : > { %v1168_v59 = vmul.f32 0.5, %v1167_v54  ;;  %v1164_v58 = vadd.f32 1e-05, %v1162_v55 }
 0x674   : > { %v1169_v4 = vsub.f32 1.5, %v1168_v59  ;;  %1676 = vrsqrt.f32 %v1164_v58  ;;  %vm1181_vm1 = vweird.f32 %v1164_v58 }
 0x676   : > { %v1170_v60 = vmul.f32 %v1675_v49, %v1169_v4 }
 0x678   : > { %v1174_v62 = vsel %vm1173_vm15, %v1675_v49, %v1170_v60 }
 0x679   : > { %v1185_v63 = vmul.f32 %v1174_v62, %v2191_v9 }
 0x67a   : > { %v1677_v47 = vpop.eup %1676 }
 0x67b   : > { %v1176_v2 = vmul.f32 %v1677_v47, %v1164_v58  ;;  %v1190_v5 = vmul.f32 %v1635_v61, %v1185_v63  ;;  %vm1182_vm0 = vweird.f32 %v1677_v47 }
 0x67c   : > { %vm1183_vm2 = vmor %vm1181_vm1, %vm1182_vm0 }
 0x67d   : > { %v1177_v6 = vmul.f32 %v1677_v47, %v1176_v2  ;;  %v2293_v8 = vadd.f32 %v1636_v41, %v1190_v5 }
 0x67f   : > { %v1178_v10 = vmul.f32 0.5, %v1177_v6  ;;  %1251 = vmatmul.f32.vlgmr.msrb.gmra.mxu2 %v2293_v8  ;;  %1274 = vmatmul.f32.vlgmr.msra.gmra.mxu3 %v2293_v8 }
 0x681   : > { %v1179_v11 = vsub.f32 1.5, %v1178_v10 }
 0x683   : > { %v1180_v12 = vmul.f32 %v1677_v47, %v1179_v11 }
 0x685   : > { %v1184_v9 = vsel %vm1183_vm2, %v1677_v47, %v1180_v12 }
 0x686   : > { %v1186_v14 = vmul.f32 %v1184_v9, %v2196_v13  ;;  %v1325_v13 = vld [vmem:[#allocation4 + $0x40] sm:$0xff] }
 0x687   : > { %1360 = vmatpush.msrb.mxu0 %v1325_v13 }
 0x688   : > { %v1191_v15 = vmul.f32 %v1635_v61, %v1186_v14 }
 0x689   : > { %1361 = vmatpush.msrb.mxu0 %v1324_v25 }
 0x68a   : > { %v2298_v16 = vadd.f32 %v1636_v41, %v1191_v15 }
 0x68b   : > { %1362 = vmatpush.msrb.mxu0 %v1323_v24  ;;  %v1637_v24 = vld [vmem:[%s2339_s11] ss:$0 sm:$0xff] }
 0x68c   : > { %1254 = vmatmul.f32.gmra.mxu2 %v2298_v16  ;;  %1277 = vmatmul.f32.gmra.mxu3 %v2298_v16 }
 0x68d   : > { %1363 = vmatpush.msrb.mxu0 %v1322_v28 }
 0x68f   : > { %1364 = vmatpush.msrb.mxu0 %v1321_v31 }
 0x691   : > { %1365 = vmatpush.msrb.mxu0 %v1320_v29 }
 0x693   : > { %1366 = vmatpush.msrb.mxu0 %v1319_v34 }
 0x695   : > { %1367 = vmatpush.msrb.mxu0 %v1318_v36 }
 0x697   : > { %1368 = vmatpush.msrb.mxu0 %v1317_v38 }
 0x702   : > { %v1252_v42 = vpop.f32.mrf.mxu2  ;;  %v1275_v43 = vpop.f32.mrf.mxu3 }
 0x703   : > { %v1253_v44 = vadd.f32 %v1252_v42, %v1231_v39  ;;  %v1276_v45 = vadd.f32 %v1275_v43, %v1232_v40 }
 0x705   : > { %v1285_v46 = vmul.f32 0.044715, %v1253_v44  ;;  %v1286_v48 = vmul.f32 0.044715, %v1276_v45  ;;  %v1281_v47 = vmul.f32 0.5, %v1253_v44  ;;  %v1282_v10 = vmul.f32 0.5, %v1276_v45 }
 0x707   : > { %v1289_v49 = vmul.f32 %v1285_v46, %v1253_v44  ;;  %v1290_v50 = vmul.f32 %v1286_v48, %v1276_v45 }
 0x709   : > { %v1293_v51 = vmul.f32 %v1289_v49, %v1253_v44  ;;  %v1294_v52 = vmul.f32 %v1290_v50, %v1276_v45 }
 0x70b   : > { %v1297_v53 = vadd.f32 %v1293_v51, %v1253_v44  ;;  %v1298_v3 = vadd.f32 %v1294_v52, %v1276_v45 }
 0x70d   : > { %v1301_v54 = vmul.f32 0.7978846, %v1297_v53  ;;  %v1302_v55 = vmul.f32 0.7978846, %v1298_v3 }
 0x70f   : > { %v1255_v56 = vpop.f32.mrf.mxu2  ;;  %v1278_v57 = vpop.f32.mrf.mxu3  ;;  %1678 = vtanh.f32 %v1301_v54  ;;  %v1638_v54 = vld [vmem:[%s2340_s12] ss:$0 sm:$0xff] }
 0x710   : > { %v1256_v59 = vadd.f32 %v1255_v56, %v1231_v39  ;;  %v1279_v58 = vadd.f32 %v1278_v57, %v1232_v40  ;;  %1680 = vtanh.f32 %v1302_v55  ;;  %v1639_v56 = vld [vmem:[%s2341_s13] ss:$0 sm:$0xff] }
 0x712   : > { %v1287_v4 = vmul.f32 0.044715, %v1256_v59  ;;  %v1288_v60 = vmul.f32 0.044715, %v1279_v58  ;;  %v1283_v21 = vmul.f32 0.5, %v1256_v59  ;;  %v1284_v13 = vmul.f32 0.5, %v1279_v58 }
 0x714   : > { %v1291_v61 = vmul.f32 %v1287_v4, %v1256_v59  ;;  %v1292_v62 = vmul.f32 %v1288_v60, %v1279_v58 }
 0x715   : > { %v1679_v63 = vpop.eup %1678 }
 0x716   : > { %v1681_v41 = vpop.eup %1680  ;;  %v1309_v2 = vadd.f32 1.0, %v1679_v63  ;;  %v1295_v5 = vmul.f32 %v1291_v61, %v1256_v59  ;;  %v1296_v6 = vmul.f32 %v1292_v62, %v1279_v58 }
 0x717   : > { %v1310_v11 = vadd.f32 1.0, %v1681_v41 }
 0x718   : > { %v1313_v12 = vmul.f32 %v1309_v2, %v1281_v47  ;;  %v1299_v9 = vadd.f32 %v1295_v5, %v1256_v59  ;;  %v1300_v14 = vadd.f32 %v1296_v6, %v1279_v58 }
 0x719   : > { %v1314_v15 = vmul.f32 %v1310_v11, %v1282_v10 }
 0x71a   : > { %1369 = vmatmul.f32.vlgmr.msrb.gmra.mxu0 %v1313_v12  ;;  %v1303_v17 = vmul.f32 0.7978846, %v1299_v9  ;;  %v1304_v18 = vmul.f32 0.7978846, %v1300_v14 }
 0x71b   : > { %1392 = vmatmul.f32.vlgmr.msra.gmra.mxu1 %v1314_v15 }
 0x71c   : > { %1682 = vtanh.f32 %v1303_v17 }
 0x71d   : > { %1684 = vtanh.f32 %v1304_v18 }
 0x722   : > { %v1683_v19 = vpop.eup %1682 }
 0x723   : > { %v1685_v20 = vpop.eup %1684  ;;  %v1311_v22 = vadd.f32 1.0, %v1683_v19 }
 0x724   : > { %v1312_v23 = vadd.f32 1.0, %v1685_v20 }
 0x725   : > { %v1315_v25 = vmul.f32 %v1311_v22, %v1283_v21 }
 0x726   : > { %v1316_v26 = vmul.f32 %v1312_v23, %v1284_v13 }
 0x727   : > { %1372 = vmatmul.f32.gmra.mxu0 %v1315_v25 }
 0x728   : > { %1395 = vmatmul.f32.gmra.mxu1 %v1316_v26 }
 0x797   : > { %v1370_v27 = vpop.f32.mrf.mxu0 }
 0x798   : > { %v1371_v28 = vadd.f32 %v1637_v24, %v1370_v27  ;;  %v1393_v30 = vpop.f32.mrf.mxu1 }
 0x79a   : > { %v1394_v31 = vadd.f32 %v1393_v30, %v1371_v28 }
 0x79c   : > { %v1399_v32 = vadd.f32 %v1394_v31, %v2293_v8 }
 0x79e   : > { %1403 = vadd.xlane.f32.xlu0 %v1399_v32 }
 0x7a4   : > { %v1373_v29 = vpop.f32.mrf.mxu0 }
 0x7a5   : > { %v1374_v33 = vadd.f32 %v1637_v24, %v1373_v29  ;;  %v1396_v34 = vpop.f32.mrf.mxu1 }
 0x7a7   : > { %v1397_v35 = vadd.f32 %v1396_v34, %v1374_v33 }
 0x7a9   : > { %v1400_v36 = vadd.f32 %v1397_v35, %v2298_v16 }
 0x7ab   : > { %1405 = vadd.xlane.f32.xlu1 %v1400_v36 }
 0x811   : > { %v1404_v37 = vpop.xlane.xlu0 %1403 }
 0x812   : > { %v1407_v38 = vmul.f32 %v1404_v37, %v2188_v7 }
 0x814   : > { %v1409_v0 = vsub.f32 %v1399_v32, %v1407_v38 }
 0x816   : > { %v1411_v1 = vmul.f32 %v1409_v0, %v1409_v0 }
 0x818   : > { %1413 = vadd.xlane.f32.xlu0 %v1411_v1 }
 0x81e   : > { %v1406_v39 = vpop.xlane.xlu1 %1405 }
 0x81f   : > { %v1408_v40 = vmul.f32 %v1406_v39, %v2188_v7 }
 0x821   : > { %v1410_v42 = vsub.f32 %v1400_v36, %v1408_v40 }
 0x823   : > { %v1412_v43 = vmul.f32 %v1410_v42, %v1410_v42 }
 0x825   : > { %1415 = vadd.xlane.f32.xlu1 %v1412_v43 }
 0x88b   : > { %v1414_v8 = vpop.xlane.xlu0 %1413 }
 0x88c   : > { %v1417_v44 = vmul.f32 %v1414_v8, %v2188_v7 }
 0x88e   : > { %v1419_v45 = vadd.f32 1e-05, %v1417_v44 }
 0x890   : > { %1686 = vrsqrt.f32 %v1419_v45  ;;  %vm1427_vm4 = vweird.f32 %v1419_v45 }
 0x896   : > { %v1687_v46 = vpop.eup %1686 }
 0x897   : > { %v1422_v16 = vmul.f32 %v1687_v46, %v1419_v45  ;;  %vm1428_vm3 = vweird.f32 %v1687_v46 }
 0x898   : > { %v1416_v48 = vpop.xlane.xlu1 %1415  ;;  %vm1429_vm5 = vmor %vm1427_vm4, %vm1428_vm3 }
 0x899   : > { %v1423_v49 = vmul.f32 %v1687_v46, %v1422_v16  ;;  %v1418_v50 = vmul.f32 %v1416_v48, %v2188_v7 }
 0x89b   : > { %v1424_v51 = vmul.f32 0.5, %v1423_v49  ;;  %v1420_v52 = vadd.f32 1e-05, %v1418_v50 }
 0x89d   : > { %v1425_v53 = vsub.f32 1.5, %v1424_v51  ;;  %1688 = vrsqrt.f32 %v1420_v52  ;;  %vm1437_vm7 = vweird.f32 %v1420_v52 }
 0x89f   : > { %v1426_v3 = vmul.f32 %v1687_v46, %v1425_v53 }
 0x8a1   : > { %v1430_v55 = vsel %vm1429_vm5, %v1687_v46, %v1426_v3 }
 0x8a2   : > { %v1441_v57 = vmul.f32 %v1430_v55, %v1409_v0 }
 0x8a3   : > { %v1689_v7 = vpop.eup %1688 }
 0x8a4   : > { %v1446_v59 = vmul.f32 %v1638_v54, %v1441_v57  ;;  %v1432_v58 = vmul.f32 %v1689_v7, %v1420_v52  ;;  %vm1438_vm6 = vweird.f32 %v1689_v7 }
 0x8a5   : > { %vm1439_vm8 = vmor %vm1437_vm7, %vm1438_vm6 }
 0x8a6   : > { %v1451_v4 = vadd.f32 %v1639_v56, %v1446_v59  ;;  %v1433_v60 = vmul.f32 %v1689_v7, %v1432_v58 }
 0x8a8   : > { %1453 = vst [vmem:[%s515_s15] sm:$0xff] %v1451_v4  ;;  %v1434_v61 = vmul.f32 0.5, %v1433_v60 }
 0x8aa   : > { %v1435_v62 = vsub.f32 1.5, %v1434_v61 }
 0x8ac   : > { %v1436_v63 = vmul.f32 %v1689_v7, %v1435_v62 }
 0x8ae   : > { %v1440_v41 = vsel %vm1439_vm8, %v1689_v7, %v1436_v63 }
 0x8af   : > { %v1442_v47 = vmul.f32 %v1440_v41, %v1410_v42 }
 0x8b1   : > { %v1447_v2 = vmul.f32 %v1638_v54, %v1442_v47 }
 0x8b3   : > { %v1452_v5 = vadd.f32 %v1639_v56, %v1447_v2 }
 0x8b5   : > { %1454 = vst [vmem:[%s515_s15 + $0x8] sm:$0xff] %v1452_v5 }
 0x8b6 PF: > { %s26_s29 = sadd.s32 1, %s1764_s29  }
 0x8b7   : > { %p23_p7 = scmp.ge.s32.totalorder %s26_s29, 4  }
 0x8b9   :  { %25 = sbr.rel (!%p23_p7) target bundleno = 2 (0x2), region = 118 }
 0x8be   :  { %1476 = vsyncpa [#allocation3], 1 }
 0x8bf   :  { %1478 = vsyncpa [#allocation3 + $0x1], 1 }
 0x8c0   :  { %1479 = vsyncpa [#allocation5], 1 }

// kernel: longfo_forward.6
= control target key start
LH: loop header
LB: loop body
LE: loop exit
PB: predicated region body
PF: predicated region fallthrough
CT: control target
= control target key end

     0   :  { %s2260_s0 = inlined_call_operand.vmem [shape: f32[2,16,128], index: 0, kind: input, shape index: {}]   ;;  %s2261_s1 = inlined_call_operand.vmem [shape: f32[2,1,16], index: 1, kind: input, shape index: {}]   ;;  %s2262_s2 = inlined_call_operand.hbm [shape: f32[128,384], index: 2, kind: input, shape index: {}]   ;;  %s2263_s3 = inlined_call_operand.vmem [shape: f32[1,384], index: 3, kind: input, shape index: {}]   ;;  %s2264_s4 = inlined_call_operand.hbm [shape: f32[128,128], index: 4, kind: input, shape index: {}]   ;;  %s2265_s5 = inlined_call_operand.vmem [shape: f32[1,128], index: 5, kind: input, shape index: {}]   ;;  %s2266_s6 = inlined_call_operand.vmem [shape: f32[1,128], index: 6, kind: input, shape index: {}]   ;;  %s2267_s7 = inlined_call_operand.vmem [shape: f32[1,128], index: 7, kind: input, shape index: {}]   ;;  %s2268_s8 = inlined_call_operand.hbm [shape: f32[128,256], index: 8, kind: input, shape index: {}]   ;;  %s2269_s9 = inlined_call_operand.vmem [shape: f32[1,256], index: 9, kind: input, shape index: {}]   ;;  %s2270_s10 = inlined_call_operand.hbm [shape: f32[256,128], index: 10, kind: input, shape index: {}]   ;;  %s2271_s11 = inlined_call_operand.vmem [shape: f32[1,128], index: 11, kind: input, shape index: {}]   ;;  %s2272_s12 = inlined_call_operand.vmem [shape: f32[1,128], index: 12, kind: input, shape index: {}]   ;;  %s2273_s13 = inlined_call_operand.vmem [shape: f32[1,128], index: 13, kind: input, shape index: {}]   ;;  %s2274_s14 = inlined_call_operand.vmem [shape: f32[2,16,128], index: 14, kind: output, shape index: {}]  }
   0x1   :  { %2276 = sst [smem:[#allocation13_spill]] %s2262_s2 }
   0x2   :  { %2277 = sst [smem:[#allocation14_spill]] %s2264_s4 }
   0x3   :  { %2278 = sst [smem:[#allocation15_spill]] %s2273_s13 }
   0x4   :  { %2279 = sst [smem:[#allocation16_spill]] %s2274_s14 }
   0x5   :  { %19 = vsyncpa [#allocation3], 0 }
   0x6   :  { %20 = vsyncpa [#allocation5], 0 }
   0x7   :  { %21 = vsyncpa [#allocation8], 0  ;;  %s2001_s29 = smov 0  }
   0x8 LB: > { %2280 = sst [smem:[#allocation12_spill]] %s1908_s29  ;;  %s2010_s17 = sadd.s32 4294967295, %s1908_s29   ;;  %s1908_s29 = sphi %s2001_s29, %s27_s29  }
   0x9   : > { %s2281_s4 = sld [smem:[#allocation14_spill]]  ;;  %p1595_p0 = scmp.ge.s32.totalorder %s1908_s29, 1 }
   0xa   : > { %p362_p1 = scmp.lt.s32.totalorder %s1908_s29, 3  ;;  %p1667_p2 = scmp.eq.s32.totalorder %s2010_s17, 0 }
   0xb   : > { %s1910_s19 = smov [#allocation4]   ;;  %s2283_s2 = sld [smem:[#allocation13_spill]] }
   0xc   : > { %p2015_p3 = pnand %p1595_p0, %p362_p1  ;;  %s392_s20 = sshll.u32 %s1910_s19, 4  ;;  %s393_s20 = int_to_ptr.vmem [resolvable:$true] %s392_s20 }
   0xd   : > { %s1911_s25 = smov [#allocation2]   ;;  %s1912_s27 = smov 128  }
   0xe   : > { %p1654_p4 = pneg %p2015_p3  ;;  %s375_s26 = sshll.u32 %s1911_s25, 4  ;;  %s376_s26 = int_to_ptr.vmem [resolvable:$true] %s375_s26 }
   0xf   : > { %s390_s16 = sshll.u32 %s2281_s4, 4  ;;  %s1913_s28 = smov 8   ;;  %s391_s16 = int_to_ptr.hbm [resolvable:$true] %s390_s16 }
  0x10   : > { %p2026_p5 = pnand %p1667_p2, %p1654_p4  ;;  %s413_s19 = sshll.u32 %s2268_s8, 4  ;;  %s414_s19 = int_to_ptr.hbm [resolvable:$true] %s413_s19 }
  0x11   : > { %s373_s23 = sshll.u32 %s2283_s2, 4  ;;  %s1914_s21 = smov 384   ;;  %s374_s23 = int_to_ptr.hbm [resolvable:$true] %s373_s23 }
  0x12   : > { %1660 = dma.hbm_to_vmem [thread:$0]  (!%p2026_p5), %s391_s16, 2048, %s393_s20, [#allocation5], %s1912_s27, %s1912_s27, %s1913_s28  }
  0x13   : > { %s1915_s22 = smov 24   ;;  %s1916_s2 = smov [#allocation6]  }
  0x14   : > { %1657 = dma.hbm_to_vmem [thread:$0]  (!%p2026_p5), %s374_s23, 6144, %s376_s26, [#allocation3], %s1914_s21, %s1914_s21, %s1915_s22  }
  0x15   : > { %s415_s4 = sshll.u32 %s1916_s2, 4  ;;  %s1917_s29 = smov 256   ;;  %s416_s4 = int_to_ptr.vmem [resolvable:$true] %s415_s4 }
  0x16   : > { %s1918_s25 = smov 16   ;;  %s430_s16 = sshll.u32 %s2270_s10, 4  ;;  %s431_s16 = int_to_ptr.hbm [resolvable:$true] %s430_s16 }
  0x17   : > { %1663 = dma.hbm_to_vmem [thread:$0]  (!%p2026_p5), %s414_s19, 4096, %s416_s4, [#allocation5], %s1917_s29, %s1917_s29, %s1918_s25  }
  0x18   : > { %s1919_s20 = smov [#allocation7]   ;;  %471 = sbr.rel (%p2015_p3) target bundleno = 2247 (0x8c7), region = 76 }
  0x19   : > { %s432_s30 = sshll.u32 %s1919_s20, 4  ;;  %s433_s30 = int_to_ptr.vmem [resolvable:$true] %s432_s30 }
  0x1a   : > { %1666 = dma.hbm_to_vmem [thread:$0]  (!%p2026_p5), %s431_s16, 4096, %s433_s30, [#allocation8], %s1912_s27, %s1912_s27, %s1913_s28  }
  0x1d   : > { %1895 = dma.done.wait (%p1667_p2), [#allocation3], 6144  }
  0x1e   : > { %1897 = vsyncadd (%p1667_p2), [#allocation3], 4294961152 }
  0x1f   : > { %1899 = dma.done.wait (%p1667_p2), [#allocation5], 6144  }
  0x20   : > { %1901 = vsyncadd (%p1667_p2), [#allocation5], 4294961152 }
  0x21   : > { %1903 = dma.done.wait (%p1667_p2), [#allocation8], 4096  }
  0x22   : > { %1905 = vsyncadd (%p1667_p2), [#allocation8], 4294963200  ;;  %v597_v0 = vld [vmem:[#allocation2 + $0x170] sm:$0xff]  ;;  %v594_v1 = vld [vmem:[#allocation2 + $0x158] sm:$0xff]  ;;  %p536_p6 = scmp.lt.s32.totalorder %s2010_s17, 1  ;;  %vm700_vm0 = vcmask 261120  }
  0x23   : > { %630 = vmatpush.msra.mxu1 %v597_v0  ;;  %v591_v2 = vld [vmem:[#allocation2 + $0x140] sm:$0xff]  ;;  %v596_v3 = vld [vmem:[#allocation2 + $0x168] sm:$0xff]  ;;  %v593_v4 = vld [vmem:[#allocation2 + $0x150] sm:$0xff]  ;;  %s1920_s23 = smov 64   ;;  %s1921_s24 = smov 96   ;;  %vm740_vm7 = vcmask 130048  }
  0x24   : > { %607 = vmatpush.msra.mxu0 %v596_v3  ;;  %v588_v5 = vld [vmem:[#allocation2 + $0x128] sm:$0xff]  ;;  %v590_v6 = vld [vmem:[#allocation2 + $0x138] sm:$0xff]  ;;  %v585_v7 = vld [vmem:[#allocation2 + $0x110] sm:$0xff]  ;;  %s2289_s17 = smov (!%p536_p6, %s2010_s17), 1  ;;  %s1922_s26 = smov 32   ;;  %vm1120_vm10 = vcmask 523264  }
  0x25   : > { %631 = vmatpush.msra.mxu1 %v594_v1  ;;  %v587_v8 = vld [vmem:[#allocation2 + $0x120] sm:$0xff]  ;;  %v582_v9 = vld [vmem:[#allocation2 + $0xf8] sm:$0xff]  ;;  %v584_v10 = vld [vmem:[#allocation2 + $0x108] sm:$0xff]  ;;  %s1636_s2 = sshll.u32 %s2289_s17, 4  ;;  %s543_s15 = scalar_lea.vmem %s2261_s1, %s2289_s17  ;;  %vm1123_vm11 = vcmask 785408  }
  0x26   : > { %608 = vmatpush.msra.mxu0 %v593_v4  ;;  %v579_v11 = vld [vmem:[#allocation2 + $0xe0] sm:$0xff]  ;;  %v581_v12 = vld [vmem:[#allocation2 + $0xf0] sm:$0xff]  ;;  %v598_v13 = vld [vmem:[#allocation2 + $0x178] sm:$0xff]  ;;  %s540_s14 = scalar_lea.vmem %s2260_s0, %s1636_s2 }
  0x27   : > { %632 = vmatpush.msra.mxu1 %v591_v2  ;;  %v595_v14 = vld [vmem:[#allocation2 + $0x160] sm:$0xff]  ;;  %v576_v15 = vld [vmem:[#allocation2 + $0xc8] sm:$0xff]  ;;  %v578_v16 = vld [vmem:[#allocation2 + $0xd8] sm:$0xff]  ;;  %653 = vmatpush.msra.mxu2 %v598_v13 }
  0x28   : > { %609 = vmatpush.msra.mxu0 %v590_v6  ;;  %v592_v17 = vld [vmem:[#allocation2 + $0x148] sm:$0xff]  ;;  %v573_v18 = vld [vmem:[#allocation2 + $0xb0] sm:$0xff]  ;;  %v575_v19 = vld [vmem:[#allocation2 + $0xc0] sm:$0xff] }
  0x29   : > { %633 = vmatpush.msra.mxu1 %v588_v5  ;;  %654 = vmatpush.msra.mxu2 %v595_v14  ;;  %v570_v20 = vld [vmem:[#allocation2 + $0x98] sm:$0xff]  ;;  %v589_v21 = vld [vmem:[#allocation2 + $0x130] sm:$0xff]  ;;  %v567_v22 = vld [vmem:[#allocation2 + $0x80] sm:$0xff]  ;;  %v1923_v14 = vmov 0  }
  0x2a   : > { %610 = vmatpush.msra.mxu0 %v587_v8  ;;  %v572_v23 = vld [vmem:[#allocation2 + $0xa8] sm:$0xff]  ;;  %v586_v24 = vld [vmem:[#allocation2 + $0x118] sm:$0xff]  ;;  %v569_v25 = vld [vmem:[#allocation2 + $0x90] sm:$0xff] }
  0x2b   : > { %634 = vmatpush.msra.mxu1 %v585_v7  ;;  %655 = vmatpush.msra.mxu2 %v592_v17  ;;  %v583_v26 = vld [vmem:[#allocation2 + $0x100] sm:$0xff]  ;;  %v564_v27 = vld [vmem:[#allocation2 + $0x68] sm:$0xff]  ;;  %v566_v28 = vld [vmem:[#allocation2 + $0x78] sm:$0xff]  ;;  %v676_v7 = vlaneseq }
  0x2c   : > { %611 = vmatpush.msra.mxu0 %v584_v10  ;;  %v580_v29 = vld [vmem:[#allocation2 + $0xe8] sm:$0xff]  ;;  %v561_v30 = vld [vmem:[#allocation2 + $0x50] sm:$0xff]  ;;  %v563_v31 = vld [vmem:[#allocation2 + $0x60] sm:$0xff] }
  0x2d   : > { %635 = vmatpush.msra.mxu1 %v582_v9  ;;  %656 = vmatpush.msra.mxu2 %v589_v21  ;;  %v577_v32 = vld [vmem:[#allocation2 + $0xd0] sm:$0xff]  ;;  %v558_v33 = vld [vmem:[#allocation2 + $0x38] sm:$0xff]  ;;  %v560_v34 = vld [vmem:[#allocation2 + $0x48] sm:$0xff]  ;;  %v677_v8 = vshrl.u32 %v676_v7, 7  ;;  %v680_v9 = vand.u32 127, %v676_v7 }
  0x2e   : > { %612 = vmatpush.msra.mxu0 %v581_v12  ;;  %v574_v35 = vld [vmem:[#allocation2 + $0xb8] sm:$0xff]  ;;  %v555_v36 = vld [vmem:[#allocation2 + $0x20] sm:$0xff]  ;;  %v557_v37 = vld [vmem:[#allocation2 + $0x30] sm:$0xff] }
  0x2f   : > { %636 = vmatpush.msra.mxu1 %v579_v11  ;;  %657 = vmatpush.msra.mxu2 %v586_v24  ;;  %v571_v38 = vld [vmem:[#allocation2 + $0xa0] sm:$0xff]  ;;  %v552_v39 = vld [vmem:[#allocation2 + $0x8] sm:$0xff]  ;;  %v554_v40 = vld [vmem:[#allocation2 + $0x18] sm:$0xff]  ;;  %v681_v12 = vsub.s32 %v677_v8, %v680_v9 }
  0x30   : > { %613 = vmatpush.msra.mxu0 %v578_v16  ;;  %v2068_v41 = vld [vmem:[%s540_s14] sm:$0xff]  ;;  %v568_v42 = vld [vmem:[#allocation2 + $0x88] sm:$0xff]  ;;  %v565_v44 = vld [vmem:[#allocation2 + $0x70] sm:$0xff]  ;;  %v678_v16 = vadd.s32 8, %v677_v8 }
  0x31   : > { %637 = vmatpush.msra.mxu1 %v576_v15  ;;  %658 = vmatpush.msra.mxu2 %v583_v26  ;;  %v551_v43 = vld [vmem:[#allocation2] sm:$0xff]  ;;  %v562_v45 = vld [vmem:[#allocation2 + $0x58] sm:$0xff]  ;;  %v2072_v47 = vld [vmem:[%s540_s14 + $0x8] sm:$0xff]  ;;  %v684_v13 = vsub.s32 0, %v681_v12  ;;  %vm683_vm2 = vcmp.lt.s32.totalorder %v681_v12, 0 }
  0x32   : > { %614 = vmatpush.msra.mxu0 %v575_v19  ;;  %v559_v46 = vld [vmem:[#allocation2 + $0x40] sm:$0xff]  ;;  %v556_v48 = vld [vmem:[#allocation2 + $0x28] sm:$0xff]  ;;  %v553_v49 = vld [vmem:[#allocation2 + $0x10] sm:$0xff]  ;;  %v682_v19 = vsub.s32 %v678_v16, %v680_v9 }
  0x33   : > { %638 = vmatpush.msra.mxu1 %v573_v18  ;;  %659 = vmatpush.msra.mxu2 %v580_v29  ;;  %v599_v51 = vld [vmem:[%s2263_s3] sm:$0x7]  ;;  %v685_v18 = vsel %vm683_vm2, %v684_v13, %v681_v12 }
  0x34   : > { %615 = vmatpush.msra.mxu0 %v572_v23  ;;  %v602_v52 = vperm.slane %v599_v51, 1  ;;  %v601_v56 = vperm.slane %v599_v51, 0  ;;  %v603_v62 = vperm.slane %v599_v51, 2  ;;  %v691_v10 = vld [vmem:[%s543_s15] sm:$0x1]  ;;  %vm689_vm3 = vcmp.le.s32.totalorder %v685_v18, 2 }
  0x35   : > { %639 = vmatpush.msra.mxu1 %v570_v20  ;;  %660 = vmatpush.msra.mxu2 %v577_v32  ;;  %vm692_vm1 = vcmp.gt.f32.partialorder %v691_v10, 0.5  ;;  %v687_v20 = vsub.s32 0, %v682_v19  ;;  %vm686_vm5 = vcmp.lt.s32.totalorder %v682_v19, 0  ;;  %v1924_v23 = vmov -1e+09   ;;  %s2286_s15 = sld [smem:[#allocation16_spill]] }
  0x36   : > { %616 = vmatpush.msra.mxu0 %v569_v25  ;;  %v693_v15 = vsel %vm692_vm1, 1, %v1923_v14 }
  0x37   : > { %640 = vmatpush.msra.mxu1 %v567_v22  ;;  %661 = vmatpush.msra.mxu2 %v574_v35  ;;  %v694_v17 = vperm.slane %v693_v15, 0  ;;  %v688_v21 = vsel %vm686_vm5, %v687_v20, %v682_v19 }
  0x38   : > { %617 = vmatpush.msra.mxu0 %v566_v28  ;;  %vm690_vm8 = vcmp.le.s32.totalorder %v688_v21, 2 }
  0x39   : > { %641 = vmatpush.msra.mxu1 %v564_v27  ;;  %662 = vmatpush.msra.mxu2 %v571_v38  ;;  %vm695_vm4 = vcmp.eq.s32.totalorder %v694_v17, 1 }
  0x3a   : > { %618 = vmatpush.msra.mxu0 %v563_v31  ;;  %vm696_vm6 = vmand %vm689_vm3, %vm695_vm4 }
  0x3b   : > { %642 = vmatpush.msra.mxu1 %v561_v30  ;;  %663 = vmatpush.msra.mxu2 %v568_v42  ;;  %v2124_v24 = vsel %vm696_vm6, 0.0, %v1924_v23  ;;  %vm697_vm9 = vmand %vm690_vm8, %vm695_vm4  ;;  %s548_s19 = scalar_lea.vmem %s2286_s15, %s1636_s2 }
  0x3c   : > { %619 = vmatpush.msra.mxu0 %v560_v34  ;;  %v2128_v29 = vsel %vm697_vm9, 0.0, %v1924_v23 }
  0x3d   : > { %643 = vmatpush.msra.mxu1 %v558_v33  ;;  %664 = vmatpush.msra.mxu2 %v565_v44 }
  0x3e   : > { %620 = vmatpush.msra.mxu0 %v557_v37 }
  0x3f   : > { %644 = vmatpush.msra.mxu1 %v555_v36  ;;  %665 = vmatpush.msra.mxu2 %v562_v45 }
  0x40   : > { %621 = vmatpush.msra.mxu0 %v554_v40 }
  0x41   : > { %645 = vmatpush.msra.mxu1 %v552_v39  ;;  %666 = vmatpush.msra.mxu2 %v559_v46 }
  0x42   : > { %646 = vmatmul.f32.vlgmr.msra.gmra.mxu1 %v2068_v41  ;;  %622 = vmatpush.msra.mxu0 %v551_v43 }
  0x43   : > { %623 = vmatmul.f32.vlgmr.msra.gmra.mxu0 %v2068_v41  ;;  %667 = vmatpush.msra.mxu2 %v556_v48 }
  0x45   : > { %668 = vmatpush.msra.mxu2 %v553_v49 }
  0x46   : > { %669 = vmatmul.f32.vlgmr.msra.gmra.mxu2 %v2068_v41 }
  0x4a   : > { %649 = vmatmul.f32.gmra.mxu1 %v2072_v47 }
  0x4b   : > { %626 = vmatmul.f32.gmra.mxu0 %v2072_v47 }
  0x4e   : > { %672 = vmatmul.f32.gmra.mxu2 %v2072_v47 }
  0xbf   : > { %v647_v50 = vpop.f32.mrf.mxu1 }
  0xc0   : > { %v624_v55 = vpop.f32.mrf.mxu0  ;;  %v648_v57 = vadd.f32 %v647_v50, %v602_v52 }
  0xc1   : > { %v2089_v58 = vadd.f32 %v624_v55, %v601_v56 }
  0xc7   : > { %v650_v53 = vpop.f32.mrf.mxu1 }
  0xc8   : > { %v2081_v54 = vadd.f32 %v650_v53, %v602_v52  ;;  %v627_v59 = vpop.f32.mrf.mxu0 }
  0xc9   : > { %v2095_v60 = vadd.f32 %v627_v59, %v601_v56  ;;  %v670_v61 = vpop.f32.mrf.mxu2 }
  0xca   : > { %900 = vrot.lane.b32.xlu1 %v2081_v54, %s1920_s23  ;;  %798 = vrot.lane.b32.xlu2 %v2081_v54, %s1921_s24  ;;  %v2102_v0 = vadd.f32 %v670_v61, %v603_v62 }
  0xcb   : > { %1610 = vmatpush.xpose.msk.msra.mxu3 %vm700_vm0, %v2081_v54 }
  0xcf   : > { %1611 = vmatpush.xpose.msk.msra.mxu3 %vm700_vm0, %v648_v57 }
  0xd1   : > { %v673_v63 = vpop.f32.mrf.mxu2 }
  0xd2   : > { %1612 = vmatmul.msk.f32.vlgmr.msra.gmra.mxu3 %vm700_vm0, %v2089_v58  ;;  %796 = vrot.lane.b32.xlu2 %v648_v57, %s1921_s24  ;;  %v2104_v1 = vadd.f32 %v673_v63, %v603_v62 }
  0xd4   : > { %783 = vmatpush.msrb.mxu3 %v2104_v1 }
  0xd6   : > { %784 = vmatpush.msrb.mxu3 %v2102_v0 }
  0xda   : > { %1613 = vmatmul.msk.f32.gmra.mxu3 %vm700_vm0, %v2095_v60  ;;  %898 = vrot.lane.b32.xlu2 %v648_v57, %s1920_s23 }
  0xe2   : > { %794 = vrot.lane.b32.xlu2 %v2095_v60, %s1921_s24 }
  0xea   : > { %894 = vrot.lane.b32.xlu2 %v2089_v58, %s1920_s23 }
  0xf2   : > { %998 = vrot.lane.b32.xlu2 %v648_v57, %s1922_s26 }
  0xfa   : > { %996 = vrot.lane.b32.xlu2 %v2095_v60, %s1922_s26 }
 0x124   : > { %v799_v2 = vpop.permute.xlu2 %798 }
 0x125   : > { %1616 = vmatpush.xpose.msk.msra.mxu3 %vm700_vm0, %v799_v2 }
 0x12c   : > { %v797_v3 = vpop.permute.xlu2 %796 }
 0x12d   : > { %1617 = vmatpush.xpose.msk.msra.mxu3 %vm700_vm0, %v797_v3 }
 0x134   : > { %v899_v4 = vpop.permute.xlu2 %898 }
 0x13c   : > { %v901_v5 = vpop.permute.xlu1 %900  ;;  %v2115_v6 = vpop.permute.xlu2 %794 }
 0x13d   : > { %1622 = vmatpush.xpose.msk.msrb.mxu2 %vm700_vm0, %v901_v5 }
 0x141   : > { %1623 = vmatpush.xpose.msk.msrb.mxu2 %vm700_vm0, %v899_v4 }
 0x144   : > { %v895_v11 = vpop.permute.xlu2 %894 }
 0x145   : > { %1624 = vmatmul.msk.f32.vlgmr.msrb.gmra.mxu2 %vm700_vm0, %v895_v11 }
 0x14c   : > { %v999_v56 = vpop.permute.xlu2 %998 }
 0x154   : > { %v997_v62 = vpop.permute.xlu2 %996 }
 0x155   : > { %v730_v22 = vpop.f32.mrf.mxu3 }
 0x156   : > { %v736_v25 = vmul.f32 0.17677669, %v730_v22 }
 0x158   : > { %v738_v26 = vadd.f32 %v736_v25, %v2124_v24 }
 0x15a   : > { %v741_v27 = vsel %vm740_vm7, %v738_v26, -inf }
 0x15b   : > { %742 = vmax.xlane.f32.xlu0 %v741_v27 }
 0x15d   : > { %v733_v28 = vpop.f32.mrf.mxu3 }
 0x15e   : > { %v737_v30 = vmul.f32 0.17677669, %v733_v28 }
 0x160   : > { %v739_v31 = vadd.f32 %v737_v30, %v2128_v29 }
 0x162   : > { %v744_v32 = vsel %vm740_vm7, %v739_v31, -inf }
 0x163   : > { %745 = vmax.xlane.f32.xlu0 %v744_v32 }
 0x177   : > { %792 = vrot.lane.b32.xlu0 %v2089_v58, %s1921_s24 }
 0x17f   : > { %1000 = vrot.lane.b32.xlu0 %v2081_v54, %s1922_s26 }
 0x187   : > { %896 = vrot.lane.b32.xlu0 %v2095_v60, %s1920_s23 }
 0x1c8   : > { %v927_v33 = vpop.f32.mrf.mxu2 }
 0x1c9   : > { %v933_v34 = vmul.f32 0.17677669, %v927_v33 }
 0x1cb   : > { %v935_v35 = vadd.f32 %v933_v34, %v2124_v24 }
 0x1cd   : > { %v937_v36 = vsel %vm740_vm7, %v935_v35, -inf }
 0x1ce   : > { %v743_v37 = vpop.xlane.xlu0 %742  ;;  %938 = vmax.xlane.f32.xlu2 %v937_v36 }
 0x1cf   : > { %v747_v38 = vsub.f32 %v738_v26, %v743_v37 }
 0x1d1   : > { %v749_v39 = vmul.f32 1.442695, %v747_v38 }
 0x1d3   : > { %1720 = vpow2.f32 %v749_v39 }
 0x1d6   : > { %v746_v40 = vpop.xlane.xlu0 %745 }
 0x1d7   : > { %v748_v42 = vsub.f32 %v739_v31, %v746_v40 }
 0x1d9   : > { %v1721_v43 = vpop.eup %1720  ;;  %v751_v44 = vmul.f32 1.442695, %v748_v42 }
 0x1da   : > { %v753_v45 = vsel %vm740_vm7, %v1721_v43, 0.0 }
 0x1db   : > { %1722 = vpow2.f32 %v751_v44  ;;  %754 = vadd.xlane.f32.xlu1 %v753_v45 }
 0x1e1   : > { %v1723_v46 = vpop.eup %1722 }
 0x1e2   : > { %v756_v48 = vsel %vm740_vm7, %v1723_v46, 0.0 }
 0x1e3   : > { %757 = vadd.xlane.f32.xlu1 %v756_v48 }
 0x1e9   : > { %v793_v49 = vpop.permute.xlu0 %792 }
 0x1f1   : > { %v1001_v50 = vpop.permute.xlu0 %1000 }
 0x1f9   : > { %v897_v51 = vpop.permute.xlu0 %896 }
 0x1fa   : > { %1625 = vmatmul.msk.f32.gmra.mxu2 %vm700_vm0, %v897_v51 }
 0x1fc   : > { %994 = vrot.lane.b32.xlu1 %v2089_v58, %s1922_s26 }
 0x241   : > { %v939_v10 = vpop.xlane.xlu2 %938 }
 0x242   : > { %v943_v13 = vsub.f32 %v935_v35, %v939_v10 }
 0x244   : > { %v945_v15 = vmul.f32 1.442695, %v943_v13 }
 0x24e   : > { %v755_v52 = vpop.xlane.xlu1 %754 }
 0x24f   : > { %1724 = vrcp.f32 %v755_v52 }
 0x255   : > { %v1725_v53 = vpop.eup %1724 }
 0x256   : > { %v758_v54 = vpop.xlane.xlu1 %757  ;;  %v761_v55 = vmul.f32 %v1725_v53, %v1721_v43 }
 0x257   : > { %1726 = vrcp.f32 %v758_v54 }
 0x258   : > { %1614 = vmatmul.msk.f32.vlgmr.msrb.gmra.mxu3 %vm740_vm7, %v761_v55  ;;  %1728 = vpow2.f32 %v945_v15 }
 0x259   : > { %1628 = vmatpush.xpose.msk.msrb.mxu3 %vm700_vm0, %v1001_v50 }
 0x25d   : > { %v1727_v57 = vpop.eup %1726  ;;  %1629 = vmatpush.xpose.msk.msrb.mxu3 %vm700_vm0, %v999_v56 }
 0x25e   : > { %v762_v59 = vmul.f32 %v1727_v57, %v1723_v46  ;;  %v2166_v22 = vpop.eup %1728 }
 0x25f   : > { %v949_v25 = vsel %vm740_vm7, %v2166_v22, 0.0 }
 0x260   : > { %1615 = vmatmul.msk.f32.gmra.mxu3 %vm740_vm7, %v762_v59 }
 0x268   : > { %1618 = vmatmul.msk.f32.vlgmr.msra.gmra.mxu3 %vm700_vm0, %v793_v49 }
 0x26e   : > { %v995_v58 = vpop.permute.xlu1 %994 }
 0x270   : > { %1619 = vmatmul.msk.f32.gmra.mxu3 %vm700_vm0, %v2115_v6 }
 0x278   : > { %1630 = vmatmul.msk.f32.vlgmr.msrb.gmra.mxu3 %vm700_vm0, %v995_v58 }
 0x27d   : > { %v930_v60 = vpop.f32.mrf.mxu2 }
 0x27e   : > { %v934_v61 = vmul.f32 0.17677669, %v930_v60 }
 0x280   : > { %1631 = vmatmul.msk.f32.gmra.mxu3 %vm700_vm0, %v997_v62  ;;  %v936_v63 = vadd.f32 %v934_v61, %v2128_v29 }
 0x282   : > { %v940_v2 = vsel %vm740_vm7, %v936_v63, -inf }
 0x283   : > { %941 = vmax.xlane.f32.xlu0 %v940_v2 }
 0x2db   : > { %v2156_v3 = vpop.f32.mrf.mxu3 }
 0x2e3   : > { %v2158_v4 = vpop.f32.mrf.mxu3 }
 0x2eb   : > { %v825_v5 = vpop.f32.mrf.mxu3 }
 0x2ec   : > { %v831_v7 = vmul.f32 0.17677669, %v825_v5 }
 0x2ee   : > { %v833_v6 = vadd.f32 %v831_v7, %v2124_v24 }
 0x2f0   : > { %v835_v8 = vsel %vm740_vm7, %v833_v6, -inf }
 0x2f1   : > { %836 = vmax.xlane.f32.xlu1 %v835_v8 }
 0x2f3   : > { %v828_v9 = vpop.f32.mrf.mxu3 }
 0x2f4   : > { %v832_v11 = vmul.f32 0.17677669, %v828_v9 }
 0x2f6   : > { %v834_v12 = vadd.f32 %v832_v11, %v2128_v29  ;;  %v942_v27 = vpop.xlane.xlu0 %941 }
 0x2f7   : > { %v944_v28 = vsub.f32 %v936_v63, %v942_v27  ;;  %v1138_v27 = vld [vmem:[#allocation4 + $0x60] sm:$0xff] }
 0x2f8   : > { %v838_v14 = vsel %vm740_vm7, %v834_v12, -inf }
 0x2f9   : > { %839 = vmax.xlane.f32.xlu0 %v838_v14  ;;  %v947_v30 = vmul.f32 1.442695, %v944_v28  ;;  %v1137_v28 = vld [vmem:[#allocation4 + $0x58] sm:$0xff] }
 0x2fb   : > { %v1027_v16 = vpop.f32.mrf.mxu3  ;;  %1730 = vpow2.f32 %v947_v30  ;;  %v1136_v30 = vld [vmem:[#allocation4 + $0x50] sm:$0xff] }
 0x2fc   : > { %v1033_v17 = vmul.f32 0.17677669, %v1027_v16 }
 0x2fe   : > { %v1035_v18 = vadd.f32 %v1033_v17, %v2124_v24  ;;  %v1699_v24 = vpack.i.bf16 %v2102_v0, %v2104_v1 }
 0x300   : > { %v1037_v19 = vsel %vm740_vm7, %v1035_v18, -inf }
 0x301   : > { %1038 = vmax.xlane.f32.xlu1 %v1037_v19  ;;  %v1731_v31 = vpop.eup %1730 }
 0x302   : > { %v952_v32 = vsel %vm740_vm7, %v1731_v31, 0.0 }
 0x303   : > { %v1030_v20 = vpop.f32.mrf.mxu3 }
 0x304   : > { %v1034_v21 = vmul.f32 0.17677669, %v1030_v20 }
 0x306   : > { %v1036_v23 = vadd.f32 %v1034_v21, %v2128_v29 }
 0x308   : > { %v1040_v26 = vsel %vm740_vm7, %v1036_v23, -inf }
 0x309   : > { %950 = vadd.xlane.f32.xlu1 %v949_v25  ;;  %1041 = vmax.xlane.f32.xlu2 %v1040_v26  ;;  %v1141_v25 = vld [vmem:[#allocation4 + $0x78] sm:$0xff]  ;;  %v1140_v26 = vld [vmem:[#allocation4 + $0x70] sm:$0xff] }
 0x30a   : > { %1146 = vmatpush.msrb.mxu1 %v1141_v25  ;;  %v1249_v25 = vld [vmem:[#allocation6 + $0x98] sm:$0xff] }
 0x30c   : > { %1147 = vmatpush.msrb.mxu1 %v1140_v26  ;;  %v1246_v26 = vld [vmem:[#allocation6 + $0x80] sm:$0xff] }
 0x30d   : > { %1700 = vrot.lane.b32.xlu0 %v1699_v24, %s1921_s24 }
 0x337   : > { %953 = vadd.xlane.f32.xlu0 %v952_v32  ;;  %v1135_v32 = vld [vmem:[#allocation4 + $0x48] sm:$0xff] }
 0x364   : > { %v837_v29 = vpop.xlane.xlu1 %836 }
 0x365   : > { %v841_v33 = vsub.f32 %v833_v6, %v837_v29  ;;  %v1134_v29 = vld [vmem:[#allocation4 + $0x40] sm:$0xff] }
 0x367   : > { %v843_v34 = vmul.f32 1.442695, %v841_v33  ;;  %v1133_v33 = vld [vmem:[#allocation4 + $0x38] sm:$0xff] }
 0x369   : > { %1732 = vpow2.f32 %v843_v34  ;;  %v1132_v34 = vld [vmem:[#allocation4 + $0x30] sm:$0xff] }
 0x36c   : > { %v840_v35 = vpop.xlane.xlu0 %839 }
 0x36d   : > { %v842_v36 = vsub.f32 %v834_v12, %v840_v35  ;;  %v1131_v35 = vld [vmem:[#allocation4 + $0x28] sm:$0xff] }
 0x36f   : > { %v1733_v37 = vpop.eup %1732  ;;  %v845_v38 = vmul.f32 1.442695, %v842_v36  ;;  %v1130_v36 = vld [vmem:[#allocation4 + $0x20] sm:$0xff] }
 0x370   : > { %v847_v0 = vsel %vm740_vm7, %v1733_v37, 0.0 }
 0x371   : > { %1734 = vpow2.f32 %v845_v38  ;;  %848 = vadd.xlane.f32.xlu1 %v847_v0  ;;  %v1128_v38 = vld [vmem:[#allocation4 + $0x10] sm:$0xff]  ;;  %v1127_v0 = vld [vmem:[#allocation4 + $0x8] sm:$0xff] }
 0x374   : > { %v1039_v1 = vpop.xlane.xlu1 %1038 }
 0x375   : > { %v1043_v39 = vsub.f32 %v1035_v18, %v1039_v1  ;;  %v1126_v1 = vld [vmem:[#allocation4] sm:$0xff] }
 0x377   : > { %v1735_v40 = vpop.eup %1734  ;;  %v1045_v42 = vmul.f32 1.442695, %v1043_v39 }
 0x378   : > { %v850_v43 = vsel %vm740_vm7, %v1735_v40, 0.0 }
 0x379   : > { %1736 = vpow2.f32 %v1045_v42  ;;  %851 = vadd.xlane.f32.xlu2 %v850_v43 }
 0x37c   : > { %v1042_v50 = vpop.xlane.xlu2 %1041  ;;  %v951_v55 = vpop.xlane.xlu1 %950 }
 0x37d   : > { %v1044_v51 = vsub.f32 %v1036_v23, %v1042_v50 }
 0x37f   : > { %v1737_v44 = vpop.eup %1736  ;;  %v1701_v45 = vpop.permute.xlu0 %1700  ;;  %v1047_v52 = vmul.f32 1.442695, %v1044_v51 }
 0x380   : > { %v1049_v46 = vsel %vm740_vm7, %v1737_v44, 0.0  ;;  %v1702_v48 = vunpack.i.l.bf16 %v1701_v45  ;;  %v1703_v49 = vunpack.i.h.bf16 %v1701_v45 }
 0x381   : > { %1050 = vadd.xlane.f32.xlu1 %v1049_v46  ;;  %1738 = vpow2.f32 %v1047_v52 }
 0x382   : > { %885 = vmatpush.msrb.mxu0 %v1702_v48 }
 0x384   : > { %886 = vmatpush.msrb.mxu0 %v1703_v49 }
 0x387   : > { %v1739_v53 = vpop.eup %1738 }
 0x388   : > { %v1052_v54 = vsel %vm740_vm7, %v1739_v53, 0.0 }
 0x391   : > { %1705 = vrot.lane.b32.xlu2 %v1699_v24, %s1920_s23 }
 0x39a   : > { %1710 = vrot.lane.b32.xlu1 %v1699_v24, %s1922_s26  ;;  %v1139_v24 = vld [vmem:[#allocation4 + $0x68] sm:$0xff] }
 0x39b   : > { %1148 = vmatpush.msrb.mxu1 %v1139_v24  ;;  %v1247_v24 = vld [vmem:[#allocation6 + $0x88] sm:$0xff] }
 0x39d   : > { %1149 = vmatpush.msrb.mxu1 %v1138_v27  ;;  %v1244_v27 = vld [vmem:[#allocation6 + $0x70] sm:$0xff] }
 0x39f   : > { %1150 = vmatpush.msrb.mxu1 %v1137_v28  ;;  %v1245_v28 = vld [vmem:[#allocation6 + $0x78] sm:$0xff] }
 0x3a1   : > { %1151 = vmatpush.msrb.mxu1 %v1136_v30  ;;  %v1242_v30 = vld [vmem:[#allocation6 + $0x60] sm:$0xff] }
 0x3a3   : > { %1152 = vmatpush.msrb.mxu1 %v1135_v32  ;;  %v1240_v32 = vld [vmem:[#allocation6 + $0x50] sm:$0xff] }
 0x3a5   : > { %1153 = vmatpush.msrb.mxu1 %v1134_v29  ;;  %v1241_v29 = vld [vmem:[#allocation6 + $0x58] sm:$0xff] }
 0x3a7   : > { %1154 = vmatpush.msrb.mxu1 %v1133_v33  ;;  %v1238_v33 = vld [vmem:[#allocation6 + $0x40] sm:$0xff] }
 0x3a9   : > { %1155 = vmatpush.msrb.mxu1 %v1132_v34  ;;  %v1239_v34 = vld [vmem:[#allocation6 + $0x48] sm:$0xff] }
 0x3aa   : > { %v954_v61 = vpop.xlane.xlu0 %953 }
 0x3ab   : > { %1156 = vmatpush.msrb.mxu1 %v1131_v35  ;;  %v1236_v35 = vld [vmem:[#allocation6 + $0x30] sm:$0xff] }
 0x3ad   : > { %1157 = vmatpush.msrb.mxu1 %v1130_v36  ;;  %v1237_v36 = vld [vmem:[#allocation6 + $0x38] sm:$0xff] }
 0x3ba   : > { %1053 = vadd.xlane.f32.xlu2 %v1052_v54 }
 0x3e4   : > { %v849_v56 = vpop.xlane.xlu1 %848 }
 0x3e5   : > { %1740 = vrcp.f32 %v849_v56 }
 0x3eb   : > { %v1741_v57 = vpop.eup %1740 }
 0x3ec   : > { %v852_v59 = vpop.xlane.xlu2 %851  ;;  %v855_v58 = vmul.f32 %v1741_v57, %v1733_v37  ;;  %v1129_v37 = vld [vmem:[#allocation4 + $0x18] sm:$0xff] }
 0x3ed   : > { %1742 = vrcp.f32 %v852_v59  ;;  %1158 = vmatpush.msrb.mxu1 %v1129_v37  ;;  %v1234_v37 = vld [vmem:[#allocation6 + $0x20] sm:$0xff] }
 0x3ee   : > { %1620 = vmatmul.msk.f32.vlgmr.msrb.gmra.mxu0 %vm740_vm7, %v855_v58  ;;  %1744 = vrcp.f32 %v951_v55  ;;  %v1925_v58 = vmov 128.0  }
 0x3ef   : > { %1746 = vrcp.f32 %v954_v61  ;;  %1159 = vmatpush.msrb.mxu1 %v1128_v38  ;;  %v1235_v38 = vld [vmem:[#allocation6 + $0x28] sm:$0xff] }
 0x3f1   : > { %1160 = vmatpush.msrb.mxu1 %v1127_v0  ;;  %v1232_v0 = vld [vmem:[#allocation6 + $0x10] sm:$0xff] }
 0x3f3   : > { %v1743_v60 = vpop.eup %1742  ;;  %1161 = vmatpush.msrb.mxu1 %v1126_v1  ;;  %v1233_v1 = vld [vmem:[#allocation6 + $0x18] sm:$0xff] }
 0x3f4   : > { %v1706_v62 = vpop.permute.xlu2 %1705  ;;  %v856_v63 = vmul.f32 %v1743_v60, %v1735_v40  ;;  %v1745_v2 = vpop.eup %1744 }
 0x3f5   : > { %v1707_v5 = vunpack.i.l.bf16 %v1706_v62  ;;  %v1708_v7 = vunpack.i.h.bf16 %v1706_v62  ;;  %v957_v6 = vmul.f32 %v1745_v2, %v2166_v22  ;;  %v1747_v8 = vpop.eup %1746  ;;  %v1051_v10 = vpop.xlane.xlu1 %1050  ;;  %v1260_v62 = vld [vmem:[#allocation6 + $0xf0] sm:$0xff]  ;;  %v1258_v2 = vld [vmem:[#allocation6 + $0xe0] sm:$0xff] }
 0x3f6   : > { %1621 = vmatmul.msk.f32.gmra.mxu0 %vm740_vm7, %v856_v63  ;;  %v958_v9 = vmul.f32 %v1747_v8, %v1731_v31  ;;  %1748 = vrcp.f32 %v1051_v10  ;;  %v1261_v63 = vld [vmem:[#allocation6 + $0xf8] sm:$0xff] }
 0x3f7   : > { %985 = vmatpush.msra.mxu2 %v1707_v5  ;;  %1291 = vmatpush.msra.mxu3 %v1261_v63  ;;  %v1259_v5 = vld [vmem:[#allocation6 + $0xe8] sm:$0xff] }
 0x3f9   : > { %986 = vmatpush.msra.mxu2 %v1708_v7  ;;  %1292 = vmatpush.msra.mxu3 %v1259_v5 }
 0x3fa   : > { %1626 = vmatmul.msk.f32.vlgmr.msra.gmra.mxu2 %vm740_vm7, %v957_v6 }
 0x3fb   : > { %1268 = vmatpush.msrb.mxu2 %v1260_v62 }
 0x3fc   : > { %v1749_v12 = vpop.eup %1748 }
 0x3fd   : > { %v1057_v15 = vmul.f32 %v1749_v12, %v1737_v44  ;;  %1269 = vmatpush.msrb.mxu2 %v1258_v2  ;;  %v1716_v2 = vld [vmem:[%s2267_s7] ss:$0 sm:$0xff] }
 0x402   : > { %1627 = vmatmul.msk.f32.gmra.mxu2 %vm740_vm7, %v958_v9 }
 0x40c   : > { %v1711_v11 = vpop.permute.xlu1 %1710 }
 0x40d   : > { %v1712_v13 = vunpack.i.l.bf16 %v1711_v11  ;;  %v1713_v14 = vunpack.i.h.bf16 %v1711_v11 }
 0x40f   : > { %1085 = vmatpush.msra.mxu0 %v1712_v13 }
 0x411   : > { %1086 = vmatpush.msra.mxu0 %v1713_v14 }
 0x412   : > { %1632 = vmatmul.msk.f32.vlgmr.msra.gmra.mxu0 %vm740_vm7, %v1057_v15  ;;  %v1256_v15 = vld [vmem:[#allocation6 + $0xd0] sm:$0xff] }
 0x413   : > { %1270 = vmatpush.msrb.mxu2 %v1256_v15 }
 0x42d   : > { %v1054_v16 = vpop.xlane.xlu2 %1053 }
 0x42e   : > { %1750 = vrcp.f32 %v1054_v16  ;;  %v1257_v16 = vld [vmem:[#allocation6 + $0xd8] sm:$0xff] }
 0x42f   : > { %1752 = vrcp.f32 %v1925_v58  ;;  %1293 = vmatpush.msra.mxu3 %v1257_v16 }
 0x434   : > { %v1751_v17 = vpop.eup %1750 }
 0x435   : > { %v1058_v18 = vmul.f32 %v1751_v17, %v1739_v53  ;;  %v1714_v53 = vld [vmem:[%s2265_s5] ss:$0 sm:$0xff] }
 0x436   : > { %v1254_v17 = vld [vmem:[#allocation6 + $0xc0] sm:$0xff] }
 0x437   : > { %1633 = vmatmul.msk.f32.gmra.mxu0 %vm740_vm7, %v1058_v18  ;;  %v1255_v18 = vld [vmem:[#allocation6 + $0xc8] sm:$0xff]  ;;  %1271 = vmatpush.msrb.mxu2 %v1254_v17  ;;  %v1361_v17 = vld [vmem:[#allocation7 + $0x58] sm:$0xff] }
 0x438   : > { %1294 = vmatpush.msra.mxu3 %v1255_v18  ;;  %v1377_v18 = vld [vmem:[#allocation7 + $0xd8] sm:$0xff] }
 0x46b   : > { %v888_v19 = vpop.f32.mrf.mxu0 }
 0x473   : > { %v891_v21 = vpop.f32.mrf.mxu0 }
 0x47d   : > { %v988_v20 = vpop.f32.mrf.mxu2 }
 0x47e   : > { %1104 = vrot.lane.b32.xlu1 %v988_v20, %s1920_s23  ;;  %v1253_v20 = vld [vmem:[#allocation6 + $0xb8] sm:$0xff] }
 0x47f   : > { %1295 = vmatpush.msra.mxu3 %v1253_v20  ;;  %v1376_v20 = vld [vmem:[#allocation7 + $0xd0] sm:$0xff] }
 0x485   : > { %v991_v23 = vpop.f32.mrf.mxu2 }
 0x486   : > { %1096 = vrot.lane.b32.xlu1 %v888_v19, %s1922_s26  ;;  %v1252_v19 = vld [vmem:[#allocation6 + $0xb0] sm:$0xff] }
 0x487   : > { %1272 = vmatpush.msrb.mxu2 %v1252_v19  ;;  %v1360_v19 = vld [vmem:[#allocation7 + $0x50] sm:$0xff] }
 0x48e   : > { %1098 = vrot.lane.b32.xlu1 %v891_v21, %s1922_s26  ;;  %v1250_v21 = vld [vmem:[#allocation6 + $0xa0] sm:$0xff]  ;;  %s2285_s26 = sld [smem:[#allocation15_spill]] }
 0x48f   : > { %v1088_v22 = vpop.f32.mrf.mxu0  ;;  %1273 = vmatpush.msrb.mxu2 %v1250_v21  ;;  %v1359_v21 = vld [vmem:[#allocation7 + $0x48] sm:$0xff] }
 0x490   : > { %1112 = vrot.lane.b32.xlu0 %v1088_v22, %s1921_s24  ;;  %v1251_v22 = vld [vmem:[#allocation6 + $0xa8] sm:$0xff] }
 0x491   : > { %1296 = vmatpush.msra.mxu3 %v1251_v22  ;;  %v1375_v22 = vld [vmem:[#allocation7 + $0xc8] sm:$0xff] }
 0x493   : > { %1297 = vmatpush.msra.mxu3 %v1249_v25  ;;  %v1357_v25 = vld [vmem:[#allocation7 + $0x38] sm:$0xff] }
 0x495   : > { %1298 = vmatpush.msra.mxu3 %v1247_v24  ;;  %v1356_v24 = vld [vmem:[#allocation7 + $0x30] sm:$0xff] }
 0x496   : > { %1106 = vrot.lane.b32.xlu1 %v991_v23, %s1920_s23  ;;  %v1248_v23 = vld [vmem:[#allocation6 + $0x90] sm:$0xff] }
 0x497   : > { %1274 = vmatpush.msrb.mxu2 %v1248_v23  ;;  %1299 = vmatpush.msra.mxu3 %v1245_v28  ;;  %v1374_v23 = vld [vmem:[#allocation7 + $0xc0] sm:$0xff]  ;;  %v1355_v28 = vld [vmem:[#allocation7 + $0x28] sm:$0xff] }
 0x499   : > { %1275 = vmatpush.msrb.mxu2 %v1246_v26  ;;  %v1373_v26 = vld [vmem:[#allocation7 + $0xb8] sm:$0xff] }
 0x49b   : > { %1276 = vmatpush.msrb.mxu2 %v1244_v27  ;;  %v1372_v27 = vld [vmem:[#allocation7 + $0xb0] sm:$0xff] }
 0x49d   : > { %1277 = vmatpush.msrb.mxu2 %v1242_v30  ;;  %v1371_v30 = vld [vmem:[#allocation7 + $0xa8] sm:$0xff] }
 0x49f   : > { %1278 = vmatpush.msrb.mxu2 %v1240_v32  ;;  %v1370_v32 = vld [vmem:[#allocation7 + $0xa0] sm:$0xff] }
 0x4a1   : > { %1279 = vmatpush.msrb.mxu2 %v1238_v33  ;;  %v1369_v33 = vld [vmem:[#allocation7 + $0x98] sm:$0xff] }
 0x4a3   : > { %1280 = vmatpush.msrb.mxu2 %v1236_v35  ;;  %v1368_v35 = vld [vmem:[#allocation7 + $0x90] sm:$0xff] }
 0x4a5   : > { %1281 = vmatpush.msrb.mxu2 %v1234_v37  ;;  %v1367_v37 = vld [vmem:[#allocation7 + $0x88] sm:$0xff] }
 0x4a7   : > { %1282 = vmatpush.msrb.mxu2 %v1232_v0  ;;  %v1366_v0 = vld [vmem:[#allocation7 + $0x80] sm:$0xff] }
 0x4b4   : > { %v1091_v31 = vpop.f32.mrf.mxu0 }
 0x4b5   : > { %1114 = vrot.lane.b32.xlu2 %v1091_v31, %s1921_s24  ;;  %v1243_v31 = vld [vmem:[#allocation6 + $0x68] sm:$0xff] }
 0x4b6   : > { %1300 = vmatpush.msra.mxu3 %v1243_v31  ;;  %v1354_v31 = vld [vmem:[#allocation7 + $0x20] sm:$0xff] }
 0x4b8   : > { %1301 = vmatpush.msra.mxu3 %v1241_v29  ;;  %v1353_v29 = vld [vmem:[#allocation7 + $0x18] sm:$0xff] }
 0x4ba   : > { %1302 = vmatpush.msra.mxu3 %v1239_v34  ;;  %v1352_v34 = vld [vmem:[#allocation7 + $0x10] sm:$0xff] }
 0x4bc   : > { %1303 = vmatpush.msra.mxu3 %v1237_v36  ;;  %v1351_v36 = vld [vmem:[#allocation7 + $0x8] sm:$0xff] }
 0x4be   : > { %1304 = vmatpush.msra.mxu3 %v1235_v38  ;;  %v1350_v38 = vld [vmem:[#allocation7] sm:$0xff] }
 0x4c0   : > { %1305 = vmatpush.msra.mxu3 %v1233_v1  ;;  %v1262_v1 = vld [vmem:[%s2269_s9] sm:$0x3] }
 0x4f0   : > { %v1105_v39 = vpop.permute.xlu1 %1104 }
 0x4f8   : > { %v1097_v40 = vpop.permute.xlu1 %1096 }
 0x4f9   : > { %v1118_v42 = vsel %vm700_vm0, %v2156_v3, %v1097_v40  ;;  %v1231_v40 = vld [vmem:[#allocation6 + $0x8] sm:$0xff] }
 0x4fa   : > { %v1121_v45 = vsel %vm1120_vm10, %v1118_v42, %v1105_v39  ;;  %v1230_v39 = vld [vmem:[#allocation6] sm:$0xff]  ;;  %1306 = vmatpush.msra.mxu3 %v1231_v40  ;;  %v1265_v40 = vperm.slane %v1262_v1, 1 }
 0x4fb   : > { %1283 = vmatpush.msrb.mxu2 %v1230_v39  ;;  %v1264_v39 = vperm.slane %v1262_v1, 0 }
 0x500   : > { %v1099_v43 = vpop.permute.xlu1 %1098 }
 0x501   : > { %v1119_v49 = vsel %vm700_vm0, %v2158_v4, %v1099_v43  ;;  %v1753_v4 = vpop.eup %1752 }
 0x502   : > { %v1113_v44 = vpop.permute.xlu0 %1112  ;;  %v1178_v60 = vmul.f32 128.0, %v1753_v4  ;;  %vm1182_vm12 = vweird.f32 %v1753_v4 }
 0x503   : > { %v1124_v46 = vsel %vm1123_vm11, %v1121_v45, %v1113_v44  ;;  %v1365_v45 = vld [vmem:[#allocation7 + $0x78] sm:$0xff] }
 0x504   : > { %1162 = vmatmul.f32.vlgmr.msrb.gmra.mxu1 %v1124_v46  ;;  %v1179_v61 = vsub.f32 1.0, %v1178_v60  ;;  %v1381_v46 = vld [vmem:[#allocation7 + $0xf8] sm:$0xff]  ;;  %1386 = vmatpush.msrb.mxu0 %v1365_v45 }
 0x505   : > { %1409 = vmatpush.msra.mxu1 %v1381_v46 }
 0x506   : > { %v1180_v7 = vmul.f32 %v1753_v4, %v1179_v61  ;;  %v1715_v61 = vld [vmem:[%s2266_s6] ss:$0 sm:$0xff] }
 0x508   : > { %v1107_v48 = vpop.permute.xlu1 %1106 }
 0x509   : > { %v1122_v50 = vsel %vm1120_vm10, %v1119_v49, %v1107_v48  ;;  %v1364_v48 = vld [vmem:[#allocation7 + $0x70] sm:$0xff] }
 0x50a   : > { %1387 = vmatpush.msrb.mxu0 %v1364_v48 }
 0x50f   : > { %v1115_v51 = vpop.permute.xlu2 %1114 }
 0x510   : > { %v1125_v52 = vsel %vm1123_vm11, %v1122_v50, %v1115_v51  ;;  %v1380_v50 = vld [vmem:[#allocation7 + $0xf0] sm:$0xff] }
 0x511   : > { %1165 = vmatmul.f32.gmra.mxu1 %v1125_v52  ;;  %v1363_v52 = vld [vmem:[#allocation7 + $0x68] sm:$0xff] }
 0x512   : > { %1410 = vmatpush.msra.mxu1 %v1380_v50  ;;  %1388 = vmatpush.msrb.mxu0 %v1363_v52 }
 0x581   : > { %v1163_v3 = vpop.f32.mrf.mxu1 }
 0x582   : > { %v1164_v54 = vadd.f32 %v1714_v53, %v1163_v3 }
 0x584   : > { %v1169_v55 = vadd.f32 %v1164_v54, %v2068_v41  ;;  %v1181_v41 = vadd.f32 %v1753_v4, %v1180_v7 }
 0x586   : > { %1173 = vadd.xlane.f32.xlu1 %v1169_v55  ;;  %v2204_v6 = vsel %vm1182_vm12, %v1753_v4, %v1181_v41 }
 0x58e   : > { %v1166_v56 = vpop.f32.mrf.mxu1 }
 0x58f   : > { %v1167_v57 = vadd.f32 %v1714_v53, %v1166_v56  ;;  %v1379_v53 = vld [vmem:[#allocation7 + $0xe8] sm:$0xff]  ;;  %v1362_v56 = vld [vmem:[#allocation7 + $0x60] sm:$0xff] }
 0x590   : > { %1411 = vmatpush.msra.mxu1 %v1379_v53  ;;  %1389 = vmatpush.msrb.mxu0 %v1362_v56 }
 0x591   : > { %v1170_v59 = vadd.f32 %v1167_v57, %v2072_v47  ;;  %v1378_v57 = vld [vmem:[#allocation7 + $0xe0] sm:$0xff] }
 0x592   : > { %1412 = vmatpush.msra.mxu1 %v1378_v57  ;;  %1390 = vmatpush.msrb.mxu0 %v1361_v17 }
 0x593   : > { %1175 = vadd.xlane.f32.xlu0 %v1170_v59 }
 0x594   : > { %1413 = vmatpush.msra.mxu1 %v1377_v18  ;;  %1391 = vmatpush.msrb.mxu0 %v1360_v19 }
 0x596   : > { %1414 = vmatpush.msra.mxu1 %v1376_v20  ;;  %1392 = vmatpush.msrb.mxu0 %v1359_v21 }
 0x598   : > { %1415 = vmatpush.msra.mxu1 %v1375_v22 }
 0x59a   : > { %1416 = vmatpush.msra.mxu1 %v1374_v23 }
 0x59c   : > { %1417 = vmatpush.msra.mxu1 %v1373_v26 }
 0x59e   : > { %1418 = vmatpush.msra.mxu1 %v1372_v27 }
 0x5a0   : > { %1419 = vmatpush.msra.mxu1 %v1371_v30 }
 0x5a2   : > { %1420 = vmatpush.msra.mxu1 %v1370_v32 }
 0x5a4   : > { %1421 = vmatpush.msra.mxu1 %v1369_v33 }
 0x5a6   : > { %1422 = vmatpush.msra.mxu1 %v1368_v35 }
 0x5a8   : > { %1423 = vmatpush.msra.mxu1 %v1367_v37 }
 0x5aa   : > { %1424 = vmatpush.msra.mxu1 %v1366_v0 }
 0x5f9   : > { %v1174_v47 = vpop.xlane.xlu1 %1173 }
 0x5fa   : > { %v1184_v8 = vmul.f32 %v2204_v6, %v1174_v47 }
 0x5fc   : > { %v2207_v9 = vsub.f32 %v1169_v55, %v1184_v8 }
 0x5fe   : > { %v1188_v10 = vmul.f32 %v2207_v9, %v2207_v9 }
 0x600   : > { %1190 = vadd.xlane.f32.xlu2 %v1188_v10 }
 0x606   : > { %v1176_v11 = vpop.xlane.xlu0 %1175 }
 0x607   : > { %v1185_v12 = vmul.f32 %v2204_v6, %v1176_v11 }
 0x609   : > { %v2212_v13 = vsub.f32 %v1170_v59, %v1185_v12 }
 0x60b   : > { %v1189_v14 = vmul.f32 %v2212_v13, %v2212_v13 }
 0x60d   : > { %1192 = vadd.xlane.f32.xlu1 %v1189_v14 }
 0x673   : > { %v1191_v42 = vpop.xlane.xlu2 %1190 }
 0x674   : > { %v1194_v43 = vmul.f32 %v1191_v42, %v2204_v6 }
 0x676   : > { %v1196_v44 = vadd.f32 1e-05, %v1194_v43 }
 0x678   : > { %1754 = vrsqrt.f32 %v1196_v44  ;;  %vm1204_vm14 = vweird.f32 %v1196_v44 }
 0x67e   : > { %v1755_v49 = vpop.eup %1754 }
 0x67f   : > { %v1199_v51 = vmul.f32 %v1755_v49, %v1196_v44  ;;  %vm1205_vm13 = vweird.f32 %v1755_v49 }
 0x680   : > { %v1193_v3 = vpop.xlane.xlu1 %1192  ;;  %vm1206_vm15 = vmor %vm1204_vm14, %vm1205_vm13 }
 0x681   : > { %v1200_v54 = vmul.f32 %v1755_v49, %v1199_v51  ;;  %v1195_v55 = vmul.f32 %v1193_v3, %v2204_v6 }
 0x683   : > { %v1201_v59 = vmul.f32 0.5, %v1200_v54  ;;  %v1197_v58 = vadd.f32 1e-05, %v1195_v55 }
 0x685   : > { %v1202_v4 = vsub.f32 1.5, %v1201_v59  ;;  %1756 = vrsqrt.f32 %v1197_v58  ;;  %vm1214_vm1 = vweird.f32 %v1197_v58 }
 0x687   : > { %v1203_v60 = vmul.f32 %v1755_v49, %v1202_v4 }
 0x689   : > { %v1207_v62 = vsel %vm1206_vm15, %v1755_v49, %v1203_v60 }
 0x68a   : > { %v1218_v63 = vmul.f32 %v1207_v62, %v2207_v9 }
 0x68b   : > { %v1757_v5 = vpop.eup %1756 }
 0x68c   : > { %v1209_v7 = vmul.f32 %v1757_v5, %v1197_v58  ;;  %v1223_v41 = vmul.f32 %v1715_v61, %v1218_v63  ;;  %vm1215_vm0 = vweird.f32 %v1757_v5 }
 0x68d   : > { %vm1216_vm2 = vmor %vm1214_vm1, %vm1215_vm0 }
 0x68e   : > { %v1210_v47 = vmul.f32 %v1757_v5, %v1209_v7  ;;  %v2225_v8 = vadd.f32 %v1716_v2, %v1223_v41 }
 0x690   : > { %v1211_v10 = vmul.f32 0.5, %v1210_v47  ;;  %1284 = vmatmul.f32.vlgmr.msrb.gmra.mxu2 %v2225_v8  ;;  %1307 = vmatmul.f32.vlgmr.msra.gmra.mxu3 %v2225_v8 }
 0x692   : > { %v1212_v11 = vsub.f32 1.5, %v1211_v10 }
 0x694   : > { %v1213_v12 = vmul.f32 %v1757_v5, %v1212_v11 }
 0x696   : > { %v1217_v9 = vsel %vm1216_vm2, %v1757_v5, %v1213_v12 }
 0x697   : > { %v1219_v14 = vmul.f32 %v1217_v9, %v2212_v13  ;;  %v1358_v13 = vld [vmem:[#allocation7 + $0x40] sm:$0xff] }
 0x698   : > { %1393 = vmatpush.msrb.mxu0 %v1358_v13 }
 0x699   : > { %v1224_v15 = vmul.f32 %v1715_v61, %v1219_v14 }
 0x69a   : > { %1394 = vmatpush.msrb.mxu0 %v1357_v25 }
 0x69b   : > { %v2230_v16 = vadd.f32 %v1716_v2, %v1224_v15 }
 0x69c   : > { %1395 = vmatpush.msrb.mxu0 %v1356_v24  ;;  %v1717_v24 = vld [vmem:[%s2271_s11] ss:$0 sm:$0xff] }
 0x69d   : > { %1287 = vmatmul.f32.gmra.mxu2 %v2230_v16  ;;  %1310 = vmatmul.f32.gmra.mxu3 %v2230_v16 }
 0x69e   : > { %1396 = vmatpush.msrb.mxu0 %v1355_v28 }
 0x6a0   : > { %1397 = vmatpush.msrb.mxu0 %v1354_v31 }
 0x6a2   : > { %1398 = vmatpush.msrb.mxu0 %v1353_v29 }
 0x6a4   : > { %1399 = vmatpush.msrb.mxu0 %v1352_v34 }
 0x6a6   : > { %1400 = vmatpush.msrb.mxu0 %v1351_v36 }
 0x6a8   : > { %1401 = vmatpush.msrb.mxu0 %v1350_v38 }
 0x713   : > { %v1285_v42 = vpop.f32.mrf.mxu2  ;;  %v1308_v43 = vpop.f32.mrf.mxu3 }
 0x714   : > { %v1286_v44 = vadd.f32 %v1285_v42, %v1264_v39  ;;  %v1309_v45 = vadd.f32 %v1308_v43, %v1265_v40 }
 0x716   : > { %v1318_v46 = vmul.f32 0.044715, %v1286_v44  ;;  %v1319_v48 = vmul.f32 0.044715, %v1309_v45  ;;  %v1314_v5 = vmul.f32 0.5, %v1286_v44  ;;  %v1315_v10 = vmul.f32 0.5, %v1309_v45 }
 0x718   : > { %v1322_v49 = vmul.f32 %v1318_v46, %v1286_v44  ;;  %v1323_v50 = vmul.f32 %v1319_v48, %v1309_v45 }
 0x71a   : > { %v1326_v51 = vmul.f32 %v1322_v49, %v1286_v44  ;;  %v1327_v52 = vmul.f32 %v1323_v50, %v1309_v45 }
 0x71c   : > { %v1330_v53 = vadd.f32 %v1326_v51, %v1286_v44  ;;  %v1331_v3 = vadd.f32 %v1327_v52, %v1309_v45 }
 0x71e   : > { %v1334_v54 = vmul.f32 0.7978846, %v1330_v53  ;;  %v1335_v55 = vmul.f32 0.7978846, %v1331_v3 }
 0x720   : > { %v1288_v56 = vpop.f32.mrf.mxu2  ;;  %v1311_v57 = vpop.f32.mrf.mxu3  ;;  %1758 = vtanh.f32 %v1334_v54  ;;  %v1718_v54 = vld [vmem:[%s2272_s12] ss:$0 sm:$0xff] }
 0x721   : > { %v1289_v59 = vadd.f32 %v1288_v56, %v1264_v39  ;;  %v1312_v58 = vadd.f32 %v1311_v57, %v1265_v40  ;;  %1760 = vtanh.f32 %v1335_v55  ;;  %v1719_v56 = vld [vmem:[%s2285_s26] ss:$0 sm:$0xff] }
 0x723   : > { %v1320_v4 = vmul.f32 0.044715, %v1289_v59  ;;  %v1321_v60 = vmul.f32 0.044715, %v1312_v58  ;;  %v1316_v21 = vmul.f32 0.5, %v1289_v59  ;;  %v1317_v13 = vmul.f32 0.5, %v1312_v58 }
 0x725   : > { %v1324_v61 = vmul.f32 %v1320_v4, %v1289_v59  ;;  %v1325_v62 = vmul.f32 %v1321_v60, %v1312_v58 }
 0x726   : > { %v1759_v63 = vpop.eup %1758 }
 0x727   : > { %v1761_v2 = vpop.eup %1760  ;;  %v1342_v7 = vadd.f32 1.0, %v1759_v63  ;;  %v1328_v41 = vmul.f32 %v1324_v61, %v1289_v59  ;;  %v1329_v47 = vmul.f32 %v1325_v62, %v1312_v58 }
 0x728   : > { %v1343_v11 = vadd.f32 1.0, %v1761_v2 }
 0x729   : > { %v1346_v12 = vmul.f32 %v1342_v7, %v1314_v5  ;;  %v1332_v9 = vadd.f32 %v1328_v41, %v1289_v59  ;;  %v1333_v14 = vadd.f32 %v1329_v47, %v1312_v58 }
 0x72a   : > { %v1347_v15 = vmul.f32 %v1343_v11, %v1315_v10 }
 0x72b   : > { %1402 = vmatmul.f32.vlgmr.msrb.gmra.mxu0 %v1346_v12  ;;  %v1336_v17 = vmul.f32 0.7978846, %v1332_v9  ;;  %v1337_v18 = vmul.f32 0.7978846, %v1333_v14 }
 0x72c   : > { %1425 = vmatmul.f32.vlgmr.msra.gmra.mxu1 %v1347_v15 }
 0x72d   : > { %1762 = vtanh.f32 %v1336_v17 }
 0x72e   : > { %1764 = vtanh.f32 %v1337_v18 }
 0x733   : > { %v1763_v19 = vpop.eup %1762 }
 0x734   : > { %v1765_v20 = vpop.eup %1764  ;;  %v1344_v22 = vadd.f32 1.0, %v1763_v19 }
 0x735   : > { %v1345_v23 = vadd.f32 1.0, %v1765_v20 }
 0x736   : > { %v1348_v25 = vmul.f32 %v1344_v22, %v1316_v21 }
 0x737   : > { %v1349_v26 = vmul.f32 %v1345_v23, %v1317_v13 }
 0x738   : > { %1405 = vmatmul.f32.gmra.mxu0 %v1348_v25 }
 0x739   : > { %1428 = vmatmul.f32.gmra.mxu1 %v1349_v26 }
 0x7a8   : > { %v1403_v27 = vpop.f32.mrf.mxu0 }
 0x7a9   : > { %v1404_v28 = vadd.f32 %v1717_v24, %v1403_v27  ;;  %v1426_v30 = vpop.f32.mrf.mxu1 }
 0x7ab   : > { %v1427_v31 = vadd.f32 %v1426_v30, %v1404_v28 }
 0x7ad   : > { %v1432_v32 = vadd.f32 %v1427_v31, %v2225_v8 }
 0x7af   : > { %1436 = vadd.xlane.f32.xlu0 %v1432_v32 }
 0x7b5   : > { %v1406_v29 = vpop.f32.mrf.mxu0 }
 0x7b6   : > { %v1407_v33 = vadd.f32 %v1717_v24, %v1406_v29  ;;  %v1429_v34 = vpop.f32.mrf.mxu1 }
 0x7b8   : > { %v1430_v35 = vadd.f32 %v1429_v34, %v1407_v33 }
 0x7ba   : > { %v1433_v36 = vadd.f32 %v1430_v35, %v2230_v16 }
 0x7bc   : > { %1438 = vadd.xlane.f32.xlu1 %v1433_v36 }
 0x822   : > { %v1437_v37 = vpop.xlane.xlu0 %1436 }
 0x823   : > { %v1440_v38 = vmul.f32 %v1437_v37, %v2204_v6 }
 0x825   : > { %v1442_v0 = vsub.f32 %v1432_v32, %v1440_v38 }
 0x827   : > { %v1444_v1 = vmul.f32 %v1442_v0, %v1442_v0 }
 0x829   : > { %1446 = vadd.xlane.f32.xlu0 %v1444_v1 }
 0x82f   : > { %v1439_v39 = vpop.xlane.xlu1 %1438 }
 0x830   : > { %v1441_v40 = vmul.f32 %v1439_v39, %v2204_v6 }
 0x832   : > { %v1443_v42 = vsub.f32 %v1433_v36, %v1441_v40 }
 0x834   : > { %v1445_v43 = vmul.f32 %v1443_v42, %v1443_v42 }
 0x836   : > { %1448 = vadd.xlane.f32.xlu1 %v1445_v43 }
 0x89c   : > { %v1447_v8 = vpop.xlane.xlu0 %1446 }
 0x89d   : > { %v1450_v44 = vmul.f32 %v1447_v8, %v2204_v6 }
 0x89f   : > { %v1452_v45 = vadd.f32 1e-05, %v1450_v44 }
 0x8a1   : > { %1766 = vrsqrt.f32 %v1452_v45  ;;  %vm1460_vm4 = vweird.f32 %v1452_v45 }
 0x8a7   : > { %v1767_v46 = vpop.eup %1766 }
 0x8a8   : > { %v1455_v16 = vmul.f32 %v1767_v46, %v1452_v45  ;;  %vm1461_vm3 = vweird.f32 %v1767_v46 }
 0x8a9   : > { %v1449_v48 = vpop.xlane.xlu1 %1448  ;;  %vm1462_vm5 = vmor %vm1460_vm4, %vm1461_vm3 }
 0x8aa   : > { %v1456_v49 = vmul.f32 %v1767_v46, %v1455_v16  ;;  %v1451_v50 = vmul.f32 %v1449_v48, %v2204_v6 }
 0x8ac   : > { %v1457_v51 = vmul.f32 0.5, %v1456_v49  ;;  %v1453_v52 = vadd.f32 1e-05, %v1451_v50 }
 0x8ae   : > { %v1458_v53 = vsub.f32 1.5, %v1457_v51  ;;  %1768 = vrsqrt.f32 %v1453_v52  ;;  %vm1470_vm7 = vweird.f32 %v1453_v52 }
 0x8b0   : > { %v1459_v3 = vmul.f32 %v1767_v46, %v1458_v53 }
 0x8b2   : > { %v1463_v55 = vsel %vm1462_vm5, %v1767_v46, %v1459_v3 }
 0x8b3   : > { %v1474_v57 = vmul.f32 %v1463_v55, %v1442_v0 }
 0x8b4   : > { %v1769_v6 = vpop.eup %1768 }
 0x8b5   : > { %v1479_v59 = vmul.f32 %v1718_v54, %v1474_v57  ;;  %v1465_v58 = vmul.f32 %v1769_v6, %v1453_v52  ;;  %vm1471_vm6 = vweird.f32 %v1769_v6 }
 0x8b6   : > { %vm1472_vm8 = vmor %vm1470_vm7, %vm1471_vm6 }
 0x8b7   : > { %v1484_v4 = vadd.f32 %v1719_v56, %v1479_v59  ;;  %v1466_v60 = vmul.f32 %v1769_v6, %v1465_v58 }
 0x8b9   : > { %1486 = vst [vmem:[%s548_s19] sm:$0xff] %v1484_v4  ;;  %v1467_v61 = vmul.f32 0.5, %v1466_v60 }
 0x8bb   : > { %v1468_v62 = vsub.f32 1.5, %v1467_v61 }
 0x8bd   : > { %v1469_v63 = vmul.f32 %v1769_v6, %v1468_v62 }
 0x8bf   : > { %v1473_v2 = vsel %vm1472_vm8, %v1769_v6, %v1469_v63 }
 0x8c0   : > { %v1475_v5 = vmul.f32 %v1473_v2, %v1443_v42 }
 0x8c2   : > { %v1480_v7 = vmul.f32 %v1718_v54, %v1475_v5 }
 0x8c4   : > { %v1485_v41 = vadd.f32 %v1719_v56, %v1480_v7 }
 0x8c6   : > { %1487 = vst [vmem:[%s548_s19 + $0x8] sm:$0xff] %v1485_v41 }
 0x8c7 PF: > { %s2287_s17 = sld [smem:[#allocation12_spill]] }
 0x8cd   : > { %s27_s29 = sadd.s32 1, %s2287_s17  }
 0x8ce   : > { %p24_p7 = scmp.ge.s32.totalorder %s27_s29, 4  }
 0x8d0   :  { %26 = sbr.rel (!%p24_p7) target bundleno = 8 (0x8), region = 126 }
 0x8d5   :  { %1509 = vsyncpa [#allocation3], 1 }
 0x8d6   :  { %1511 = vsyncpa [#allocation3 + $0x1], 1 }
 0x8d7   :  { %1512 = vsyncpa [#allocation5], 1 }
 0x8d8   :  { %1513 = vsyncpa [#allocation8], 1 }

</bundles_post_ra>
